<compile_context>
chip_gen: v7x
topology: tpu7x:2x2x1
jax: 0.10.0
libtpu: 0.0.40
codegen_flags: <defaults>
</compile_context>

<pallas_src>
import jax
import jax.numpy as jnp
from jax.experimental import pallas as pl
from jax.experimental.pallas import tpu as pltpu

# ---- UNetVanilla config (matches module __init__ semantics) ------------------
SPATIAL_DIMS = 2
IN_CHANNELS = 4
OUT_CHANNELS = 3
CHANNELS = (8, 16, 32)
STRIDES = (1, 2, 2)
KERNEL_SIZE = 3          # kernel_size == up_kernel_size == 3
NUM_RES_UNITS = 0        # default -> exactly one ResidualUnit per scale
EPS = 1e-5               # nn.InstanceNorm2d default eps
# dropout=0.0 -> identity; adn_ordering='NDA' -> Norm, (Drop), Act


# ----------------------------- Pallas kernels ---------------------------------
def _conv_kernel(x_ref, w_ref, b_ref, o_ref):
    """Plain conv (pre_conv): o = w (Cout,K) @ x (K,P) + b, lane-dense output."""
    y = jnp.dot(w_ref[...], x_ref[0], preferred_element_type=jnp.float32)
    o_ref[0] = (y + b_ref[...]).astype(o_ref.dtype)


def _make_resunit_kernel(Wp, Pw, n_valid, shared_res, has_proj):
    """Fused MONAI ResidualUnit (subunits=2, NDA, InstanceNorm, PReLU).

    Column layout for all (C, Pw) tensors: row-major over (Ho, Wp) where only
    the first Wo columns of each Wp-wide row are valid (mask=1); the trailing
    Wp-Wo columns are zero/garbage and are sliced off outside the kernel.
    """
    inv_n = 1.0 / float(n_valid)

    def kernel(*refs):
        it = iter(refs)
        p0_ref = next(it)                       # (1, K0, Pw) bf16 conv0 patches
        w0_ref = next(it)                       # (C1, K0)    bf16
        b0_ref = next(it)                       # (C1, 1)     f32
        pr_ref = p0_ref if shared_res else next(it)   # residual-path patches
        wr_ref = next(it)                       # (C1, Kr)    bf16
        br_ref = next(it)                       # (C1, 1)     f32
        w1_ref = next(it)                       # (9, C1, C1) f32 (tap-major)
        b1_ref = next(it)                       # (C1, 1)     f32
        m_ref = next(it)                        # (1, Pw)     f32 validity mask
        a_ref = next(it)                        # (1, 2)      f32 PReLU alphas (SMEM)
        wo_ref = next(it) if has_proj else None  # (Cf, C1)   f32 final 1x1 conv
        bo_ref = next(it) if has_proj else None  # (Cf, 1)    f32
        o_ref = next(it)                        # (1, Cf, Pw) f32
        hpad_ref = next(it)                     # (C1, Lp)    f32 VMEM scratch

        mask = m_ref[...]                       # (1, Pw)
        a0 = a_ref[0, 0]
        a1 = a_ref[0, 1]

        def inorm(y):
            # InstanceNorm2d(affine=False): masked biased stats over valid cols.
            mean = jnp.sum(y * mask, axis=1, keepdims=True) * inv_n
            d = (y - mean) * mask
            var = jnp.sum(d * d, axis=1, keepdims=True) * inv_n
            return (y - mean) * jax.lax.rsqrt(var + EPS)

        def prelu(y, a):
            return jnp.where(y >= 0, y, a * y)

        # ---- subunit 0: conv (patches pre-built) + IN + PReLU ----------------
        y0 = jnp.dot(w0_ref[...], p0_ref[0],
                     preferred_element_type=jnp.float32) + b0_ref[...]
        h = prelu(inorm(y0), a0)                # (C1, Pw) f32

        # ---- residual path conv (1x1 or strided 3x3, patches pre-built) ------
        res = jnp.dot(wr_ref[...], pr_ref[0],
                      preferred_element_type=jnp.float32) + br_ref[...]

        # ---- subunit 1: 3x3 / stride 1 / pad 1 conv, im2col done in-kernel ---
        # Zero the padded flat buffer, drop the (masked) activation in at flat
        # offset Wp+1; the zeroed pad columns double as the conv's zero padding.
        hpad_ref[...] = jnp.zeros_like(hpad_ref)
        hpad_ref[:, Wp + 1:Wp + 1 + Pw] = (h * mask).astype(hpad_ref.dtype)

        z = jnp.zeros_like(h)
        for t in range(9):                      # 9 shifted-slice matmuls
            off = (t // 3) * Wp + (t % 3)
            z = z + jnp.dot(w1_ref[t], hpad_ref[:, off:off + Pw],
                            preferred_element_type=jnp.float32)
        y1 = prelu(inorm(z + b1_ref[...]), a1) + res

        # ---- optional fused final 1x1 output conv ----------------------------
        if has_proj:
            y1 = jnp.dot(wo_ref[...], y1,
                         preferred_element_type=jnp.float32) + bo_ref[...]
        o_ref[0] = y1.astype(o_ref.dtype)

    return kernel


# ----------------------------- plain-JAX glue ---------------------------------
def _im2col_cols(x, kh, kw, stride, pad, wp_out=None):
    """x: (N,C,H,W) -> bf16 patches (N, kh*kw*C, Ho*wp_out).

    Feature order: tap-major / channel-minor. Spatial columns are row-major
    over (Ho, wp_out) with zeros in the trailing wp_out-Wo columns of each row.
    """
    x = x.astype(jnp.bfloat16)
    N, C, H, W = x.shape
    Ho = (H + 2 * pad - kh) // stride + 1
    Wo = (W + 2 * pad - kw) // stride + 1
    if wp_out is None:
        wp_out = Wo
    xp = jnp.pad(x, ((0, 0), (0, 0), (pad, pad), (pad, pad)))
    taps = []
    for dy in range(kh):
        for dx in range(kw):
            taps.append(xp[:, :, dy:dy + stride * Ho:stride,
                           dx:dx + stride * Wo:stride])
    p = jnp.stack(taps, axis=1).reshape(N, kh * kw * C, Ho, Wo)
    if wp_out > Wo:
        p = jnp.pad(p, ((0, 0), (0, 0), (0, 0), (0, wp_out - Wo)))
    return p.reshape(N, kh * kw * C, Ho * wp_out), Ho, Wo


def conv2d_pallas(x, w_mat, b_col, k, stride, pad):
    """MONAI Convolution(conv_only=True) in transposed (Cout, P) layout."""
    N = x.shape[0]
    Cout, K = w_mat.shape
    patches, Ho, Wo = _im2col_cols(x, k, k, stride, pad)
    P = Ho * Wo
    out = pl.pallas_call(
        _conv_kernel,
        out_shape=jax.ShapeDtypeStruct((N, Cout, P), jnp.float32),
        grid=(N,),
        in_specs=[
            pl.BlockSpec((1, K, P), lambda n: (n, 0, 0)),
            pl.BlockSpec((Cout, K), lambda n: (0, 0)),
            pl.BlockSpec((Cout, 1), lambda n: (0, 0)),
        ],
        out_specs=pl.BlockSpec((1, Cout, P), lambda n: (n, 0, 0)),
        compiler_params=pltpu.CompilerParams(dimension_semantics=("parallel",)),
    )(patches, w_mat, b_col)
    return out.reshape(N, Cout, Ho, Wo)


def residual_unit(x, p, stride, final_proj=None):
    """One fused pallas_call for a whole MONAI ResidualUnit (+ optional 1x1 out)."""
    N, Cin, H, W = x.shape
    C1 = p["w0"].shape[0]
    Ho = (H + 2 - 3) // stride + 1
    Wo = (W + 2 - 3) // stride + 1
    Wp = Wo + 2                      # valid width + 2 zeroed pad columns
    Pw = Ho * Wp
    Lp = Pw + 2 * Wp + 8             # padded flat buffer length (with tail slack)

    # conv0 patches (stride handled here); residual conv shares them when strided
    p0, _, _ = _im2col_cols(x, 3, 3, stride, 1, Wp)
    shared_res = stride != 1         # strided residual conv = 3x3/stride/pad1 (same patches)

    args = [p0, p["w0"], p["b0"]]
    in_specs = [
        pl.BlockSpec((1, p0.shape[1], Pw), lambda n: (n, 0, 0)),
        pl.BlockSpec(p["w0"].shape, lambda n: (0, 0)),
        pl.BlockSpec((C1, 1), lambda n: (0, 0)),
    ]
    if not shared_res:               # non-strided residual path: 1x1 conv
        pr, _, _ = _im2col_cols(x, 1, 1, 1, 0, Wp)
        args.append(pr)
        in_specs.append(pl.BlockSpec((1, pr.shape[1], Pw), lambda n: (n, 0, 0)))

    mask = (jnp.arange(Pw) % Wp < Wo).astype(jnp.float32).reshape(1, Pw)
    alphas = jnp.stack([p["a0"], p["a1"]]).astype(jnp.float32).reshape(1, 2)

    args += [p["wr"], p["br"], p["w1t"], p["b1"], mask, alphas]
    in_specs += [
        pl.BlockSpec(p["wr"].shape, lambda n: (0, 0)),
        pl.BlockSpec((C1, 1), lambda n: (0, 0)),
        pl.BlockSpec(p["w1t"].shape, lambda n: (0, 0, 0)),
        pl.BlockSpec((C1, 1), lambda n: (0, 0)),
        pl.BlockSpec((1, Pw), lambda n: (0, 0)),
        pl.BlockSpec(memory_space=pltpu.MemorySpace.SMEM),
    ]

    Cf = C1
    if final_proj is not None:
        wo, bo = final_proj
        Cf = wo.shape[0]
        args += [wo, bo]
        in_specs += [
            pl.BlockSpec(wo.shape, lambda n: (0, 0)),
            pl.BlockSpec((Cf, 1), lambda n: (0, 0)),
        ]

    out = pl.pallas_call(
        _make_resunit_kernel(Wp, Pw, Ho * Wo, shared_res, final_proj is not None),
        out_shape=jax.ShapeDtypeStruct((N, Cf, Pw), jnp.float32),
        grid=(N,),
        in_specs=in_specs,
        out_specs=pl.BlockSpec((1, Cf, Pw), lambda n: (n, 0, 0)),
        scratch_shapes=[pltpu.VMEM((C1, Lp), jnp.float32)],
        compiler_params=pltpu.CompilerParams(dimension_semantics=("parallel",)),
    )(*args)
    # drop the pad columns -> dense NCHW
    return out.reshape(N, Cf, Ho, Wp)[:, :, :, :Wo]


def unet_forward(x, params):
    """x: (N, Cin, H, W) NCHW -> (N, OUT_CHANNELS, H, W) NCHW."""
    x = conv2d_pallas(x, params["pre_w"], params["pre_b"], 3, STRIDES[0], 1)
    skips = [x]
    for i, dp in enumerate(params["down"]):                       # encoder
        x = residual_unit(x, dp, stride=STRIDES[i + 1])
        skips.append(x)
    L = len(CHANNELS)
    n_up = len(params["up"])
    for j, up in enumerate(params["up"]):                         # decoder
        c = L - 2 - j
        f = STRIDES[c + 1]                                        # saved_strides[c]
        if f != 1:
            # TODO(synk): nearest-upsample + channel concat stay as XLA glue
            # (not folded into the conv's in-kernel load path).
            x = jnp.repeat(jnp.repeat(x, f, axis=2), f, axis=3)   # nn.Upsample nearest
        x = jnp.concatenate([skips[c], x], axis=1)                # concat((skip, x), dim=1)
        fin = (params["out_w"], params["out_b"]) if j == n_up - 1 else None
        x = residual_unit(x, up, stride=1, final_proj=fin)        # last unit fuses out conv
    return x


# ----------------------------- parameters -------------------------------------
def _conv_params(key, cin, cout, k, dtype=jnp.bfloat16):
    """Returns pre-packed weight (Cout, k*k*Cin) [tap-major/channel-minor] + (Cout,1) bias."""
    k1, k2 = jax.random.split(key)
    fan_in = k * k * cin
    w = jax.random.normal(k1, (cout, cin, k, k), jnp.float32) / jnp.sqrt(fan_in)
    b = jax.random.normal(k2, (cout,), jnp.float32) * 0.01
    w_mat = jnp.transpose(w, (0, 2, 3, 1)).reshape(cout, fan_in).astype(dtype)
    return w_mat, b.reshape(cout, 1)


def _conv_params_taps(key, cin, cout, k=3):
    """Returns per-tap weights (k*k, Cout, Cin) for the in-kernel conv + (Cout,1) bias."""
    k1, k2 = jax.random.split(key)
    fan_in = k * k * cin
    w = jax.random.normal(k1, (cout, cin, k, k), jnp.float32) / jnp.sqrt(fan_in)
    b = jax.random.normal(k2, (cout,), jnp.float32) * 0.01
    w_taps = jnp.transpose(w, (2, 3, 0, 1)).reshape(k * k, cout, cin)   # f32 (VMEM-resident)
    return w_taps, b.reshape(cout, 1)


def init_params(key):
    keys = iter(jax.random.split(key, 64))
    p = {}
    p["pre_w"], p["pre_b"] = _conv_params(next(keys), IN_CHANNELS, CHANNELS[0], 3)
    p["down"] = []
    for s in range(1, len(CHANNELS)):
        cin, cout, stride = CHANNELS[s - 1], CHANNELS[s], STRIDES[s]
        d = {}
        d["w0"], d["b0"] = _conv_params(next(keys), cin, cout, 3)
        d["a0"] = jnp.float32(0.25)                 # nn.PReLU() default
        d["w1t"], d["b1"] = _conv_params_taps(next(keys), cout, cout, 3)
        d["a1"] = jnp.float32(0.25)
        rk = 3 if stride != 1 else 1                # ResidualUnit residual conv
        d["wr"], d["br"] = _conv_params(next(keys), cin, cout, rk)
        p["down"].append(d)
    p["up"] = []
    for c in range(len(CHANNELS) - 2, -1, -1):
        cin = CHANNELS[c + 1] + CHANNELS[c]
        cout = CHANNELS[c]
        u = {}
        u["w0"], u["b0"] = _conv_params(next(keys), cin, cout, 3)
        u["a0"] = jnp.float32(0.25)
        u["w1t"], u["b1"] = _conv_params_taps(next(keys), cout, cout, 3)
        u["a1"] = jnp.float32(0.25)
        u["wr"], u["br"] = _conv_params(next(keys), cin, cout, 1)   # 1x1 residual
        p["up"].append(u)
    p["out_w"], p["out_b"] = _conv_params(next(keys), CHANNELS[0], OUT_CHANNELS, 1,
                                          dtype=jnp.float32)
    return p


# ----------------------------------- main --------------------------------------
if __name__ == "__main__":
    key = jax.random.PRNGKey(0)
    pkey, xkey = jax.random.split(key)
    params = init_params(pkey)
    x = jax.random.normal(xkey, (2, IN_CHANNELS, 16, 16), jnp.float32)

    y = jax.jit(unet_forward)(x, params)
    y = jax.block_until_ready(y)
    assert y.shape == (2, OUT_CHANNELS, 16, 16), y.shape
    assert bool(jnp.all(jnp.isfinite(y)))
    # TODO(synk): the `modalities` arg of SequentialWIthModalities is unused by
    # plain ResidualUnit layers and therefore not modeled.
    print("KERNEL_OK")
</pallas_src>

<mosaic_0001>
module attributes {stable_mosaic.version = 11 : i64} {
  func.func @_conv_kernel(%arg0: i32, %arg1: memref<1x36x256xbf16, #tpu.memory_space<vmem>>, %arg2: memref<8x36xbf16, #tpu.memory_space<vmem>>, %arg3: memref<8x1xf32, #tpu.memory_space<vmem>>, %arg4: memref<1x8x256xf32, #tpu.memory_space<vmem>>) attributes {dimension_semantics = [#tpu.dimension_semantics<parallel>], iteration_bounds = array<i64: 2>, scalar_prefetch = 0 : i64, scratch_operands = 0 : i64, tpu.core_type = #tpu.core_type<tc>, window_params = [{transform_indices = @transform_0, window_bounds = array<i64: 1, 36, 256>}, {pipeline_mode = #tpu.pipeline_mode<synchronous>, transform_indices = @transform_1, window_bounds = array<i64: 8, 36>}, {pipeline_mode = #tpu.pipeline_mode<synchronous>, transform_indices = @transform_2, window_bounds = array<i64: 8, 1>}, {transform_indices = @transform_3, window_bounds = array<i64: 1, 8, 256>}]} {
    %c0 = arith.constant 0 : index
    %c0_0 = arith.constant 0 : index
    %0 = vector.load %arg2[%c0, %c0_0] : memref<8x36xbf16, #tpu.memory_space<vmem>>, vector<8x36xbf16>
    %c0_1 = arith.constant 0 : index
    %c0_2 = arith.constant 0 : index
    %c0_3 = arith.constant 0 : index
    %1 = vector.load %arg1[%c0_1, %c0_2, %c0_3] : memref<1x36x256xbf16, #tpu.memory_space<vmem>>, vector<1x36x256xbf16>
    %2 = vector.shape_cast %1 : vector<1x36x256xbf16> to vector<36x256xbf16>
    %cst = arith.constant dense<0.000000e+00> : vector<8x256xf32>
    %3 = tpu.matmul %0, %2, %cst {dimension_numbers = #tpu.dot_dimension_numbers<[1], [0], [0], [1], [0, 0, 1, 1], [], []>} : vector<8x36xbf16>, vector<36x256xbf16>, vector<8x256xf32> -> vector<8x256xf32>
    %c0_4 = arith.constant 0 : index
    %c0_5 = arith.constant 0 : index
    %4 = vector.load %arg3[%c0_4, %c0_5] : memref<8x1xf32, #tpu.memory_space<vmem>>, vector<8x1xf32>
    %5 = vector.broadcast %4 : vector<8x1xf32> to vector<8x256xf32>
    %6 = arith.addf %3, %5 : vector<8x256xf32>
    %c0_6 = arith.constant 0 : index
    %c0_7 = arith.constant 0 : index
    %c0_8 = arith.constant 0 : index
    %7 = vector.load %arg4[%c0_6, %c0_7, %c0_8] : memref<1x8x256xf32, #tpu.memory_space<vmem>>, vector<1x8x256xf32>
    %8 = vector.shape_cast %7 : vector<1x8x256xf32> to vector<8x256xf32>
    %9 = vector.shape_cast %6 : vector<8x256xf32> to vector<1x8x256xf32>
    tpu.vector_store %arg4[%c0_6, %c0_7, %c0_8], %9 {strides = array<i32>} : memref<1x8x256xf32, #tpu.memory_space<vmem>>, vector<1x8x256xf32>,
    return
  }
  func.func @transform_0(%arg0: i32) -> (i32, i32, i32) {
    %c0_i32 = arith.constant 0 : i32
    %c0_i32_0 = arith.constant 0 : i32
    %c0_i32_1 = arith.constant 0 : i32
    return %arg0, %c0_i32, %c0_i32_0 : i32, i32, i32
  }
  func.func @transform_1(%arg0: i32) -> (i32, i32) {
    %c0_i32 = arith.constant 0 : i32
    %c0_i32_0 = arith.constant 0 : i32
    %c0_i32_1 = arith.constant 0 : i32
    return %c0_i32, %c0_i32_0 : i32, i32
  }
  func.func @transform_2(%arg0: i32) -> (i32, i32) {
    %c0_i32 = arith.constant 0 : i32
    %c0_i32_0 = arith.constant 0 : i32
    %c0_i32_1 = arith.constant 0 : i32
    return %c0_i32, %c0_i32_0 : i32, i32
  }
  func.func @transform_3(%arg0: i32) -> (i32, i32, i32) {
    %c0_i32 = arith.constant 0 : i32
    %c0_i32_0 = arith.constant 0 : i32
    %c0_i32_1 = arith.constant 0 : i32
    return %arg0, %c0_i32, %c0_i32_0 : i32, i32, i32
  }
}

module attributes {stable_mosaic.version = 11 : i64} {
  func.func @kernel(%arg0: i32, %arg1: memref<1x72x80xbf16, #tpu.memory_space<vmem>>, %arg2: memref<16x72xbf16, #tpu.memory_space<vmem>>, %arg3: memref<16x1xf32, #tpu.memory_space<vmem>>, %arg4: memref<16x72xbf16, #tpu.memory_space<vmem>>, %arg5: memref<16x1xf32, #tpu.memory_space<vmem>>, %arg6: memref<9x16x16xf32, #tpu.memory_space<vmem>>, %arg7: memref<16x1xf32, #tpu.memory_space<vmem>>, %arg8: memref<1x80xf32, #tpu.memory_space<vmem>>, %arg9: memref<1x2xf32, #tpu.memory_space<smem>>, %arg10: memref<1x16x80xf32, #tpu.memory_space<vmem>>, %arg11: memref<16x108xf32, #tpu.memory_space<vmem>>) attributes {dimension_semantics = [#tpu.dimension_semantics<parallel>], iteration_bounds = array<i64: 2>, scalar_prefetch = 0 : i64, scratch_operands = 1 : i64, tpu.core_type = #tpu.core_type<tc>, window_params = [{transform_indices = @transform_0, window_bounds = array<i64: 1, 72, 80>}, {pipeline_mode = #tpu.pipeline_mode<synchronous>, transform_indices = @transform_1, window_bounds = array<i64: 16, 72>}, {pipeline_mode = #tpu.pipeline_mode<synchronous>, transform_indices = @transform_2, window_bounds = array<i64: 16, 1>}, {pipeline_mode = #tpu.pipeline_mode<synchronous>, transform_indices = @transform_3, window_bounds = array<i64: 16, 72>}, {pipeline_mode = #tpu.pipeline_mode<synchronous>, transform_indices = @transform_4, window_bounds = array<i64: 16, 1>}, {pipeline_mode = #tpu.pipeline_mode<synchronous>, transform_indices = @transform_5, window_bounds = array<i64: 9, 16, 16>}, {pipeline_mode = #tpu.pipeline_mode<synchronous>, transform_indices = @transform_6, window_bounds = array<i64: 16, 1>}, {pipeline_mode = #tpu.pipeline_mode<synchronous>, transform_indices = @transform_7, window_bounds = array<i64: 1, 80>}, {transform_indices = @transform_8, window_bounds = array<i64: 1, 2>}, {transform_indices = @transform_9, window_bounds = array<i64: 1, 16, 80>}]} {
    %c0 = arith.constant 0 : index
    %c0_0 = arith.constant 0 : index
    %0 = vector.load %arg8[%c0, %c0_0] : memref<1x80xf32, #tpu.memory_space<vmem>>, vector<1x80xf32>
    %c0_1 = arith.constant 0 : index
    %c0_2 = arith.constant 0 : index
    %1 = memref.load %arg9[%c0_1, %c0_2] : memref<1x2xf32, #tpu.memory_space<smem>>
    %c0_3 = arith.constant 0 : index
    %c1 = arith.constant 1 : index
    %2 = memref.load %arg9[%c0_3, %c1] : memref<1x2xf32, #tpu.memory_space<smem>>
    %c0_4 = arith.constant 0 : index
    %c0_5 = arith.constant 0 : index
    %3 = vector.load %arg2[%c0_4, %c0_5] : memref<16x72xbf16, #tpu.memory_space<vmem>>, vector<16x72xbf16>
    %c0_6 = arith.constant 0 : index
    %c0_7 = arith.constant 0 : index
    %c0_8 = arith.constant 0 : index
    %4 = vector.load %arg1[%c0_6, %c0_7, %c0_8] : memref<1x72x80xbf16, #tpu.memory_space<vmem>>, vector<1x72x80xbf16>
    %5 = vector.shape_cast %4 : vector<1x72x80xbf16> to vector<72x80xbf16>
    %cst = arith.constant dense<0.000000e+00> : vector<16x80xf32>
    %6 = tpu.matmul %3, %5, %cst {dimension_numbers = #tpu.dot_dimension_numbers<[1], [0], [0], [1], [0, 0, 1, 1], [], []>} : vector<16x72xbf16>, vector<72x80xbf16>, vector<16x80xf32> -> vector<16x80xf32>
    %c0_9 = arith.constant 0 : index
    %c0_10 = arith.constant 0 : index
    %7 = vector.load %arg3[%c0_9, %c0_10] : memref<16x1xf32, #tpu.memory_space<vmem>>, vector<16x1xf32>
    %8 = vector.broadcast %7 : vector<16x1xf32> to vector<16x80xf32>
    %9 = arith.addf %6, %8 : vector<16x80xf32>
    %10 = vector.broadcast %0 : vector<1x80xf32> to vector<16x80xf32>
    %11 = arith.mulf %9, %10 : vector<16x80xf32>
    %cst_11 = arith.constant dense<0.000000e+00> : vector<16xf32>
    %12 = vector.multi_reduction <add>, %11, %cst_11 [1] : vector<16x80xf32> to vector<16xf32>
    %13 = vector.shape_cast %12 : vector<16xf32> to vector<16x1xf32>
    %cst_12 = arith.constant 1.562500e-02 : f32
    %14 = vector.broadcast %cst_12 : f32 to vector<16x1xf32>
    %15 = arith.mulf %13, %14 : vector<16x1xf32>
    %16 = vector.broadcast %15 : vector<16x1xf32> to vector<16x80xf32>
    %17 = arith.subf %9, %16 : vector<16x80xf32>
    %18 = vector.broadcast %0 : vector<1x80xf32> to vector<16x80xf32>
    %19 = arith.mulf %17, %18 : vector<16x80xf32>
    %20 = arith.mulf %19, %19 : vector<16x80xf32>
    %cst_13 = arith.constant dense<0.000000e+00> : vector<16xf32>
    %21 = vector.multi_reduction <add>, %20, %cst_13 [1] : vector<16x80xf32> to vector<16xf32>
    %22 = vector.shape_cast %21 : vector<16xf32> to vector<16x1xf32>
    %cst_14 = arith.constant 1.562500e-02 : f32
    %23 = vector.broadcast %cst_14 : f32 to vector<16x1xf32>
    %24 = arith.mulf %22, %23 : vector<16x1xf32>
    %25 = vector.broadcast %15 : vector<16x1xf32> to vector<16x80xf32>
    %26 = arith.subf %9, %25 : vector<16x80xf32>
    %cst_15 = arith.constant 9.99999974E-6 : f32
    %27 = vector.broadcast %cst_15 : f32 to vector<16x1xf32>
    %28 = arith.addf %24, %27 : vector<16x1xf32>
    %29 = math.rsqrt %28 : vector<16x1xf32>
    %30 = vector.broadcast %29 : vector<16x1xf32> to vector<16x80xf32>
    %31 = arith.mulf %26, %30 : vector<16x80xf32>
    %cst_16 = arith.constant 0.000000e+00 : f32
    %32 = vector.broadcast %cst_16 : f32 to vector<16x80xf32>
    %33 = arith.cmpf oge, %31, %32 : vector<16x80xf32>
    %34 = vector.broadcast %1 : f32 to vector<16x80xf32>
    %35 = arith.mulf %34, %31 : vector<16x80xf32>
    %36 = arith.select %33, %31, %35 : vector<16x80xi1>, vector<16x80xf32>
    %c0_17 = arith.constant 0 : index
    %c0_18 = arith.constant 0 : index
    %37 = vector.load %arg4[%c0_17, %c0_18] : memref<16x72xbf16, #tpu.memory_space<vmem>>, vector<16x72xbf16>
    %c0_19 = arith.constant 0 : index
    %c0_20 = arith.constant 0 : index
    %c0_21 = arith.constant 0 : index
    %38 = vector.load %arg1[%c0_19, %c0_20, %c0_21] : memref<1x72x80xbf16, #tpu.memory_space<vmem>>, vector<1x72x80xbf16>
    %39 = vector.shape_cast %38 : vector<1x72x80xbf16> to vector<72x80xbf16>
    %cst_22 = arith.constant dense<0.000000e+00> : vector<16x80xf32>
    %40 = tpu.matmul %37, %39, %cst_22 {dimension_numbers = #tpu.dot_dimension_numbers<[1], [0], [0], [1], [0, 0, 1, 1], [], []>} : vector<16x72xbf16>, vector<72x80xbf16>, vector<16x80xf32> -> vector<16x80xf32>
    %c0_23 = arith.constant 0 : index
    %c0_24 = arith.constant 0 : index
    %41 = vector.load %arg5[%c0_23, %c0_24] : memref<16x1xf32, #tpu.memory_space<vmem>>, vector<16x1xf32>
    %42 = vector.broadcast %41 : vector<16x1xf32> to vector<16x80xf32>
    %43 = arith.addf %40, %42 : vector<16x80xf32>
    %cst_25 = arith.constant 0.000000e+00 : f32
    %44 = vector.broadcast %cst_25 : f32 to vector<16x108xf32>
    %c0_26 = arith.constant 0 : index
    %c0_27 = arith.constant 0 : index
    %45 = vector.load %arg11[%c0_26, %c0_27] : memref<16x108xf32, #tpu.memory_space<vmem>>, vector<16x108xf32>
    tpu.vector_store %arg11[%c0_26, %c0_27], %44 {strides = array<i32>} : memref<16x108xf32, #tpu.memory_space<vmem>>, vector<16x108xf32>,
    %46 = vector.broadcast %0 : vector<1x80xf32> to vector<16x80xf32>
    %47 = arith.mulf %36, %46 : vector<16x80xf32>
    %c0_28 = arith.constant 0 : index
    %c11 = arith.constant 11 : index
    %48 = vector.load %arg11[%c0_28, %c11] : memref<16x108xf32, #tpu.memory_space<vmem>>, vector<16x80xf32>
    tpu.vector_store %arg11[%c0_28, %c11], %47 {strides = array<i32>} : memref<16x108xf32, #tpu.memory_space<vmem>>, vector<16x80xf32>,
    %cst_29 = arith.constant 0.000000e+00 : f32
    %49 = vector.broadcast %cst_29 : f32 to vector<16x80xf32>
    %c0_30 = arith.constant 0 : index
    %c0_31 = arith.constant 0 : index
    %c0_32 = arith.constant 0 : index
    %50 = vector.load %arg6[%c0_30, %c0_31, %c0_32] : memref<9x16x16xf32, #tpu.memory_space<vmem>>, vector<1x16x16xf32>
    %51 = vector.shape_cast %50 : vector<1x16x16xf32> to vector<16x16xf32>
    %c0_33 = arith.constant 0 : index
    %c0_34 = arith.constant 0 : index
    %52 = vector.load %arg11[%c0_33, %c0_34] : memref<16x108xf32, #tpu.memory_space<vmem>>, vector<16x80xf32>
    %cst_35 = arith.constant dense<0.000000e+00> : vector<16x80xf32>
    %53 = tpu.matmul %51, %52, %cst_35 {dimension_numbers = #tpu.dot_dimension_numbers<[1], [0], [0], [1], [0, 0, 1, 1], [], []>} : vector<16x16xf32>, vector<16x80xf32>, vector<16x80xf32> -> vector<16x80xf32>
    %54 = arith.addf %49, %53 : vector<16x80xf32>
    %c1_36 = arith.constant 1 : index
    %c0_37 = arith.constant 0 : index
    %c0_38 = arith.constant 0 : index
    %55 = vector.load %arg6[%c1_36, %c0_37, %c0_38] : memref<9x16x16xf32, #tpu.memory_space<vmem>>, vector<1x16x16xf32>
    %56 = vector.shape_cast %55 : vector<1x16x16xf32> to vector<16x16xf32>
    %c0_39 = arith.constant 0 : index
    %c1_40 = arith.constant 1 : index
    %57 = vector.load %arg11[%c0_39, %c1_40] : memref<16x108xf32, #tpu.memory_space<vmem>>, vector<16x80xf32>
    %cst_41 = arith.constant dense<0.000000e+00> : vector<16x80xf32>
    %58 = tpu.matmul %56, %57, %cst_41 {dimension_numbers = #tpu.dot_dimension_numbers<[1], [0], [0], [1], [0, 0, 1, 1], [], []>} : vector<16x16xf32>, vector<16x80xf32>, vector<16x80xf32> -> vector<16x80xf32>
    %59 = arith.addf %54, %58 : vector<16x80xf32>
    %c2 = arith.constant 2 : index
    %c0_42 = arith.constant 0 : index
    %c0_43 = arith.constant 0 : index
    %60 = vector.load %arg6[%c2, %c0_42, %c0_43] : memref<9x16x16xf32, #tpu.memory_space<vmem>>, vector<1x16x16xf32>
    %61 = vector.shape_cast %60 : vector<1x16x16xf32> to vector<16x16xf32>
    %c0_44 = arith.constant 0 : index
    %c2_45 = arith.constant 2 : index
    %62 = vector.load %arg11[%c0_44, %c2_45] : memref<16x108xf32, #tpu.memory_space<vmem>>, vector<16x80xf32>
    %cst_46 = arith.constant dense<0.000000e+00> : vector<16x80xf32>
    %63 = tpu.matmul %61, %62, %cst_46 {dimension_numbers = #tpu.dot_dimension_numbers<[1], [0], [0], [1], [0, 0, 1, 1], [], []>} : vector<16x16xf32>, vector<16x80xf32>, vector<16x80xf32> -> vector<16x80xf32>
    %64 = arith.addf %59, %63 : vector<16x80xf32>
    %c3 = arith.constant 3 : index
    %c0_47 = arith.constant 0 : index
    %c0_48 = arith.constant 0 : index
    %65 = vector.load %arg6[%c3, %c0_47, %c0_48] : memref<9x16x16xf32, #tpu.memory_space<vmem>>, vector<1x16x16xf32>
    %66 = vector.shape_cast %65 : vector<1x16x16xf32> to vector<16x16xf32>
    %c0_49 = arith.constant 0 : index
    %c10 = arith.constant 10 : index
    %67 = vector.load %arg11[%c0_49, %c10] : memref<16x108xf32, #tpu.memory_space<vmem>>, vector<16x80xf32>
    %cst_50 = arith.constant dense<0.000000e+00> : vector<16x80xf32>
    %68 = tpu.matmul %66, %67, %cst_50 {dimension_numbers = #tpu.dot_dimension_numbers<[1], [0], [0], [1], [0, 0, 1, 1], [], []>} : vector<16x16xf32>, vector<16x80xf32>, vector<16x80xf32> -> vector<16x80xf32>
    %69 = arith.addf %64, %68 : vector<16x80xf32>
    %c4 = arith.constant 4 : index
    %c0_51 = arith.constant 0 : index
    %c0_52 = arith.constant 0 : index
    %70 = vector.load %arg6[%c4, %c0_51, %c0_52] : memref<9x16x16xf32, #tpu.memory_space<vmem>>, vector<1x16x16xf32>
    %71 = vector.shape_cast %70 : vector<1x16x16xf32> to vector<16x16xf32>
    %c0_53 = arith.constant 0 : index
    %c11_54 = arith.constant 11 : index
    %72 = vector.load %arg11[%c0_53, %c11_54] : memref<16x108xf32, #tpu.memory_space<vmem>>, vector<16x80xf32>
    %cst_55 = arith.constant dense<0.000000e+00> : vector<16x80xf32>
    %73 = tpu.matmul %71, %72, %cst_55 {dimension_numbers = #tpu.dot_dimension_numbers<[1], [0], [0], [1], [0, 0, 1, 1], [], []>} : vector<16x16xf32>, vector<16x80xf32>, vector<16x80xf32> -> vector<16x80xf32>
    %74 = arith.addf %69, %73 : vector<16x80xf32>
    %c5 = arith.constant 5 : index
    %c0_56 = arith.constant 0 : index
    %c0_57 = arith.constant 0 : index
    %75 = vector.load %arg6[%c5, %c0_56, %c0_57] : memref<9x16x16xf32, #tpu.memory_space<vmem>>, vector<1x16x16xf32>
    %76 = vector.shape_cast %75 : vector<1x16x16xf32> to vector<16x16xf32>
    %c0_58 = arith.constant 0 : index
    %c12 = arith.constant 12 : index
    %77 = vector.load %arg11[%c0_58, %c12] : memref<16x108xf32, #tpu.memory_space<vmem>>, vector<16x80xf32>
    %cst_59 = arith.constant dense<0.000000e+00> : vector<16x80xf32>
    %78 = tpu.matmul %76, %77, %cst_59 {dimension_numbers = #tpu.dot_dimension_numbers<[1], [0], [0], [1], [0, 0, 1, 1], [], []>} : vector<16x16xf32>, vector<16x80xf32>, vector<16x80xf32> -> vector<16x80xf32>
    %79 = arith.addf %74, %78 : vector<16x80xf32>
    %c6 = arith.constant 6 : index
    %c0_60 = arith.constant 0 : index
    %c0_61 = arith.constant 0 : index
    %80 = vector.load %arg6[%c6, %c0_60, %c0_61] : memref<9x16x16xf32, #tpu.memory_space<vmem>>, vector<1x16x16xf32>
    %81 = vector.shape_cast %80 : vector<1x16x16xf32> to vector<16x16xf32>
    %c0_62 = arith.constant 0 : index
    %c20 = arith.constant 20 : index
    %82 = vector.load %arg11[%c0_62, %c20] : memref<16x108xf32, #tpu.memory_space<vmem>>, vector<16x80xf32>
    %cst_63 = arith.constant dense<0.000000e+00> : vector<16x80xf32>
    %83 = tpu.matmul %81, %82, %cst_63 {dimension_numbers = #tpu.dot_dimension_numbers<[1], [0], [0], [1], [0, 0, 1, 1], [], []>} : vector<16x16xf32>, vector<16x80xf32>, vector<16x80xf32> -> vector<16x80xf32>
    %84 = arith.addf %79, %83 : vector<16x80xf32>
    %c7 = arith.constant 7 : index
    %c0_64 = arith.constant 0 : index
    %c0_65 = arith.constant 0 : index
    %85 = vector.load %arg6[%c7, %c0_64, %c0_65] : memref<9x16x16xf32, #tpu.memory_space<vmem>>, vector<1x16x16xf32>
    %86 = vector.shape_cast %85 : vector<1x16x16xf32> to vector<16x16xf32>
    %c0_66 = arith.constant 0 : index
    %c21 = arith.constant 21 : index
    %87 = vector.load %arg11[%c0_66, %c21] : memref<16x108xf32, #tpu.memory_space<vmem>>, vector<16x80xf32>
    %cst_67 = arith.constant dense<0.000000e+00> : vector<16x80xf32>
    %88 = tpu.matmul %86, %87, %cst_67 {dimension_numbers = #tpu.dot_dimension_numbers<[1], [0], [0], [1], [0, 0, 1, 1], [], []>} : vector<16x16xf32>, vector<16x80xf32>, vector<16x80xf32> -> vector<16x80xf32>
    %89 = arith.addf %84, %88 : vector<16x80xf32>
    %c8 = arith.constant 8 : index
    %c0_68 = arith.constant 0 : index
    %c0_69 = arith.constant 0 : index
    %90 = vector.load %arg6[%c8, %c0_68, %c0_69] : memref<9x16x16xf32, #tpu.memory_space<vmem>>, vector<1x16x16xf32>
    %91 = vector.shape_cast %90 : vector<1x16x16xf32> to vector<16x16xf32>
    %c0_70 = arith.constant 0 : index
    %c22 = arith.constant 22 : index
    %92 = vector.load %arg11[%c0_70, %c22] : memref<16x108xf32, #tpu.memory_space<vmem>>, vector<16x80xf32>
    %cst_71 = arith.constant dense<0.000000e+00> : vector<16x80xf32>
    %93 = tpu.matmul %91, %92, %cst_71 {dimension_numbers = #tpu.dot_dimension_numbers<[1], [0], [0], [1], [0, 0, 1, 1], [], []>} : vector<16x16xf32>, vector<16x80xf32>, vector<16x80xf32> -> vector<16x80xf32>
    %94 = arith.addf %89, %93 : vector<16x80xf32>
    %c0_72 = arith.constant 0 : index
    %c0_73 = arith.constant 0 : index
    %95 = vector.load %arg7[%c0_72, %c0_73] : memref<16x1xf32, #tpu.memory_space<vmem>>, vector<16x1xf32>
    %96 = vector.broadcast %95 : vector<16x1xf32> to vector<16x80xf32>
    %97 = arith.addf %94, %96 : vector<16x80xf32>
    %98 = vector.broadcast %0 : vector<1x80xf32> to vector<16x80xf32>
    %99 = arith.mulf %97, %98 : vector<16x80xf32>
    %cst_74 = arith.constant dense<0.000000e+00> : vector<16xf32>
    %100 = vector.multi_reduction <add>, %99, %cst_74 [1] : vector<16x80xf32> to vector<16xf32>
    %101 = vector.shape_cast %100 : vector<16xf32> to vector<16x1xf32>
    %cst_75 = arith.constant 1.562500e-02 : f32
    %102 = vector.broadcast %cst_75 : f32 to vector<16x1xf32>
    %103 = arith.mulf %101, %102 : vector<16x1xf32>
    %104 = vector.broadcast %103 : vector<16x1xf32> to vector<16x80xf32>
    %105 = arith.subf %97, %104 : vector<16x80xf32>
    %106 = vector.broadcast %0 : vector<1x80xf32> to vector<16x80xf32>
    %107 = arith.mulf %105, %106 : vector<16x80xf32>
    %108 = arith.mulf %107, %107 : vector<16x80xf32>
    %cst_76 = arith.constant dense<0.000000e+00> : vector<16xf32>
    %109 = vector.multi_reduction <add>, %108, %cst_76 [1] : vector<16x80xf32> to vector<16xf32>
    %110 = vector.shape_cast %109 : vector<16xf32> to vector<16x1xf32>
    %cst_77 = arith.constant 1.562500e-02 : f32
    %111 = vector.broadcast %cst_77 : f32 to vector<16x1xf32>
    %112 = arith.mulf %110, %111 : vector<16x1xf32>
    %113 = vector.broadcast %103 : vector<16x1xf32> to vector<16x80xf32>
    %114 = arith.subf %97, %113 : vector<16x80xf32>
    %cst_78 = arith.constant 9.99999974E-6 : f32
    %115 = vector.broadcast %cst_78 : f32 to vector<16x1xf32>
    %116 = arith.addf %112, %115 : vector<16x1xf32>
    %117 = math.rsqrt %116 : vector<16x1xf32>
    %118 = vector.broadcast %117 : vector<16x1xf32> to vector<16x80xf32>
    %119 = arith.mulf %114, %118 : vector<16x80xf32>
    %cst_79 = arith.constant 0.000000e+00 : f32
    %120 = vector.broadcast %cst_79 : f32 to vector<16x80xf32>
    %121 = arith.cmpf oge, %119, %120 : vector<16x80xf32>
    %122 = vector.broadcast %2 : f32 to vector<16x80xf32>
    %123 = arith.mulf %122, %119 : vector<16x80xf32>
    %124 = arith.select %121, %119, %123 : vector<16x80xi1>, vector<16x80xf32>
    %125 = arith.addf %124, %43 : vector<16x80xf32>
    %c0_80 = arith.constant 0 : index
    %c0_81 = arith.constant 0 : index
    %c0_82 = arith.constant 0 : index
    %126 = vector.load %arg10[%c0_80, %c0_81, %c0_82] : memref<1x16x80xf32, #tpu.memory_space<vmem>>, vector<1x16x80xf32>
    %127 = vector.shape_cast %126 : vector<1x16x80xf32> to vector<16x80xf32>
    %128 = vector.shape_cast %125 : vector<16x80xf32> to vector<1x16x80xf32>
    tpu.vector_store %arg10[%c0_80, %c0_81, %c0_82], %128 {strides = array<i32>} : memref<1x16x80xf32, #tpu.memory_space<vmem>>, vector<1x16x80xf32>,
    return
  }
  func.func @transform_0(%arg0: i32) -> (i32, i32, i32) {
    %c0_i32 = arith.constant 0 : i32
    %c0_i32_0 = arith.constant 0 : i32
    %c0_i32_1 = arith.constant 0 : i32
    return %arg0, %c0_i32, %c0_i32_0 : i32, i32, i32
  }
  func.func @transform_1(%arg0: i32) -> (i32, i32) {
    %c0_i32 = arith.constant 0 : i32
    %c0_i32_0 = arith.constant 0 : i32
    %c0_i32_1 = arith.constant 0 : i32
    return %c0_i32, %c0_i32_0 : i32, i32
  }
  func.func @transform_2(%arg0: i32) -> (i32, i32) {
    %c0_i32 = arith.constant 0 : i32
    %c0_i32_0 = arith.constant 0 : i32
    %c0_i32_1 = arith.constant 0 : i32
    return %c0_i32, %c0_i32_0 : i32, i32
  }
  func.func @transform_3(%arg0: i32) -> (i32, i32) {
    %c0_i32 = arith.constant 0 : i32
    %c0_i32_0 = arith.constant 0 : i32
    %c0_i32_1 = arith.constant 0 : i32
    return %c0_i32, %c0_i32_0 : i32, i32
  }
  func.func @transform_4(%arg0: i32) -> (i32, i32) {
    %c0_i32 = arith.constant 0 : i32
    %c0_i32_0 = arith.constant 0 : i32
    %c0_i32_1 = arith.constant 0 : i32
    return %c0_i32, %c0_i32_0 : i32, i32
  }
  func.func @transform_5(%arg0: i32) -> (i32, i32, i32) {
    %c0_i32 = arith.constant 0 : i32
    %c0_i32_0 = arith.constant 0 : i32
    %c0_i32_1 = arith.constant 0 : i32
    %c0_i32_2 = arith.constant 0 : i32
    return %c0_i32, %c0_i32_0, %c0_i32_1 : i32, i32, i32
  }
  func.func @transform_6(%arg0: i32) -> (i32, i32) {
    %c0_i32 = arith.constant 0 : i32
    %c0_i32_0 = arith.constant 0 : i32
    %c0_i32_1 = arith.constant 0 : i32
    return %c0_i32, %c0_i32_0 : i32, i32
  }
  func.func @transform_7(%arg0: i32) -> (i32, i32) {
    %c0_i32 = arith.constant 0 : i32
    %c0_i32_0 = arith.constant 0 : i32
    %c0_i32_1 = arith.constant 0 : i32
    return %c0_i32, %c0_i32_0 : i32, i32
  }
  func.func @transform_8(%arg0: i32) -> (i32, i32) {
    %c0_i32 = arith.constant 0 : i32
    %c0_i32_0 = arith.constant 0 : i32
    %c0_i32_1 = arith.constant 0 : i32
    return %c0_i32, %c0_i32_0 : i32, i32
  }
  func.func @transform_9(%arg0: i32) -> (i32, i32, i32) {
    %c0_i32 = arith.constant 0 : i32
    %c0_i32_0 = arith.constant 0 : i32
    %c0_i32_1 = arith.constant 0 : i32
    return %arg0, %c0_i32, %c0_i32_0 : i32, i32, i32
  }
}

module attributes {stable_mosaic.version = 11 : i64} {
  func.func @kernel(%arg0: i32, %arg1: memref<1x144x24xbf16, #tpu.memory_space<vmem>>, %arg2: memref<32x144xbf16, #tpu.memory_space<vmem>>, %arg3: memref<32x1xf32, #tpu.memory_space<vmem>>, %arg4: memref<32x144xbf16, #tpu.memory_space<vmem>>, %arg5: memref<32x1xf32, #tpu.memory_space<vmem>>, %arg6: memref<9x32x32xf32, #tpu.memory_space<vmem>>, %arg7: memref<32x1xf32, #tpu.memory_space<vmem>>, %arg8: memref<1x24xf32, #tpu.memory_space<vmem>>, %arg9: memref<1x2xf32, #tpu.memory_space<smem>>, %arg10: memref<1x32x24xf32, #tpu.memory_space<vmem>>, %arg11: memref<32x44xf32, #tpu.memory_space<vmem>>) attributes {dimension_semantics = [#tpu.dimension_semantics<parallel>], iteration_bounds = array<i64: 2>, scalar_prefetch = 0 : i64, scratch_operands = 1 : i64, tpu.core_type = #tpu.core_type<tc>, window_params = [{transform_indices = @transform_0, window_bounds = array<i64: 1, 144, 24>}, {pipeline_mode = #tpu.pipeline_mode<synchronous>, transform_indices = @transform_1, window_bounds = array<i64: 32, 144>}, {pipeline_mode = #tpu.pipeline_mode<synchronous>, transform_indices = @transform_2, window_bounds = array<i64: 32, 1>}, {pipeline_mode = #tpu.pipeline_mode<synchronous>, transform_indices = @transform_3, window_bounds = array<i64: 32, 144>}, {pipeline_mode = #tpu.pipeline_mode<synchronous>, transform_indices = @transform_4, window_bounds = array<i64: 32, 1>}, {pipeline_mode = #tpu.pipeline_mode<synchronous>, transform_indices = @transform_5, window_bounds = array<i64: 9, 32, 32>}, {pipeline_mode = #tpu.pipeline_mode<synchronous>, transform_indices = @transform_6, window_bounds = array<i64: 32, 1>}, {pipeline_mode = #tpu.pipeline_mode<synchronous>, transform_indices = @transform_7, window_bounds = array<i64: 1, 24>}, {transform_indices = @transform_8, window_bounds = array<i64: 1, 2>}, {transform_indices = @transform_9, window_bounds = array<i64: 1, 32, 24>}]} {
    %c0 = arith.constant 0 : index
    %c0_0 = arith.constant 0 : index
    %0 = vector.load %arg8[%c0, %c0_0] : memref<1x24xf32, #tpu.memory_space<vmem>>, vector<1x24xf32>
    %c0_1 = arith.constant 0 : index
    %c0_2 = arith.constant 0 : index
    %1 = memref.load %arg9[%c0_1, %c0_2] : memref<1x2xf32, #tpu.memory_space<smem>>
    %c0_3 = arith.constant 0 : index
    %c1 = arith.constant 1 : index
    %2 = memref.load %arg9[%c0_3, %c1] : memref<1x2xf32, #tpu.memory_space<smem>>
    %c0_4 = arith.constant 0 : index
    %c0_5 = arith.constant 0 : index
    %3 = vector.load %arg2[%c0_4, %c0_5] : memref<32x144xbf16, #tpu.memory_space<vmem>>, vector<32x144xbf16>
    %c0_6 = arith.constant 0 : index
    %c0_7 = arith.constant 0 : index
    %c0_8 = arith.constant 0 : index
    %4 = vector.load %arg1[%c0_6, %c0_7, %c0_8] : memref<1x144x24xbf16, #tpu.memory_space<vmem>>, vector<1x144x24xbf16>
    %5 = vector.shape_cast %4 : vector<1x144x24xbf16> to vector<144x24xbf16>
    %cst = arith.constant dense<0.000000e+00> : vector<32x24xf32>
    %6 = tpu.matmul %3, %5, %cst {dimension_numbers = #tpu.dot_dimension_numbers<[1], [0], [0], [1], [0, 0, 1, 1], [], []>} : vector<32x144xbf16>, vector<144x24xbf16>, vector<32x24xf32> -> vector<32x24xf32>
    %c0_9 = arith.constant 0 : index
    %c0_10 = arith.constant 0 : index
    %7 = vector.load %arg3[%c0_9, %c0_10] : memref<32x1xf32, #tpu.memory_space<vmem>>, vector<32x1xf32>
    %8 = vector.broadcast %7 : vector<32x1xf32> to vector<32x24xf32>
    %9 = arith.addf %6, %8 : vector<32x24xf32>
    %10 = vector.broadcast %0 : vector<1x24xf32> to vector<32x24xf32>
    %11 = arith.mulf %9, %10 : vector<32x24xf32>
    %cst_11 = arith.constant dense<0.000000e+00> : vector<32xf32>
    %12 = vector.multi_reduction <add>, %11, %cst_11 [1] : vector<32x24xf32> to vector<32xf32>
    %13 = vector.shape_cast %12 : vector<32xf32> to vector<32x1xf32>
    %cst_12 = arith.constant 6.250000e-02 : f32
    %14 = vector.broadcast %cst_12 : f32 to vector<32x1xf32>
    %15 = arith.mulf %13, %14 : vector<32x1xf32>
    %16 = vector.broadcast %15 : vector<32x1xf32> to vector<32x24xf32>
    %17 = arith.subf %9, %16 : vector<32x24xf32>
    %18 = vector.broadcast %0 : vector<1x24xf32> to vector<32x24xf32>
    %19 = arith.mulf %17, %18 : vector<32x24xf32>
    %20 = arith.mulf %19, %19 : vector<32x24xf32>
    %cst_13 = arith.constant dense<0.000000e+00> : vector<32xf32>
    %21 = vector.multi_reduction <add>, %20, %cst_13 [1] : vector<32x24xf32> to vector<32xf32>
    %22 = vector.shape_cast %21 : vector<32xf32> to vector<32x1xf32>
    %cst_14 = arith.constant 6.250000e-02 : f32
    %23 = vector.broadcast %cst_14 : f32 to vector<32x1xf32>
    %24 = arith.mulf %22, %23 : vector<32x1xf32>
    %25 = vector.broadcast %15 : vector<32x1xf32> to vector<32x24xf32>
    %26 = arith.subf %9, %25 : vector<32x24xf32>
    %cst_15 = arith.constant 9.99999974E-6 : f32
    %27 = vector.broadcast %cst_15 : f32 to vector<32x1xf32>
    %28 = arith.addf %24, %27 : vector<32x1xf32>
    %29 = math.rsqrt %28 : vector<32x1xf32>
    %30 = vector.broadcast %29 : vector<32x1xf32> to vector<32x24xf32>
    %31 = arith.mulf %26, %30 : vector<32x24xf32>
    %cst_16 = arith.constant 0.000000e+00 : f32
    %32 = vector.broadcast %cst_16 : f32 to vector<32x24xf32>
    %33 = arith.cmpf oge, %31, %32 : vector<32x24xf32>
    %34 = vector.broadcast %1 : f32 to vector<32x24xf32>
    %35 = arith.mulf %34, %31 : vector<32x24xf32>
    %36 = arith.select %33, %31, %35 : vector<32x24xi1>, vector<32x24xf32>
    %c0_17 = arith.constant 0 : index
    %c0_18 = arith.constant 0 : index
    %37 = vector.load %arg4[%c0_17, %c0_18] : memref<32x144xbf16, #tpu.memory_space<vmem>>, vector<32x144xbf16>
    %c0_19 = arith.constant 0 : index
    %c0_20 = arith.constant 0 : index
    %c0_21 = arith.constant 0 : index
    %38 = vector.load %arg1[%c0_19, %c0_20, %c0_21] : memref<1x144x24xbf16, #tpu.memory_space<vmem>>, vector<1x144x24xbf16>
    %39 = vector.shape_cast %38 : vector<1x144x24xbf16> to vector<144x24xbf16>
    %cst_22 = arith.constant dense<0.000000e+00> : vector<32x24xf32>
    %40 = tpu.matmul %37, %39, %cst_22 {dimension_numbers = #tpu.dot_dimension_numbers<[1], [0], [0], [1], [0, 0, 1, 1], [], []>} : vector<32x144xbf16>, vector<144x24xbf16>, vector<32x24xf32> -> vector<32x24xf32>
    %c0_23 = arith.constant 0 : index
    %c0_24 = arith.constant 0 : index
    %41 = vector.load %arg5[%c0_23, %c0_24] : memref<32x1xf32, #tpu.memory_space<vmem>>, vector<32x1xf32>
    %42 = vector.broadcast %41 : vector<32x1xf32> to vector<32x24xf32>
    %43 = arith.addf %40, %42 : vector<32x24xf32>
    %cst_25 = arith.constant 0.000000e+00 : f32
    %44 = vector.broadcast %cst_25 : f32 to vector<32x44xf32>
    %c0_26 = arith.constant 0 : index
    %c0_27 = arith.constant 0 : index
    %45 = vector.load %arg11[%c0_26, %c0_27] : memref<32x44xf32, #tpu.memory_space<vmem>>, vector<32x44xf32>
    tpu.vector_store %arg11[%c0_26, %c0_27], %44 {strides = array<i32>} : memref<32x44xf32, #tpu.memory_space<vmem>>, vector<32x44xf32>,
    %46 = vector.broadcast %0 : vector<1x24xf32> to vector<32x24xf32>
    %47 = arith.mulf %36, %46 : vector<32x24xf32>
    %c0_28 = arith.constant 0 : index
    %c7 = arith.constant 7 : index
    %48 = vector.load %arg11[%c0_28, %c7] : memref<32x44xf32, #tpu.memory_space<vmem>>, vector<32x24xf32>
    tpu.vector_store %arg11[%c0_28, %c7], %47 {strides = array<i32>} : memref<32x44xf32, #tpu.memory_space<vmem>>, vector<32x24xf32>,
    %cst_29 = arith.constant 0.000000e+00 : f32
    %49 = vector.broadcast %cst_29 : f32 to vector<32x24xf32>
    %c0_30 = arith.constant 0 : index
    %c0_31 = arith.constant 0 : index
    %c0_32 = arith.constant 0 : index
    %50 = vector.load %arg6[%c0_30, %c0_31, %c0_32] : memref<9x32x32xf32, #tpu.memory_space<vmem>>, vector<1x32x32xf32>
    %51 = vector.shape_cast %50 : vector<1x32x32xf32> to vector<32x32xf32>
    %c0_33 = arith.constant 0 : index
    %c0_34 = arith.constant 0 : index
    %52 = vector.load %arg11[%c0_33, %c0_34] : memref<32x44xf32, #tpu.memory_space<vmem>>, vector<32x24xf32>
    %cst_35 = arith.constant dense<0.000000e+00> : vector<32x24xf32>
    %53 = tpu.matmul %51, %52, %cst_35 {dimension_numbers = #tpu.dot_dimension_numbers<[1], [0], [0], [1], [0, 0, 1, 1], [], []>} : vector<32x32xf32>, vector<32x24xf32>, vector<32x24xf32> -> vector<32x24xf32>
    %54 = arith.addf %49, %53 : vector<32x24xf32>
    %c1_36 = arith.constant 1 : index
    %c0_37 = arith.constant 0 : index
    %c0_38 = arith.constant 0 : index
    %55 = vector.load %arg6[%c1_36, %c0_37, %c0_38] : memref<9x32x32xf32, #tpu.memory_space<vmem>>, vector<1x32x32xf32>
    %56 = vector.shape_cast %55 : vector<1x32x32xf32> to vector<32x32xf32>
    %c0_39 = arith.constant 0 : index
    %c1_40 = arith.constant 1 : index
    %57 = vector.load %arg11[%c0_39, %c1_40] : memref<32x44xf32, #tpu.memory_space<vmem>>, vector<32x24xf32>
    %cst_41 = arith.constant dense<0.000000e+00> : vector<32x24xf32>
    %58 = tpu.matmul %56, %57, %cst_41 {dimension_numbers = #tpu.dot_dimension_numbers<[1], [0], [0], [1], [0, 0, 1, 1], [], []>} : vector<32x32xf32>, vector<32x24xf32>, vector<32x24xf32> -> vector<32x24xf32>
    %59 = arith.addf %54, %58 : vector<32x24xf32>
    %c2 = arith.constant 2 : index
    %c0_42 = arith.constant 0 : index
    %c0_43 = arith.constant 0 : index
    %60 = vector.load %arg6[%c2, %c0_42, %c0_43] : memref<9x32x32xf32, #tpu.memory_space<vmem>>, vector<1x32x32xf32>
    %61 = vector.shape_cast %60 : vector<1x32x32xf32> to vector<32x32xf32>
    %c0_44 = arith.constant 0 : index
    %c2_45 = arith.constant 2 : index
    %62 = vector.load %arg11[%c0_44, %c2_45] : memref<32x44xf32, #tpu.memory_space<vmem>>, vector<32x24xf32>
    %cst_46 = arith.constant dense<0.000000e+00> : vector<32x24xf32>
    %63 = tpu.matmul %61, %62, %cst_46 {dimension_numbers = #tpu.dot_dimension_numbers<[1], [0], [0], [1], [0, 0, 1, 1], [], []>} : vector<32x32xf32>, vector<32x24xf32>, vector<32x24xf32> -> vector<32x24xf32>
    %64 = arith.addf %59, %63 : vector<32x24xf32>
    %c3 = arith.constant 3 : index
    %c0_47 = arith.constant 0 : index
    %c0_48 = arith.constant 0 : index
    %65 = vector.load %arg6[%c3, %c0_47, %c0_48] : memref<9x32x32xf32, #tpu.memory_space<vmem>>, vector<1x32x32xf32>
    %66 = vector.shape_cast %65 : vector<1x32x32xf32> to vector<32x32xf32>
    %c0_49 = arith.constant 0 : index
    %c6 = arith.constant 6 : index
    %67 = vector.load %arg11[%c0_49, %c6] : memref<32x44xf32, #tpu.memory_space<vmem>>, vector<32x24xf32>
    %cst_50 = arith.constant dense<0.000000e+00> : vector<32x24xf32>
    %68 = tpu.matmul %66, %67, %cst_50 {dimension_numbers = #tpu.dot_dimension_numbers<[1], [0], [0], [1], [0, 0, 1, 1], [], []>} : vector<32x32xf32>, vector<32x24xf32>, vector<32x24xf32> -> vector<32x24xf32>
    %69 = arith.addf %64, %68 : vector<32x24xf32>
    %c4 = arith.constant 4 : index
    %c0_51 = arith.constant 0 : index
    %c0_52 = arith.constant 0 : index
    %70 = vector.load %arg6[%c4, %c0_51, %c0_52] : memref<9x32x32xf32, #tpu.memory_space<vmem>>, vector<1x32x32xf32>
    %71 = vector.shape_cast %70 : vector<1x32x32xf32> to vector<32x32xf32>
    %c0_53 = arith.constant 0 : index
    %c7_54 = arith.constant 7 : index
    %72 = vector.load %arg11[%c0_53, %c7_54] : memref<32x44xf32, #tpu.memory_space<vmem>>, vector<32x24xf32>
    %cst_55 = arith.constant dense<0.000000e+00> : vector<32x24xf32>
    %73 = tpu.matmul %71, %72, %cst_55 {dimension_numbers = #tpu.dot_dimension_numbers<[1], [0], [0], [1], [0, 0, 1, 1], [], []>} : vector<32x32xf32>, vector<32x24xf32>, vector<32x24xf32> -> vector<32x24xf32>
    %74 = arith.addf %69, %73 : vector<32x24xf32>
    %c5 = arith.constant 5 : index
    %c0_56 = arith.constant 0 : index
    %c0_57 = arith.constant 0 : index
    %75 = vector.load %arg6[%c5, %c0_56, %c0_57] : memref<9x32x32xf32, #tpu.memory_space<vmem>>, vector<1x32x32xf32>
    %76 = vector.shape_cast %75 : vector<1x32x32xf32> to vector<32x32xf32>
    %c0_58 = arith.constant 0 : index
    %c8 = arith.constant 8 : index
    %77 = vector.load %arg11[%c0_58, %c8] : memref<32x44xf32, #tpu.memory_space<vmem>>, vector<32x24xf32>
    %cst_59 = arith.constant dense<0.000000e+00> : vector<32x24xf32>
    %78 = tpu.matmul %76, %77, %cst_59 {dimension_numbers = #tpu.dot_dimension_numbers<[1], [0], [0], [1], [0, 0, 1, 1], [], []>} : vector<32x32xf32>, vector<32x24xf32>, vector<32x24xf32> -> vector<32x24xf32>
    %79 = arith.addf %74, %78 : vector<32x24xf32>
    %c6_60 = arith.constant 6 : index
    %c0_61 = arith.constant 0 : index
    %c0_62 = arith.constant 0 : index
    %80 = vector.load %arg6[%c6_60, %c0_61, %c0_62] : memref<9x32x32xf32, #tpu.memory_space<vmem>>, vector<1x32x32xf32>
    %81 = vector.shape_cast %80 : vector<1x32x32xf32> to vector<32x32xf32>
    %c0_63 = arith.constant 0 : index
    %c12 = arith.constant 12 : index
    %82 = vector.load %arg11[%c0_63, %c12] : memref<32x44xf32, #tpu.memory_space<vmem>>, vector<32x24xf32>
    %cst_64 = arith.constant dense<0.000000e+00> : vector<32x24xf32>
    %83 = tpu.matmul %81, %82, %cst_64 {dimension_numbers = #tpu.dot_dimension_numbers<[1], [0], [0], [1], [0, 0, 1, 1], [], []>} : vector<32x32xf32>, vector<32x24xf32>, vector<32x24xf32> -> vector<32x24xf32>
    %84 = arith.addf %79, %83 : vector<32x24xf32>
    %c7_65 = arith.constant 7 : index
    %c0_66 = arith.constant 0 : index
    %c0_67 = arith.constant 0 : index
    %85 = vector.load %arg6[%c7_65, %c0_66, %c0_67] : memref<9x32x32xf32, #tpu.memory_space<vmem>>, vector<1x32x32xf32>
    %86 = vector.shape_cast %85 : vector<1x32x32xf32> to vector<32x32xf32>
    %c0_68 = arith.constant 0 : index
    %c13 = arith.constant 13 : index
    %87 = vector.load %arg11[%c0_68, %c13] : memref<32x44xf32, #tpu.memory_space<vmem>>, vector<32x24xf32>
    %cst_69 = arith.constant dense<0.000000e+00> : vector<32x24xf32>
    %88 = tpu.matmul %86, %87, %cst_69 {dimension_numbers = #tpu.dot_dimension_numbers<[1], [0], [0], [1], [0, 0, 1, 1], [], []>} : vector<32x32xf32>, vector<32x24xf32>, vector<32x24xf32> -> vector<32x24xf32>
    %89 = arith.addf %84, %88 : vector<32x24xf32>
    %c8_70 = arith.constant 8 : index
    %c0_71 = arith.constant 0 : index
    %c0_72 = arith.constant 0 : index
    %90 = vector.load %arg6[%c8_70, %c0_71, %c0_72] : memref<9x32x32xf32, #tpu.memory_space<vmem>>, vector<1x32x32xf32>
    %91 = vector.shape_cast %90 : vector<1x32x32xf32> to vector<32x32xf32>
    %c0_73 = arith.constant 0 : index
    %c14 = arith.constant 14 : index
    %92 = vector.load %arg11[%c0_73, %c14] : memref<32x44xf32, #tpu.memory_space<vmem>>, vector<32x24xf32>
    %cst_74 = arith.constant dense<0.000000e+00> : vector<32x24xf32>
    %93 = tpu.matmul %91, %92, %cst_74 {dimension_numbers = #tpu.dot_dimension_numbers<[1], [0], [0], [1], [0, 0, 1, 1], [], []>} : vector<32x32xf32>, vector<32x24xf32>, vector<32x24xf32> -> vector<32x24xf32>
    %94 = arith.addf %89, %93 : vector<32x24xf32>
    %c0_75 = arith.constant 0 : index
    %c0_76 = arith.constant 0 : index
    %95 = vector.load %arg7[%c0_75, %c0_76] : memref<32x1xf32, #tpu.memory_space<vmem>>, vector<32x1xf32>
    %96 = vector.broadcast %95 : vector<32x1xf32> to vector<32x24xf32>
    %97 = arith.addf %94, %96 : vector<32x24xf32>
    %98 = vector.broadcast %0 : vector<1x24xf32> to vector<32x24xf32>
    %99 = arith.mulf %97, %98 : vector<32x24xf32>
    %cst_77 = arith.constant dense<0.000000e+00> : vector<32xf32>
    %100 = vector.multi_reduction <add>, %99, %cst_77 [1] : vector<32x24xf32> to vector<32xf32>
    %101 = vector.shape_cast %100 : vector<32xf32> to vector<32x1xf32>
    %cst_78 = arith.constant 6.250000e-02 : f32
    %102 = vector.broadcast %cst_78 : f32 to vector<32x1xf32>
    %103 = arith.mulf %101, %102 : vector<32x1xf32>
    %104 = vector.broadcast %103 : vector<32x1xf32> to vector<32x24xf32>
    %105 = arith.subf %97, %104 : vector<32x24xf32>
    %106 = vector.broadcast %0 : vector<1x24xf32> to vector<32x24xf32>
    %107 = arith.mulf %105, %106 : vector<32x24xf32>
    %108 = arith.mulf %107, %107 : vector<32x24xf32>
    %cst_79 = arith.constant dense<0.000000e+00> : vector<32xf32>
    %109 = vector.multi_reduction <add>, %108, %cst_79 [1] : vector<32x24xf32> to vector<32xf32>
    %110 = vector.shape_cast %109 : vector<32xf32> to vector<32x1xf32>
    %cst_80 = arith.constant 6.250000e-02 : f32
    %111 = vector.broadcast %cst_80 : f32 to vector<32x1xf32>
    %112 = arith.mulf %110, %111 : vector<32x1xf32>
    %113 = vector.broadcast %103 : vector<32x1xf32> to vector<32x24xf32>
    %114 = arith.subf %97, %113 : vector<32x24xf32>
    %cst_81 = arith.constant 9.99999974E-6 : f32
    %115 = vector.broadcast %cst_81 : f32 to vector<32x1xf32>
    %116 = arith.addf %112, %115 : vector<32x1xf32>
    %117 = math.rsqrt %116 : vector<32x1xf32>
    %118 = vector.broadcast %117 : vector<32x1xf32> to vector<32x24xf32>
    %119 = arith.mulf %114, %118 : vector<32x24xf32>
    %cst_82 = arith.constant 0.000000e+00 : f32
    %120 = vector.broadcast %cst_82 : f32 to vector<32x24xf32>
    %121 = arith.cmpf oge, %119, %120 : vector<32x24xf32>
    %122 = vector.broadcast %2 : f32 to vector<32x24xf32>
    %123 = arith.mulf %122, %119 : vector<32x24xf32>
    %124 = arith.select %121, %119, %123 : vector<32x24xi1>, vector<32x24xf32>
    %125 = arith.addf %124, %43 : vector<32x24xf32>
    %c0_83 = arith.constant 0 : index
    %c0_84 = arith.constant 0 : index
    %c0_85 = arith.constant 0 : index
    %126 = vector.load %arg10[%c0_83, %c0_84, %c0_85] : memref<1x32x24xf32, #tpu.memory_space<vmem>>, vector<1x32x24xf32>
    %127 = vector.shape_cast %126 : vector<1x32x24xf32> to vector<32x24xf32>
    %128 = vector.shape_cast %125 : vector<32x24xf32> to vector<1x32x24xf32>
    tpu.vector_store %arg10[%c0_83, %c0_84, %c0_85], %128 {strides = array<i32>} : memref<1x32x24xf32, #tpu.memory_space<vmem>>, vector<1x32x24xf32>,
    return
  }
  func.func @transform_0(%arg0: i32) -> (i32, i32, i32) {
    %c0_i32 = arith.constant 0 : i32
    %c0_i32_0 = arith.constant 0 : i32
    %c0_i32_1 = arith.constant 0 : i32
    return %arg0, %c0_i32, %c0_i32_0 : i32, i32, i32
  }
  func.func @transform_1(%arg0: i32) -> (i32, i32) {
    %c0_i32 = arith.constant 0 : i32
    %c0_i32_0 = arith.constant 0 : i32
    %c0_i32_1 = arith.constant 0 : i32
    return %c0_i32, %c0_i32_0 : i32, i32
  }
  func.func @transform_2(%arg0: i32) -> (i32, i32) {
    %c0_i32 = arith.constant 0 : i32
    %c0_i32_0 = arith.constant 0 : i32
    %c0_i32_1 = arith.constant 0 : i32
    return %c0_i32, %c0_i32_0 : i32, i32
  }
  func.func @transform_3(%arg0: i32) -> (i32, i32) {
    %c0_i32 = arith.constant 0 : i32
    %c0_i32_0 = arith.constant 0 : i32
    %c0_i32_1 = arith.constant 0 : i32
    return %c0_i32, %c0_i32_0 : i32, i32
  }
  func.func @transform_4(%arg0: i32) -> (i32, i32) {
    %c0_i32 = arith.constant 0 : i32
    %c0_i32_0 = arith.constant 0 : i32
    %c0_i32_1 = arith.constant 0 : i32
    return %c0_i32, %c0_i32_0 : i32, i32
  }
  func.func @transform_5(%arg0: i32) -> (i32, i32, i32) {
    %c0_i32 = arith.constant 0 : i32
    %c0_i32_0 = arith.constant 0 : i32
    %c0_i32_1 = arith.constant 0 : i32
    %c0_i32_2 = arith.constant 0 : i32
    return %c0_i32, %c0_i32_0, %c0_i32_1 : i32, i32, i32
  }
  func.func @transform_6(%arg0: i32) -> (i32, i32) {
    %c0_i32 = arith.constant 0 : i32
    %c0_i32_0 = arith.constant 0 : i32
    %c0_i32_1 = arith.constant 0 : i32
    return %c0_i32, %c0_i32_0 : i32, i32
  }
  func.func @transform_7(%arg0: i32) -> (i32, i32) {
    %c0_i32 = arith.constant 0 : i32
    %c0_i32_0 = arith.constant 0 : i32
    %c0_i32_1 = arith.constant 0 : i32
    return %c0_i32, %c0_i32_0 : i32, i32
  }
  func.func @transform_8(%arg0: i32) -> (i32, i32) {
    %c0_i32 = arith.constant 0 : i32
    %c0_i32_0 = arith.constant 0 : i32
    %c0_i32_1 = arith.constant 0 : i32
    return %c0_i32, %c0_i32_0 : i32, i32
  }
  func.func @transform_9(%arg0: i32) -> (i32, i32, i32) {
    %c0_i32 = arith.constant 0 : i32
    %c0_i32_0 = arith.constant 0 : i32
    %c0_i32_1 = arith.constant 0 : i32
    return %arg0, %c0_i32, %c0_i32_0 : i32, i32, i32
  }
}

module attributes {stable_mosaic.version = 11 : i64} {
  func.func @kernel(%arg0: i32, %arg1: memref<1x432x80xbf16, #tpu.memory_space<vmem>>, %arg2: memref<16x432xbf16, #tpu.memory_space<vmem>>, %arg3: memref<16x1xf32, #tpu.memory_space<vmem>>, %arg4: memref<1x48x80xbf16, #tpu.memory_space<vmem>>, %arg5: memref<16x48xbf16, #tpu.memory_space<vmem>>, %arg6: memref<16x1xf32, #tpu.memory_space<vmem>>, %arg7: memref<9x16x16xf32, #tpu.memory_space<vmem>>, %arg8: memref<16x1xf32, #tpu.memory_space<vmem>>, %arg9: memref<1x80xf32, #tpu.memory_space<vmem>>, %arg10: memref<1x2xf32, #tpu.memory_space<smem>>, %arg11: memref<1x16x80xf32, #tpu.memory_space<vmem>>, %arg12: memref<16x108xf32, #tpu.memory_space<vmem>>) attributes {dimension_semantics = [#tpu.dimension_semantics<parallel>], iteration_bounds = array<i64: 2>, scalar_prefetch = 0 : i64, scratch_operands = 1 : i64, tpu.core_type = #tpu.core_type<tc>, window_params = [{transform_indices = @transform_0, window_bounds = array<i64: 1, 432, 80>}, {pipeline_mode = #tpu.pipeline_mode<synchronous>, transform_indices = @transform_1, window_bounds = array<i64: 16, 432>}, {pipeline_mode = #tpu.pipeline_mode<synchronous>, transform_indices = @transform_2, window_bounds = array<i64: 16, 1>}, {transform_indices = @transform_3, window_bounds = array<i64: 1, 48, 80>}, {pipeline_mode = #tpu.pipeline_mode<synchronous>, transform_indices = @transform_4, window_bounds = array<i64: 16, 48>}, {pipeline_mode = #tpu.pipeline_mode<synchronous>, transform_indices = @transform_5, window_bounds = array<i64: 16, 1>}, {pipeline_mode = #tpu.pipeline_mode<synchronous>, transform_indices = @transform_6, window_bounds = array<i64: 9, 16, 16>}, {pipeline_mode = #tpu.pipeline_mode<synchronous>, transform_indices = @transform_7, window_bounds = array<i64: 16, 1>}, {pipeline_mode = #tpu.pipeline_mode<synchronous>, transform_indices = @transform_8, window_bounds = array<i64: 1, 80>}, {transform_indices = @transform_9, window_bounds = array<i64: 1, 2>}, {transform_indices = @transform_10, window_bounds = array<i64: 1, 16, 80>}]} {
    %c0 = arith.constant 0 : index
    %c0_0 = arith.constant 0 : index
    %0 = vector.load %arg9[%c0, %c0_0] : memref<1x80xf32, #tpu.memory_space<vmem>>, vector<1x80xf32>
    %c0_1 = arith.constant 0 : index
    %c0_2 = arith.constant 0 : index
    %1 = memref.load %arg10[%c0_1, %c0_2] : memref<1x2xf32, #tpu.memory_space<smem>>
    %c0_3 = arith.constant 0 : index
    %c1 = arith.constant 1 : index
    %2 = memref.load %arg10[%c0_3, %c1] : memref<1x2xf32, #tpu.memory_space<smem>>
    %c0_4 = arith.constant 0 : index
    %c0_5 = arith.constant 0 : index
    %3 = vector.load %arg2[%c0_4, %c0_5] : memref<16x432xbf16, #tpu.memory_space<vmem>>, vector<16x432xbf16>
    %c0_6 = arith.constant 0 : index
    %c0_7 = arith.constant 0 : index
    %c0_8 = arith.constant 0 : index
    %4 = vector.load %arg1[%c0_6, %c0_7, %c0_8] : memref<1x432x80xbf16, #tpu.memory_space<vmem>>, vector<1x432x80xbf16>
    %5 = vector.shape_cast %4 : vector<1x432x80xbf16> to vector<432x80xbf16>
    %cst = arith.constant dense<0.000000e+00> : vector<16x80xf32>
    %6 = tpu.matmul %3, %5, %cst {dimension_numbers = #tpu.dot_dimension_numbers<[1], [0], [0], [1], [0, 0, 1, 1], [], []>} : vector<16x432xbf16>, vector<432x80xbf16>, vector<16x80xf32> -> vector<16x80xf32>
    %c0_9 = arith.constant 0 : index
    %c0_10 = arith.constant 0 : index
    %7 = vector.load %arg3[%c0_9, %c0_10] : memref<16x1xf32, #tpu.memory_space<vmem>>, vector<16x1xf32>
    %8 = vector.broadcast %7 : vector<16x1xf32> to vector<16x80xf32>
    %9 = arith.addf %6, %8 : vector<16x80xf32>
    %10 = vector.broadcast %0 : vector<1x80xf32> to vector<16x80xf32>
    %11 = arith.mulf %9, %10 : vector<16x80xf32>
    %cst_11 = arith.constant dense<0.000000e+00> : vector<16xf32>
    %12 = vector.multi_reduction <add>, %11, %cst_11 [1] : vector<16x80xf32> to vector<16xf32>
    %13 = vector.shape_cast %12 : vector<16xf32> to vector<16x1xf32>
    %cst_12 = arith.constant 1.562500e-02 : f32
    %14 = vector.broadcast %cst_12 : f32 to vector<16x1xf32>
    %15 = arith.mulf %13, %14 : vector<16x1xf32>
    %16 = vector.broadcast %15 : vector<16x1xf32> to vector<16x80xf32>
    %17 = arith.subf %9, %16 : vector<16x80xf32>
    %18 = vector.broadcast %0 : vector<1x80xf32> to vector<16x80xf32>
    %19 = arith.mulf %17, %18 : vector<16x80xf32>
    %20 = arith.mulf %19, %19 : vector<16x80xf32>
    %cst_13 = arith.constant dense<0.000000e+00> : vector<16xf32>
    %21 = vector.multi_reduction <add>, %20, %cst_13 [1] : vector<16x80xf32> to vector<16xf32>
    %22 = vector.shape_cast %21 : vector<16xf32> to vector<16x1xf32>
    %cst_14 = arith.constant 1.562500e-02 : f32
    %23 = vector.broadcast %cst_14 : f32 to vector<16x1xf32>
    %24 = arith.mulf %22, %23 : vector<16x1xf32>
    %25 = vector.broadcast %15 : vector<16x1xf32> to vector<16x80xf32>
    %26 = arith.subf %9, %25 : vector<16x80xf32>
    %cst_15 = arith.constant 9.99999974E-6 : f32
    %27 = vector.broadcast %cst_15 : f32 to vector<16x1xf32>
    %28 = arith.addf %24, %27 : vector<16x1xf32>
    %29 = math.rsqrt %28 : vector<16x1xf32>
    %30 = vector.broadcast %29 : vector<16x1xf32> to vector<16x80xf32>
    %31 = arith.mulf %26, %30 : vector<16x80xf32>
    %cst_16 = arith.constant 0.000000e+00 : f32
    %32 = vector.broadcast %cst_16 : f32 to vector<16x80xf32>
    %33 = arith.cmpf oge, %31, %32 : vector<16x80xf32>
    %34 = vector.broadcast %1 : f32 to vector<16x80xf32>
    %35 = arith.mulf %34, %31 : vector<16x80xf32>
    %36 = arith.select %33, %31, %35 : vector<16x80xi1>, vector<16x80xf32>
    %c0_17 = arith.constant 0 : index
    %c0_18 = arith.constant 0 : index
    %37 = vector.load %arg5[%c0_17, %c0_18] : memref<16x48xbf16, #tpu.memory_space<vmem>>, vector<16x48xbf16>
    %c0_19 = arith.constant 0 : index
    %c0_20 = arith.constant 0 : index
    %c0_21 = arith.constant 0 : index
    %38 = vector.load %arg4[%c0_19, %c0_20, %c0_21] : memref<1x48x80xbf16, #tpu.memory_space<vmem>>, vector<1x48x80xbf16>
    %39 = vector.shape_cast %38 : vector<1x48x80xbf16> to vector<48x80xbf16>
    %cst_22 = arith.constant dense<0.000000e+00> : vector<16x80xf32>
    %40 = tpu.matmul %37, %39, %cst_22 {dimension_numbers = #tpu.dot_dimension_numbers<[1], [0], [0], [1], [0, 0, 1, 1], [], []>} : vector<16x48xbf16>, vector<48x80xbf16>, vector<16x80xf32> -> vector<16x80xf32>
    %c0_23 = arith.constant 0 : index
    %c0_24 = arith.constant 0 : index
    %41 = vector.load %arg6[%c0_23, %c0_24] : memref<16x1xf32, #tpu.memory_space<vmem>>, vector<16x1xf32>
    %42 = vector.broadcast %41 : vector<16x1xf32> to vector<16x80xf32>
    %43 = arith.addf %40, %42 : vector<16x80xf32>
    %cst_25 = arith.constant 0.000000e+00 : f32
    %44 = vector.broadcast %cst_25 : f32 to vector<16x108xf32>
    %c0_26 = arith.constant 0 : index
    %c0_27 = arith.constant 0 : index
    %45 = vector.load %arg12[%c0_26, %c0_27] : memref<16x108xf32, #tpu.memory_space<vmem>>, vector<16x108xf32>
    tpu.vector_store %arg12[%c0_26, %c0_27], %44 {strides = array<i32>} : memref<16x108xf32, #tpu.memory_space<vmem>>, vector<16x108xf32>,
    %46 = vector.broadcast %0 : vector<1x80xf32> to vector<16x80xf32>
    %47 = arith.mulf %36, %46 : vector<16x80xf32>
    %c0_28 = arith.constant 0 : index
    %c11 = arith.constant 11 : index
    %48 = vector.load %arg12[%c0_28, %c11] : memref<16x108xf32, #tpu.memory_space<vmem>>, vector<16x80xf32>
    tpu.vector_store %arg12[%c0_28, %c11], %47 {strides = array<i32>} : memref<16x108xf32, #tpu.memory_space<vmem>>, vector<16x80xf32>,
    %cst_29 = arith.constant 0.000000e+00 : f32
    %49 = vector.broadcast %cst_29 : f32 to vector<16x80xf32>
    %c0_30 = arith.constant 0 : index
    %c0_31 = arith.constant 0 : index
    %c0_32 = arith.constant 0 : index
    %50 = vector.load %arg7[%c0_30, %c0_31, %c0_32] : memref<9x16x16xf32, #tpu.memory_space<vmem>>, vector<1x16x16xf32>
    %51 = vector.shape_cast %50 : vector<1x16x16xf32> to vector<16x16xf32>
    %c0_33 = arith.constant 0 : index
    %c0_34 = arith.constant 0 : index
    %52 = vector.load %arg12[%c0_33, %c0_34] : memref<16x108xf32, #tpu.memory_space<vmem>>, vector<16x80xf32>
    %cst_35 = arith.constant dense<0.000000e+00> : vector<16x80xf32>
    %53 = tpu.matmul %51, %52, %cst_35 {dimension_numbers = #tpu.dot_dimension_numbers<[1], [0], [0], [1], [0, 0, 1, 1], [], []>} : vector<16x16xf32>, vector<16x80xf32>, vector<16x80xf32> -> vector<16x80xf32>
    %54 = arith.addf %49, %53 : vector<16x80xf32>
    %c1_36 = arith.constant 1 : index
    %c0_37 = arith.constant 0 : index
    %c0_38 = arith.constant 0 : index
    %55 = vector.load %arg7[%c1_36, %c0_37, %c0_38] : memref<9x16x16xf32, #tpu.memory_space<vmem>>, vector<1x16x16xf32>
    %56 = vector.shape_cast %55 : vector<1x16x16xf32> to vector<16x16xf32>
    %c0_39 = arith.constant 0 : index
    %c1_40 = arith.constant 1 : index
    %57 = vector.load %arg12[%c0_39, %c1_40] : memref<16x108xf32, #tpu.memory_space<vmem>>, vector<16x80xf32>
    %cst_41 = arith.constant dense<0.000000e+00> : vector<16x80xf32>
    %58 = tpu.matmul %56, %57, %cst_41 {dimension_numbers = #tpu.dot_dimension_numbers<[1], [0], [0], [1], [0, 0, 1, 1], [], []>} : vector<16x16xf32>, vector<16x80xf32>, vector<16x80xf32> -> vector<16x80xf32>
    %59 = arith.addf %54, %58 : vector<16x80xf32>
    %c2 = arith.constant 2 : index
    %c0_42 = arith.constant 0 : index
    %c0_43 = arith.constant 0 : index
    %60 = vector.load %arg7[%c2, %c0_42, %c0_43] : memref<9x16x16xf32, #tpu.memory_space<vmem>>, vector<1x16x16xf32>
    %61 = vector.shape_cast %60 : vector<1x16x16xf32> to vector<16x16xf32>
    %c0_44 = arith.constant 0 : index
    %c2_45 = arith.constant 2 : index
    %62 = vector.load %arg12[%c0_44, %c2_45] : memref<16x108xf32, #tpu.memory_space<vmem>>, vector<16x80xf32>
    %cst_46 = arith.constant dense<0.000000e+00> : vector<16x80xf32>
    %63 = tpu.matmul %61, %62, %cst_46 {dimension_numbers = #tpu.dot_dimension_numbers<[1], [0], [0], [1], [0, 0, 1, 1], [], []>} : vector<16x16xf32>, vector<16x80xf32>, vector<16x80xf32> -> vector<16x80xf32>
    %64 = arith.addf %59, %63 : vector<16x80xf32>
    %c3 = arith.constant 3 : index
    %c0_47 = arith.constant 0 : index
    %c0_48 = arith.constant 0 : index
    %65 = vector.load %arg7[%c3, %c0_47, %c0_48] : memref<9x16x16xf32, #tpu.memory_space<vmem>>, vector<1x16x16xf32>
    %66 = vector.shape_cast %65 : vector<1x16x16xf32> to vector<16x16xf32>
    %c0_49 = arith.constant 0 : index
    %c10 = arith.constant 10 : index
    %67 = vector.load %arg12[%c0_49, %c10] : memref<16x108xf32, #tpu.memory_space<vmem>>, vector<16x80xf32>
    %cst_50 = arith.constant dense<0.000000e+00> : vector<16x80xf32>
    %68 = tpu.matmul %66, %67, %cst_50 {dimension_numbers = #tpu.dot_dimension_numbers<[1], [0], [0], [1], [0, 0, 1, 1], [], []>} : vector<16x16xf32>, vector<16x80xf32>, vector<16x80xf32> -> vector<16x80xf32>
    %69 = arith.addf %64, %68 : vector<16x80xf32>
    %c4 = arith.constant 4 : index
    %c0_51 = arith.constant 0 : index
    %c0_52 = arith.constant 0 : index
    %70 = vector.load %arg7[%c4, %c0_51, %c0_52] : memref<9x16x16xf32, #tpu.memory_space<vmem>>, vector<1x16x16xf32>
    %71 = vector.shape_cast %70 : vector<1x16x16xf32> to vector<16x16xf32>
    %c0_53 = arith.constant 0 : index
    %c11_54 = arith.constant 11 : index
    %72 = vector.load %arg12[%c0_53, %c11_54] : memref<16x108xf32, #tpu.memory_space<vmem>>, vector<16x80xf32>
    %cst_55 = arith.constant dense<0.000000e+00> : vector<16x80xf32>
    %73 = tpu.matmul %71, %72, %cst_55 {dimension_numbers = #tpu.dot_dimension_numbers<[1], [0], [0], [1], [0, 0, 1, 1], [], []>} : vector<16x16xf32>, vector<16x80xf32>, vector<16x80xf32> -> vector<16x80xf32>
    %74 = arith.addf %69, %73 : vector<16x80xf32>
    %c5 = arith.constant 5 : index
    %c0_56 = arith.constant 0 : index
    %c0_57 = arith.constant 0 : index
    %75 = vector.load %arg7[%c5, %c0_56, %c0_57] : memref<9x16x16xf32, #tpu.memory_space<vmem>>, vector<1x16x16xf32>
    %76 = vector.shape_cast %75 : vector<1x16x16xf32> to vector<16x16xf32>
    %c0_58 = arith.constant 0 : index
    %c12 = arith.constant 12 : index
    %77 = vector.load %arg12[%c0_58, %c12] : memref<16x108xf32, #tpu.memory_space<vmem>>, vector<16x80xf32>
    %cst_59 = arith.constant dense<0.000000e+00> : vector<16x80xf32>
    %78 = tpu.matmul %76, %77, %cst_59 {dimension_numbers = #tpu.dot_dimension_numbers<[1], [0], [0], [1], [0, 0, 1, 1], [], []>} : vector<16x16xf32>, vector<16x80xf32>, vector<16x80xf32> -> vector<16x80xf32>
    %79 = arith.addf %74, %78 : vector<16x80xf32>
    %c6 = arith.constant 6 : index
    %c0_60 = arith.constant 0 : index
    %c0_61 = arith.constant 0 : index
    %80 = vector.load %arg7[%c6, %c0_60, %c0_61] : memref<9x16x16xf32, #tpu.memory_space<vmem>>, vector<1x16x16xf32>
    %81 = vector.shape_cast %80 : vector<1x16x16xf32> to vector<16x16xf32>
    %c0_62 = arith.constant 0 : index
    %c20 = arith.constant 20 : index
    %82 = vector.load %arg12[%c0_62, %c20] : memref<16x108xf32, #tpu.memory_space<vmem>>, vector<16x80xf32>
    %cst_63 = arith.constant dense<0.000000e+00> : vector<16x80xf32>
    %83 = tpu.matmul %81, %82, %cst_63 {dimension_numbers = #tpu.dot_dimension_numbers<[1], [0], [0], [1], [0, 0, 1, 1], [], []>} : vector<16x16xf32>, vector<16x80xf32>, vector<16x80xf32> -> vector<16x80xf32>
    %84 = arith.addf %79, %83 : vector<16x80xf32>
    %c7 = arith.constant 7 : index
    %c0_64 = arith.constant 0 : index
    %c0_65 = arith.constant 0 : index
    %85 = vector.load %arg7[%c7, %c0_64, %c0_65] : memref<9x16x16xf32, #tpu.memory_space<vmem>>, vector<1x16x16xf32>
    %86 = vector.shape_cast %85 : vector<1x16x16xf32> to vector<16x16xf32>
    %c0_66 = arith.constant 0 : index
    %c21 = arith.constant 21 : index
    %87 = vector.load %arg12[%c0_66, %c21] : memref<16x108xf32, #tpu.memory_space<vmem>>, vector<16x80xf32>
    %cst_67 = arith.constant dense<0.000000e+00> : vector<16x80xf32>
    %88 = tpu.matmul %86, %87, %cst_67 {dimension_numbers = #tpu.dot_dimension_numbers<[1], [0], [0], [1], [0, 0, 1, 1], [], []>} : vector<16x16xf32>, vector<16x80xf32>, vector<16x80xf32> -> vector<16x80xf32>
    %89 = arith.addf %84, %88 : vector<16x80xf32>
    %c8 = arith.constant 8 : index
    %c0_68 = arith.constant 0 : index
    %c0_69 = arith.constant 0 : index
    %90 = vector.load %arg7[%c8, %c0_68, %c0_69] : memref<9x16x16xf32, #tpu.memory_space<vmem>>, vector<1x16x16xf32>
    %91 = vector.shape_cast %90 : vector<1x16x16xf32> to vector<16x16xf32>
    %c0_70 = arith.constant 0 : index
    %c22 = arith.constant 22 : index
    %92 = vector.load %arg12[%c0_70, %c22] : memref<16x108xf32, #tpu.memory_space<vmem>>, vector<16x80xf32>
    %cst_71 = arith.constant dense<0.000000e+00> : vector<16x80xf32>
    %93 = tpu.matmul %91, %92, %cst_71 {dimension_numbers = #tpu.dot_dimension_numbers<[1], [0], [0], [1], [0, 0, 1, 1], [], []>} : vector<16x16xf32>, vector<16x80xf32>, vector<16x80xf32> -> vector<16x80xf32>
    %94 = arith.addf %89, %93 : vector<16x80xf32>
    %c0_72 = arith.constant 0 : index
    %c0_73 = arith.constant 0 : index
    %95 = vector.load %arg8[%c0_72, %c0_73] : memref<16x1xf32, #tpu.memory_space<vmem>>, vector<16x1xf32>
    %96 = vector.broadcast %95 : vector<16x1xf32> to vector<16x80xf32>
    %97 = arith.addf %94, %96 : vector<16x80xf32>
    %98 = vector.broadcast %0 : vector<1x80xf32> to vector<16x80xf32>
    %99 = arith.mulf %97, %98 : vector<16x80xf32>
    %cst_74 = arith.constant dense<0.000000e+00> : vector<16xf32>
    %100 = vector.multi_reduction <add>, %99, %cst_74 [1] : vector<16x80xf32> to vector<16xf32>
    %101 = vector.shape_cast %100 : vector<16xf32> to vector<16x1xf32>
    %cst_75 = arith.constant 1.562500e-02 : f32
    %102 = vector.broadcast %cst_75 : f32 to vector<16x1xf32>
    %103 = arith.mulf %101, %102 : vector<16x1xf32>
    %104 = vector.broadcast %103 : vector<16x1xf32> to vector<16x80xf32>
    %105 = arith.subf %97, %104 : vector<16x80xf32>
    %106 = vector.broadcast %0 : vector<1x80xf32> to vector<16x80xf32>
    %107 = arith.mulf %105, %106 : vector<16x80xf32>
    %108 = arith.mulf %107, %107 : vector<16x80xf32>
    %cst_76 = arith.constant dense<0.000000e+00> : vector<16xf32>
    %109 = vector.multi_reduction <add>, %108, %cst_76 [1] : vector<16x80xf32> to vector<16xf32>
    %110 = vector.shape_cast %109 : vector<16xf32> to vector<16x1xf32>
    %cst_77 = arith.constant 1.562500e-02 : f32
    %111 = vector.broadcast %cst_77 : f32 to vector<16x1xf32>
    %112 = arith.mulf %110, %111 : vector<16x1xf32>
    %113 = vector.broadcast %103 : vector<16x1xf32> to vector<16x80xf32>
    %114 = arith.subf %97, %113 : vector<16x80xf32>
    %cst_78 = arith.constant 9.99999974E-6 : f32
    %115 = vector.broadcast %cst_78 : f32 to vector<16x1xf32>
    %116 = arith.addf %112, %115 : vector<16x1xf32>
    %117 = math.rsqrt %116 : vector<16x1xf32>
    %118 = vector.broadcast %117 : vector<16x1xf32> to vector<16x80xf32>
    %119 = arith.mulf %114, %118 : vector<16x80xf32>
    %cst_79 = arith.constant 0.000000e+00 : f32
    %120 = vector.broadcast %cst_79 : f32 to vector<16x80xf32>
    %121 = arith.cmpf oge, %119, %120 : vector<16x80xf32>
    %122 = vector.broadcast %2 : f32 to vector<16x80xf32>
    %123 = arith.mulf %122, %119 : vector<16x80xf32>
    %124 = arith.select %121, %119, %123 : vector<16x80xi1>, vector<16x80xf32>
    %125 = arith.addf %124, %43 : vector<16x80xf32>
    %c0_80 = arith.constant 0 : index
    %c0_81 = arith.constant 0 : index
    %c0_82 = arith.constant 0 : index
    %126 = vector.load %arg11[%c0_80, %c0_81, %c0_82] : memref<1x16x80xf32, #tpu.memory_space<vmem>>, vector<1x16x80xf32>
    %127 = vector.shape_cast %126 : vector<1x16x80xf32> to vector<16x80xf32>
    %128 = vector.shape_cast %125 : vector<16x80xf32> to vector<1x16x80xf32>
    tpu.vector_store %arg11[%c0_80, %c0_81, %c0_82], %128 {strides = array<i32>} : memref<1x16x80xf32, #tpu.memory_space<vmem>>, vector<1x16x80xf32>,
    return
  }
  func.func @transform_0(%arg0: i32) -> (i32, i32, i32) {
    %c0_i32 = arith.constant 0 : i32
    %c0_i32_0 = arith.constant 0 : i32
    %c0_i32_1 = arith.constant 0 : i32
    return %arg0, %c0_i32, %c0_i32_0 : i32, i32, i32
  }
  func.func @transform_1(%arg0: i32) -> (i32, i32) {
    %c0_i32 = arith.constant 0 : i32
    %c0_i32_0 = arith.constant 0 : i32
    %c0_i32_1 = arith.constant 0 : i32
    return %c0_i32, %c0_i32_0 : i32, i32
  }
  func.func @transform_2(%arg0: i32) -> (i32, i32) {
    %c0_i32 = arith.constant 0 : i32
    %c0_i32_0 = arith.constant 0 : i32
    %c0_i32_1 = arith.constant 0 : i32
    return %c0_i32, %c0_i32_0 : i32, i32
  }
  func.func @transform_3(%arg0: i32) -> (i32, i32, i32) {
    %c0_i32 = arith.constant 0 : i32
    %c0_i32_0 = arith.constant 0 : i32
    %c0_i32_1 = arith.constant 0 : i32
    return %arg0, %c0_i32, %c0_i32_0 : i32, i32, i32
  }
  func.func @transform_4(%arg0: i32) -> (i32, i32) {
    %c0_i32 = arith.constant 0 : i32
    %c0_i32_0 = arith.constant 0 : i32
    %c0_i32_1 = arith.constant 0 : i32
    return %c0_i32, %c0_i32_0 : i32, i32
  }
  func.func @transform_5(%arg0: i32) -> (i32, i32) {
    %c0_i32 = arith.constant 0 : i32
    %c0_i32_0 = arith.constant 0 : i32
    %c0_i32_1 = arith.constant 0 : i32
    return %c0_i32, %c0_i32_0 : i32, i32
  }
  func.func @transform_6(%arg0: i32) -> (i32, i32, i32) {
    %c0_i32 = arith.constant 0 : i32
    %c0_i32_0 = arith.constant 0 : i32
    %c0_i32_1 = arith.constant 0 : i32
    %c0_i32_2 = arith.constant 0 : i32
    return %c0_i32, %c0_i32_0, %c0_i32_1 : i32, i32, i32
  }
  func.func @transform_7(%arg0: i32) -> (i32, i32) {
    %c0_i32 = arith.constant 0 : i32
    %c0_i32_0 = arith.constant 0 : i32
    %c0_i32_1 = arith.constant 0 : i32
    return %c0_i32, %c0_i32_0 : i32, i32
  }
  func.func @transform_8(%arg0: i32) -> (i32, i32) {
    %c0_i32 = arith.constant 0 : i32
    %c0_i32_0 = arith.constant 0 : i32
    %c0_i32_1 = arith.constant 0 : i32
    return %c0_i32, %c0_i32_0 : i32, i32
  }
  func.func @transform_9(%arg0: i32) -> (i32, i32) {
    %c0_i32 = arith.constant 0 : i32
    %c0_i32_0 = arith.constant 0 : i32
    %c0_i32_1 = arith.constant 0 : i32
    return %c0_i32, %c0_i32_0 : i32, i32
  }
  func.func @transform_10(%arg0: i32) -> (i32, i32, i32) {
    %c0_i32 = arith.constant 0 : i32
    %c0_i32_0 = arith.constant 0 : i32
    %c0_i32_1 = arith.constant 0 : i32
    return %arg0, %c0_i32, %c0_i32_0 : i32, i32, i32
  }
}

module attributes {stable_mosaic.version = 11 : i64} {
  func.func @kernel(%arg0: i32, %arg1: memref<1x216x288xbf16, #tpu.memory_space<vmem>>, %arg2: memref<8x216xbf16, #tpu.memory_space<vmem>>, %arg3: memref<8x1xf32, #tpu.memory_space<vmem>>, %arg4: memref<1x24x288xbf16, #tpu.memory_space<vmem>>, %arg5: memref<8x24xbf16, #tpu.memory_space<vmem>>, %arg6: memref<8x1xf32, #tpu.memory_space<vmem>>, %arg7: memref<9x8x8xf32, #tpu.memory_space<vmem>>, %arg8: memref<8x1xf32, #tpu.memory_space<vmem>>, %arg9: memref<1x288xf32, #tpu.memory_space<vmem>>, %arg10: memref<1x2xf32, #tpu.memory_space<smem>>, %arg11: memref<3x8xf32, #tpu.memory_space<vmem>>, %arg12: memref<3x1xf32, #tpu.memory_space<vmem>>, %arg13: memref<1x3x288xf32, #tpu.memory_space<vmem>>, %arg14: memref<8x332xf32, #tpu.memory_space<vmem>>) attributes {dimension_semantics = [#tpu.dimension_semantics<parallel>], iteration_bounds = array<i64: 2>, scalar_prefetch = 0 : i64, scratch_operands = 1 : i64, tpu.core_type = #tpu.core_type<tc>, window_params = [{transform_indices = @transform_0, window_bounds = array<i64: 1, 216, 288>}, {pipeline_mode = #tpu.pipeline_mode<synchronous>, transform_indices = @transform_1, window_bounds = array<i64: 8, 216>}, {pipeline_mode = #tpu.pipeline_mode<synchronous>, transform_indices = @transform_2, window_bounds = array<i64: 8, 1>}, {transform_indices = @transform_3, window_bounds = array<i64: 1, 24, 288>}, {pipeline_mode = #tpu.pipeline_mode<synchronous>, transform_indices = @transform_4, window_bounds = array<i64: 8, 24>}, {pipeline_mode = #tpu.pipeline_mode<synchronous>, transform_indices = @transform_5, window_bounds = array<i64: 8, 1>}, {pipeline_mode = #tpu.pipeline_mode<synchronous>, transform_indices = @transform_6, window_bounds = array<i64: 9, 8, 8>}, {pipeline_mode = #tpu.pipeline_mode<synchronous>, transform_indices = @transform_7, window_bounds = array<i64: 8, 1>}, {pipeline_mode = #tpu.pipeline_mode<synchronous>, transform_indices = @transform_8, window_bounds = array<i64: 1, 288>}, {transform_indices = @transform_9, window_bounds = array<i64: 1, 2>}, {pipeline_mode = #tpu.pipeline_mode<synchronous>, transform_indices = @transform_10, window_bounds = array<i64: 3, 8>}, {pipeline_mode = #tpu.pipeline_mode<synchronous>, transform_indices = @transform_11, window_bounds = array<i64: 3, 1>}, {transform_indices = @transform_12, window_bounds = array<i64: 1, 3, 288>}]} {
    %c0 = arith.constant 0 : index
    %c0_0 = arith.constant 0 : index
    %0 = vector.load %arg9[%c0, %c0_0] : memref<1x288xf32, #tpu.memory_space<vmem>>, vector<1x288xf32>
    %c0_1 = arith.constant 0 : index
    %c0_2 = arith.constant 0 : index
    %1 = memref.load %arg10[%c0_1, %c0_2] : memref<1x2xf32, #tpu.memory_space<smem>>
    %c0_3 = arith.constant 0 : index
    %c1 = arith.constant 1 : index
    %2 = memref.load %arg10[%c0_3, %c1] : memref<1x2xf32, #tpu.memory_space<smem>>
    %c0_4 = arith.constant 0 : index
    %c0_5 = arith.constant 0 : index
    %3 = vector.load %arg2[%c0_4, %c0_5] : memref<8x216xbf16, #tpu.memory_space<vmem>>, vector<8x216xbf16>
    %c0_6 = arith.constant 0 : index
    %c0_7 = arith.constant 0 : index
    %c0_8 = arith.constant 0 : index
    %4 = vector.load %arg1[%c0_6, %c0_7, %c0_8] : memref<1x216x288xbf16, #tpu.memory_space<vmem>>, vector<1x216x288xbf16>
    %5 = vector.shape_cast %4 : vector<1x216x288xbf16> to vector<216x288xbf16>
    %cst = arith.constant dense<0.000000e+00> : vector<8x288xf32>
    %6 = tpu.matmul %3, %5, %cst {dimension_numbers = #tpu.dot_dimension_numbers<[1], [0], [0], [1], [0, 0, 1, 1], [], []>} : vector<8x216xbf16>, vector<216x288xbf16>, vector<8x288xf32> -> vector<8x288xf32>
    %c0_9 = arith.constant 0 : index
    %c0_10 = arith.constant 0 : index
    %7 = vector.load %arg3[%c0_9, %c0_10] : memref<8x1xf32, #tpu.memory_space<vmem>>, vector<8x1xf32>
    %8 = vector.broadcast %7 : vector<8x1xf32> to vector<8x288xf32>
    %9 = arith.addf %6, %8 : vector<8x288xf32>
    %10 = vector.broadcast %0 : vector<1x288xf32> to vector<8x288xf32>
    %11 = arith.mulf %9, %10 : vector<8x288xf32>
    %cst_11 = arith.constant dense<0.000000e+00> : vector<8xf32>
    %12 = vector.multi_reduction <add>, %11, %cst_11 [1] : vector<8x288xf32> to vector<8xf32>
    %13 = vector.shape_cast %12 : vector<8xf32> to vector<8x1xf32>
    %cst_12 = arith.constant 3.906250e-03 : f32
    %14 = vector.broadcast %cst_12 : f32 to vector<8x1xf32>
    %15 = arith.mulf %13, %14 : vector<8x1xf32>
    %16 = vector.broadcast %15 : vector<8x1xf32> to vector<8x288xf32>
    %17 = arith.subf %9, %16 : vector<8x288xf32>
    %18 = vector.broadcast %0 : vector<1x288xf32> to vector<8x288xf32>
    %19 = arith.mulf %17, %18 : vector<8x288xf32>
    %20 = arith.mulf %19, %19 : vector<8x288xf32>
    %cst_13 = arith.constant dense<0.000000e+00> : vector<8xf32>
    %21 = vector.multi_reduction <add>, %20, %cst_13 [1] : vector<8x288xf32> to vector<8xf32>
    %22 = vector.shape_cast %21 : vector<8xf32> to vector<8x1xf32>
    %cst_14 = arith.constant 3.906250e-03 : f32
    %23 = vector.broadcast %cst_14 : f32 to vector<8x1xf32>
    %24 = arith.mulf %22, %23 : vector<8x1xf32>
    %25 = vector.broadcast %15 : vector<8x1xf32> to vector<8x288xf32>
    %26 = arith.subf %9, %25 : vector<8x288xf32>
    %cst_15 = arith.constant 9.99999974E-6 : f32
    %27 = vector.broadcast %cst_15 : f32 to vector<8x1xf32>
    %28 = arith.addf %24, %27 : vector<8x1xf32>
    %29 = math.rsqrt %28 : vector<8x1xf32>
    %30 = vector.broadcast %29 : vector<8x1xf32> to vector<8x288xf32>
    %31 = arith.mulf %26, %30 : vector<8x288xf32>
    %cst_16 = arith.constant 0.000000e+00 : f32
    %32 = vector.broadcast %cst_16 : f32 to vector<8x288xf32>
    %33 = arith.cmpf oge, %31, %32 : vector<8x288xf32>
    %34 = vector.broadcast %1 : f32 to vector<8x288xf32>
    %35 = arith.mulf %34, %31 : vector<8x288xf32>
    %36 = arith.select %33, %31, %35 : vector<8x288xi1>, vector<8x288xf32>
    %c0_17 = arith.constant 0 : index
    %c0_18 = arith.constant 0 : index
    %37 = vector.load %arg5[%c0_17, %c0_18] : memref<8x24xbf16, #tpu.memory_space<vmem>>, vector<8x24xbf16>
    %c0_19 = arith.constant 0 : index
    %c0_20 = arith.constant 0 : index
    %c0_21 = arith.constant 0 : index
    %38 = vector.load %arg4[%c0_19, %c0_20, %c0_21] : memref<1x24x288xbf16, #tpu.memory_space<vmem>>, vector<1x24x288xbf16>
    %39 = vector.shape_cast %38 : vector<1x24x288xbf16> to vector<24x288xbf16>
    %cst_22 = arith.constant dense<0.000000e+00> : vector<8x288xf32>
    %40 = tpu.matmul %37, %39, %cst_22 {dimension_numbers = #tpu.dot_dimension_numbers<[1], [0], [0], [1], [0, 0, 1, 1], [], []>} : vector<8x24xbf16>, vector<24x288xbf16>, vector<8x288xf32> -> vector<8x288xf32>
    %c0_23 = arith.constant 0 : index
    %c0_24 = arith.constant 0 : index
    %41 = vector.load %arg6[%c0_23, %c0_24] : memref<8x1xf32, #tpu.memory_space<vmem>>, vector<8x1xf32>
    %42 = vector.broadcast %41 : vector<8x1xf32> to vector<8x288xf32>
    %43 = arith.addf %40, %42 : vector<8x288xf32>
    %cst_25 = arith.constant 0.000000e+00 : f32
    %44 = vector.broadcast %cst_25 : f32 to vector<8x332xf32>
    %c0_26 = arith.constant 0 : index
    %c0_27 = arith.constant 0 : index
    %45 = vector.load %arg14[%c0_26, %c0_27] : memref<8x332xf32, #tpu.memory_space<vmem>>, vector<8x332xf32>
    tpu.vector_store %arg14[%c0_26, %c0_27], %44 {strides = array<i32>} : memref<8x332xf32, #tpu.memory_space<vmem>>, vector<8x332xf32>,
    %46 = vector.broadcast %0 : vector<1x288xf32> to vector<8x288xf32>
    %47 = arith.mulf %36, %46 : vector<8x288xf32>
    %c0_28 = arith.constant 0 : index
    %c19 = arith.constant 19 : index
    %48 = vector.load %arg14[%c0_28, %c19] : memref<8x332xf32, #tpu.memory_space<vmem>>, vector<8x288xf32>
    tpu.vector_store %arg14[%c0_28, %c19], %47 {strides = array<i32>} : memref<8x332xf32, #tpu.memory_space<vmem>>, vector<8x288xf32>,
    %cst_29 = arith.constant 0.000000e+00 : f32
    %49 = vector.broadcast %cst_29 : f32 to vector<8x288xf32>
    %c0_30 = arith.constant 0 : index
    %c0_31 = arith.constant 0 : index
    %c0_32 = arith.constant 0 : index
    %50 = vector.load %arg7[%c0_30, %c0_31, %c0_32] : memref<9x8x8xf32, #tpu.memory_space<vmem>>, vector<1x8x8xf32>
    %51 = vector.shape_cast %50 : vector<1x8x8xf32> to vector<8x8xf32>
    %c0_33 = arith.constant 0 : index
    %c0_34 = arith.constant 0 : index
    %52 = vector.load %arg14[%c0_33, %c0_34] : memref<8x332xf32, #tpu.memory_space<vmem>>, vector<8x288xf32>
    %cst_35 = arith.constant dense<0.000000e+00> : vector<8x288xf32>
    %53 = tpu.matmul %51, %52, %cst_35 {dimension_numbers = #tpu.dot_dimension_numbers<[1], [0], [0], [1], [0, 0, 1, 1], [], []>} : vector<8x8xf32>, vector<8x288xf32>, vector<8x288xf32> -> vector<8x288xf32>
    %54 = arith.addf %49, %53 : vector<8x288xf32>
    %c1_36 = arith.constant 1 : index
    %c0_37 = arith.constant 0 : index
    %c0_38 = arith.constant 0 : index
    %55 = vector.load %arg7[%c1_36, %c0_37, %c0_38] : memref<9x8x8xf32, #tpu.memory_space<vmem>>, vector<1x8x8xf32>
    %56 = vector.shape_cast %55 : vector<1x8x8xf32> to vector<8x8xf32>
    %c0_39 = arith.constant 0 : index
    %c1_40 = arith.constant 1 : index
    %57 = vector.load %arg14[%c0_39, %c1_40] : memref<8x332xf32, #tpu.memory_space<vmem>>, vector<8x288xf32>
    %cst_41 = arith.constant dense<0.000000e+00> : vector<8x288xf32>
    %58 = tpu.matmul %56, %57, %cst_41 {dimension_numbers = #tpu.dot_dimension_numbers<[1], [0], [0], [1], [0, 0, 1, 1], [], []>} : vector<8x8xf32>, vector<8x288xf32>, vector<8x288xf32> -> vector<8x288xf32>
    %59 = arith.addf %54, %58 : vector<8x288xf32>
    %c2 = arith.constant 2 : index
    %c0_42 = arith.constant 0 : index
    %c0_43 = arith.constant 0 : index
    %60 = vector.load %arg7[%c2, %c0_42, %c0_43] : memref<9x8x8xf32, #tpu.memory_space<vmem>>, vector<1x8x8xf32>
    %61 = vector.shape_cast %60 : vector<1x8x8xf32> to vector<8x8xf32>
    %c0_44 = arith.constant 0 : index
    %c2_45 = arith.constant 2 : index
    %62 = vector.load %arg14[%c0_44, %c2_45] : memref<8x332xf32, #tpu.memory_space<vmem>>, vector<8x288xf32>
    %cst_46 = arith.constant dense<0.000000e+00> : vector<8x288xf32>
    %63 = tpu.matmul %61, %62, %cst_46 {dimension_numbers = #tpu.dot_dimension_numbers<[1], [0], [0], [1], [0, 0, 1, 1], [], []>} : vector<8x8xf32>, vector<8x288xf32>, vector<8x288xf32> -> vector<8x288xf32>
    %64 = arith.addf %59, %63 : vector<8x288xf32>
    %c3 = arith.constant 3 : index
    %c0_47 = arith.constant 0 : index
    %c0_48 = arith.constant 0 : index
    %65 = vector.load %arg7[%c3, %c0_47, %c0_48] : memref<9x8x8xf32, #tpu.memory_space<vmem>>, vector<1x8x8xf32>
    %66 = vector.shape_cast %65 : vector<1x8x8xf32> to vector<8x8xf32>
    %c0_49 = arith.constant 0 : index
    %c18 = arith.constant 18 : index
    %67 = vector.load %arg14[%c0_49, %c18] : memref<8x332xf32, #tpu.memory_space<vmem>>, vector<8x288xf32>
    %cst_50 = arith.constant dense<0.000000e+00> : vector<8x288xf32>
    %68 = tpu.matmul %66, %67, %cst_50 {dimension_numbers = #tpu.dot_dimension_numbers<[1], [0], [0], [1], [0, 0, 1, 1], [], []>} : vector<8x8xf32>, vector<8x288xf32>, vector<8x288xf32> -> vector<8x288xf32>
    %69 = arith.addf %64, %68 : vector<8x288xf32>
    %c4 = arith.constant 4 : index
    %c0_51 = arith.constant 0 : index
    %c0_52 = arith.constant 0 : index
    %70 = vector.load %arg7[%c4, %c0_51, %c0_52] : memref<9x8x8xf32, #tpu.memory_space<vmem>>, vector<1x8x8xf32>
    %71 = vector.shape_cast %70 : vector<1x8x8xf32> to vector<8x8xf32>
    %c0_53 = arith.constant 0 : index
    %c19_54 = arith.constant 19 : index
    %72 = vector.load %arg14[%c0_53, %c19_54] : memref<8x332xf32, #tpu.memory_space<vmem>>, vector<8x288xf32>
    %cst_55 = arith.constant dense<0.000000e+00> : vector<8x288xf32>
    %73 = tpu.matmul %71, %72, %cst_55 {dimension_numbers = #tpu.dot_dimension_numbers<[1], [0], [0], [1], [0, 0, 1, 1], [], []>} : vector<8x8xf32>, vector<8x288xf32>, vector<8x288xf32> -> vector<8x288xf32>
    %74 = arith.addf %69, %73 : vector<8x288xf32>
    %c5 = arith.constant 5 : index
    %c0_56 = arith.constant 0 : index
    %c0_57 = arith.constant 0 : index
    %75 = vector.load %arg7[%c5, %c0_56, %c0_57] : memref<9x8x8xf32, #tpu.memory_space<vmem>>, vector<1x8x8xf32>
    %76 = vector.shape_cast %75 : vector<1x8x8xf32> to vector<8x8xf32>
    %c0_58 = arith.constant 0 : index
    %c20 = arith.constant 20 : index
    %77 = vector.load %arg14[%c0_58, %c20] : memref<8x332xf32, #tpu.memory_space<vmem>>, vector<8x288xf32>
    %cst_59 = arith.constant dense<0.000000e+00> : vector<8x288xf32>
    %78 = tpu.matmul %76, %77, %cst_59 {dimension_numbers = #tpu.dot_dimension_numbers<[1], [0], [0], [1], [0, 0, 1, 1], [], []>} : vector<8x8xf32>, vector<8x288xf32>, vector<8x288xf32> -> vector<8x288xf32>
    %79 = arith.addf %74, %78 : vector<8x288xf32>
    %c6 = arith.constant 6 : index
    %c0_60 = arith.constant 0 : index
    %c0_61 = arith.constant 0 : index
    %80 = vector.load %arg7[%c6, %c0_60, %c0_61] : memref<9x8x8xf32, #tpu.memory_space<vmem>>, vector<1x8x8xf32>
    %81 = vector.shape_cast %80 : vector<1x8x8xf32> to vector<8x8xf32>
    %c0_62 = arith.constant 0 : index
    %c36 = arith.constant 36 : index
    %82 = vector.load %arg14[%c0_62, %c36] : memref<8x332xf32, #tpu.memory_space<vmem>>, vector<8x288xf32>
    %cst_63 = arith.constant dense<0.000000e+00> : vector<8x288xf32>
    %83 = tpu.matmul %81, %82, %cst_63 {dimension_numbers = #tpu.dot_dimension_numbers<[1], [0], [0], [1], [0, 0, 1, 1], [], []>} : vector<8x8xf32>, vector<8x288xf32>, vector<8x288xf32> -> vector<8x288xf32>
    %84 = arith.addf %79, %83 : vector<8x288xf32>
    %c7 = arith.constant 7 : index
    %c0_64 = arith.constant 0 : index
    %c0_65 = arith.constant 0 : index
    %85 = vector.load %arg7[%c7, %c0_64, %c0_65] : memref<9x8x8xf32, #tpu.memory_space<vmem>>, vector<1x8x8xf32>
    %86 = vector.shape_cast %85 : vector<1x8x8xf32> to vector<8x8xf32>
    %c0_66 = arith.constant 0 : index
    %c37 = arith.constant 37 : index
    %87 = vector.load %arg14[%c0_66, %c37] : memref<8x332xf32, #tpu.memory_space<vmem>>, vector<8x288xf32>
    %cst_67 = arith.constant dense<0.000000e+00> : vector<8x288xf32>
    %88 = tpu.matmul %86, %87, %cst_67 {dimension_numbers = #tpu.dot_dimension_numbers<[1], [0], [0], [1], [0, 0, 1, 1], [], []>} : vector<8x8xf32>, vector<8x288xf32>, vector<8x288xf32> -> vector<8x288xf32>
    %89 = arith.addf %84, %88 : vector<8x288xf32>
    %c8 = arith.constant 8 : index
    %c0_68 = arith.constant 0 : index
    %c0_69 = arith.constant 0 : index
    %90 = vector.load %arg7[%c8, %c0_68, %c0_69] : memref<9x8x8xf32, #tpu.memory_space<vmem>>, vector<1x8x8xf32>
    %91 = vector.shape_cast %90 : vector<1x8x8xf32> to vector<8x8xf32>
    %c0_70 = arith.constant 0 : index
    %c38 = arith.constant 38 : index
    %92 = vector.load %arg14[%c0_70, %c38] : memref<8x332xf32, #tpu.memory_space<vmem>>, vector<8x288xf32>
    %cst_71 = arith.constant dense<0.000000e+00> : vector<8x288xf32>
    %93 = tpu.matmul %91, %92, %cst_71 {dimension_numbers = #tpu.dot_dimension_numbers<[1], [0], [0], [1], [0, 0, 1, 1], [], []>} : vector<8x8xf32>, vector<8x288xf32>, vector<8x288xf32> -> vector<8x288xf32>
    %94 = arith.addf %89, %93 : vector<8x288xf32>
    %c0_72 = arith.constant 0 : index
    %c0_73 = arith.constant 0 : index
    %95 = vector.load %arg8[%c0_72, %c0_73] : memref<8x1xf32, #tpu.memory_space<vmem>>, vector<8x1xf32>
    %96 = vector.broadcast %95 : vector<8x1xf32> to vector<8x288xf32>
    %97 = arith.addf %94, %96 : vector<8x288xf32>
    %98 = vector.broadcast %0 : vector<1x288xf32> to vector<8x288xf32>
    %99 = arith.mulf %97, %98 : vector<8x288xf32>
    %cst_74 = arith.constant dense<0.000000e+00> : vector<8xf32>
    %100 = vector.multi_reduction <add>, %99, %cst_74 [1] : vector<8x288xf32> to vector<8xf32>
    %101 = vector.shape_cast %100 : vector<8xf32> to vector<8x1xf32>
    %cst_75 = arith.constant 3.906250e-03 : f32
    %102 = vector.broadcast %cst_75 : f32 to vector<8x1xf32>
    %103 = arith.mulf %101, %102 : vector<8x1xf32>
    %104 = vector.broadcast %103 : vector<8x1xf32> to vector<8x288xf32>
    %105 = arith.subf %97, %104 : vector<8x288xf32>
    %106 = vector.broadcast %0 : vector<1x288xf32> to vector<8x288xf32>
    %107 = arith.mulf %105, %106 : vector<8x288xf32>
    %108 = arith.mulf %107, %107 : vector<8x288xf32>
    %cst_76 = arith.constant dense<0.000000e+00> : vector<8xf32>
    %109 = vector.multi_reduction <add>, %108, %cst_76 [1] : vector<8x288xf32> to vector<8xf32>
    %110 = vector.shape_cast %109 : vector<8xf32> to vector<8x1xf32>
    %cst_77 = arith.constant 3.906250e-03 : f32
    %111 = vector.broadcast %cst_77 : f32 to vector<8x1xf32>
    %112 = arith.mulf %110, %111 : vector<8x1xf32>
    %113 = vector.broadcast %103 : vector<8x1xf32> to vector<8x288xf32>
    %114 = arith.subf %97, %113 : vector<8x288xf32>
    %cst_78 = arith.constant 9.99999974E-6 : f32
    %115 = vector.broadcast %cst_78 : f32 to vector<8x1xf32>
    %116 = arith.addf %112, %115 : vector<8x1xf32>
    %117 = math.rsqrt %116 : vector<8x1xf32>
    %118 = vector.broadcast %117 : vector<8x1xf32> to vector<8x288xf32>
    %119 = arith.mulf %114, %118 : vector<8x288xf32>
    %cst_79 = arith.constant 0.000000e+00 : f32
    %120 = vector.broadcast %cst_79 : f32 to vector<8x288xf32>
    %121 = arith.cmpf oge, %119, %120 : vector<8x288xf32>
    %122 = vector.broadcast %2 : f32 to vector<8x288xf32>
    %123 = arith.mulf %122, %119 : vector<8x288xf32>
    %124 = arith.select %121, %119, %123 : vector<8x288xi1>, vector<8x288xf32>
    %125 = arith.addf %124, %43 : vector<8x288xf32>
    %c0_80 = arith.constant 0 : index
    %c0_81 = arith.constant 0 : index
    %126 = vector.load %arg11[%c0_80, %c0_81] : memref<3x8xf32, #tpu.memory_space<vmem>>, vector<3x8xf32>
    %cst_82 = arith.constant dense<0.000000e+00> : vector<3x288xf32>
    %127 = tpu.matmul %126, %125, %cst_82 {dimension_numbers = #tpu.dot_dimension_numbers<[1], [0], [0], [1], [0, 0, 1, 1], [], []>} : vector<3x8xf32>, vector<8x288xf32>, vector<3x288xf32> -> vector<3x288xf32>
    %c0_83 = arith.constant 0 : index
    %c0_84 = arith.constant 0 : index
    %128 = vector.load %arg12[%c0_83, %c0_84] : memref<3x1xf32, #tpu.memory_space<vmem>>, vector<3x1xf32>
    %129 = vector.broadcast %128 : vector<3x1xf32> to vector<3x288xf32>
    %130 = arith.addf %127, %129 : vector<3x288xf32>
    %c0_85 = arith.constant 0 : index
    %c0_86 = arith.constant 0 : index
    %c0_87 = arith.constant 0 : index
    %131 = vector.load %arg13[%c0_85, %c0_86, %c0_87] : memref<1x3x288xf32, #tpu.memory_space<vmem>>, vector<1x3x288xf32>
    %132 = vector.shape_cast %131 : vector<1x3x288xf32> to vector<3x288xf32>
    %133 = vector.shape_cast %130 : vector<3x288xf32> to vector<1x3x288xf32>
    tpu.vector_store %arg13[%c0_85, %c0_86, %c0_87], %133 {strides = array<i32>} : memref<1x3x288xf32, #tpu.memory_space<vmem>>, vector<1x3x288xf32>,
    return
  }
  func.func @transform_0(%arg0: i32) -> (i32, i32, i32) {
    %c0_i32 = arith.constant 0 : i32
    %c0_i32_0 = arith.constant 0 : i32
    %c0_i32_1 = arith.constant 0 : i32
    return %arg0, %c0_i32, %c0_i32_0 : i32, i32, i32
  }
  func.func @transform_1(%arg0: i32) -> (i32, i32) {
    %c0_i32 = arith.constant 0 : i32
    %c0_i32_0 = arith.constant 0 : i32
    %c0_i32_1 = arith.constant 0 : i32
    return %c0_i32, %c0_i32_0 : i32, i32
  }
  func.func @transform_2(%arg0: i32) -> (i32, i32) {
    %c0_i32 = arith.constant 0 : i32
    %c0_i32_0 = arith.constant 0 : i32
    %c0_i32_1 = arith.constant 0 : i32
    return %c0_i32, %c0_i32_0 : i32, i32
  }
  func.func @transform_3(%arg0: i32) -> (i32, i32, i32) {
    %c0_i32 = arith.constant 0 : i32
    %c0_i32_0 = arith.constant 0 : i32
    %c0_i32_1 = arith.constant 0 : i32
    return %arg0, %c0_i32, %c0_i32_0 : i32, i32, i32
  }
  func.func @transform_4(%arg0: i32) -> (i32, i32) {
    %c0_i32 = arith.constant 0 : i32
    %c0_i32_0 = arith.constant 0 : i32
    %c0_i32_1 = arith.constant 0 : i32
    return %c0_i32, %c0_i32_0 : i32, i32
  }
  func.func @transform_5(%arg0: i32) -> (i32, i32) {
    %c0_i32 = arith.constant 0 : i32
    %c0_i32_0 = arith.constant 0 : i32
    %c0_i32_1 = arith.constant 0 : i32
    return %c0_i32, %c0_i32_0 : i32, i32
  }
  func.func @transform_6(%arg0: i32) -> (i32, i32, i32) {
    %c0_i32 = arith.constant 0 : i32
    %c0_i32_0 = arith.constant 0 : i32
    %c0_i32_1 = arith.constant 0 : i32
    %c0_i32_2 = arith.constant 0 : i32
    return %c0_i32, %c0_i32_0, %c0_i32_1 : i32, i32, i32
  }
  func.func @transform_7(%arg0: i32) -> (i32, i32) {
    %c0_i32 = arith.constant 0 : i32
    %c0_i32_0 = arith.constant 0 : i32
    %c0_i32_1 = arith.constant 0 : i32
    return %c0_i32, %c0_i32_0 : i32, i32
  }
  func.func @transform_8(%arg0: i32) -> (i32, i32) {
    %c0_i32 = arith.constant 0 : i32
    %c0_i32_0 = arith.constant 0 : i32
    %c0_i32_1 = arith.constant 0 : i32
    return %c0_i32, %c0_i32_0 : i32, i32
  }
  func.func @transform_9(%arg0: i32) -> (i32, i32) {
    %c0_i32 = arith.constant 0 : i32
    %c0_i32_0 = arith.constant 0 : i32
    %c0_i32_1 = arith.constant 0 : i32
    return %c0_i32, %c0_i32_0 : i32, i32
  }
  func.func @transform_10(%arg0: i32) -> (i32, i32) {
    %c0_i32 = arith.constant 0 : i32
    %c0_i32_0 = arith.constant 0 : i32
    %c0_i32_1 = arith.constant 0 : i32
    return %c0_i32, %c0_i32_0 : i32, i32
  }
  func.func @transform_11(%arg0: i32) -> (i32, i32) {
    %c0_i32 = arith.constant 0 : i32
    %c0_i32_0 = arith.constant 0 : i32
    %c0_i32_1 = arith.constant 0 : i32
    return %c0_i32, %c0_i32_0 : i32, i32
  }
  func.func @transform_12(%arg0: i32) -> (i32, i32, i32) {
    %c0_i32 = arith.constant 0 : i32
    %c0_i32_0 = arith.constant 0 : i32
    %c0_i32_1 = arith.constant 0 : i32
    return %arg0, %c0_i32, %c0_i32_0 : i32, i32, i32
  }
}

</mosaic_0001>

<bundles_post_ra>
// kernel: unet_forward.5
= control target key start
LH: loop header
LB: loop body
LE: loop exit
PB: predicated region body
PF: predicated region fallthrough
CT: control target
= control target key end

     0   :  { %s385_s12 = smov 0   ;;  %s408_s0 = inlined_call_operand.vmem [shape: bf16[2,36,256], index: 0, kind: input, shape index: {}]   ;;  %s409_s1 = inlined_call_operand.vmem [shape: bf16[8,36], index: 1, kind: input, shape index: {}]   ;;  %s410_s2 = inlined_call_operand.vmem [shape: f32[8,1], index: 2, kind: input, shape index: {}]   ;;  %s411_s3 = inlined_call_operand.vmem [shape: f32[2,8,256], index: 3, kind: output, shape index: {}]  }
   0x1 LB: > { %s318_s13 = sadd.s32 4294967295, %s362_s12   ;;  %p322_p0 = scmp.ge.s32.totalorder %s362_s12, 1  ;;  %s362_s12 = sphi %s385_s12, %s13_s12  }
   0x2   : > { %p137_p1 = scmp.lt.s32.totalorder %s362_s12, 3 }
   0x4   : > { %p138_p2 = pnand %p322_p0, %p137_p1 }
   0x5   : > { %p161_p3 = scmp.lt.s32.totalorder (!%p138_p2), %s318_s13, 1  ;;  %v364_v0 = vmov (!%p138_p2), 0   ;;  %v178_v1 = vld [vmem:[%s410_s2] sm:$0xff] (!%p138_p2)  ;;  %vm213_vm0 = vcmask (!%p138_p2), 1041408   ;;  %vm209_vm1 = vcmask (!%p138_p2), 293888  }
   0x6   : > { %141 = sbr.rel (%p138_p2) target bundleno = 246 (0xf6), region = 32  ;;  %252 = vmatprep.mubr.bf16.mxu0 (!%p138_p2), %v364_v0  ;;  %347 = vset.pattern.permute.xlu0 (!%p138_p2), %v364_v0  ;;  %v172_v10 = vld [vmem:[%s409_s1] sm:$0xf] (!%p138_p2) }
   0x7   : > { %181 = vperm.xlu0 (!%p138_p2), %347, %v178_v1  }
   0xd   : > { %s413_s13 = smov (!%p161_p3, %s318_s13), 1 }
   0xe   : > { %s337_s16 = smul.u32 40, %s413_s13  ;;  %s336_s22 = sshll.u32 %s413_s13, 4 }
   0xf   : > { %s170_s25 = scalar_lea.vmem %s411_s3, %s336_s22 }
  0x10   : > { %s165_s19 = scalar_lea.vmem %s408_s0, %s337_s16 }
  0x11   : > { %v348_v2 = vld [vmem:[%s165_s19 + $0x4] ss:$8 sps:$4 sm:$0xff]   ;;  %v350_v3 = vld [vmem:[%s165_s19] ss:$8 sps:$4 sm:$0xff]   ;;  %v351_v4 = vld [vmem:[%s165_s19 + $0x14] ss:$8 sps:$4 sm:$0xff]  }
  0x12   : > { %220 = vmatprep.subr.bf16.mxu0 %v348_v2  ;;  %v177_v5 = vld [vmem:[%s165_s19 + $0x20] sm:$0x33]  ;;  %v353_v6 = vld [vmem:[%s165_s19 + $0x10] ss:$8 sps:$4 sm:$0xff]  }
  0x13   : > { %221 = vmatpush1.bf16.msra.mxu0 %v350_v3  ;;  %v331_v7 = vcombine.high %v177_v5, %v177_v5  ;;  %v330_v8 = vcombine.low %v177_v5, %v177_v5 }
  0x14   : > { %222 = vmatprep.subr.bf16.mxu0 %v351_v4 }
  0x15   : > { %v215_v9 = vsel %vm213_vm0, %v330_v8, 0 }
  0x17   : > { %223 = vmatpush1.bf16.msra.mxu0 %v353_v6 }
  0x18   : > { %332 = vmatprep.subr.msk.bf16.mxu0 %vm213_vm0, %v331_v7 }
  0x1b   : > { %225 = vmatpush1.bf16.msra.mxu0 %v215_v9 }
  0x1e   : > { %333 = vmatmul.mubr.msk.bf16.vlgmr.msra.gmra.mrb[0].mxu0 %vm209_vm1, %v172_v10 }
  0x86   : > { %v182_v11 = vpop.permute.xlu0 %181 }
  0xf1   : > { %v254_v12 = vpop.f32.mrb[0].mxu0 }
  0xf2   : > { %v255_v13 = vadd.f32 %v254_v12, %v182_v11  ;;  %v256_v14 = vpop.f32.mrb[1].mxu0 }
  0xf3   : > { %v257_v15 = vadd.f32 %v256_v14, %v182_v11  ;;  %v258_v16 = vpop.f32.mrb[2].mxu0 }
  0xf4   : > { %261 = vst [vmem:[%s170_s25] sm:$0xff] %v255_v13  ;;  %v259_v17 = vpop.f32.mrb[3].mxu0 }
  0xf5   : > { %262 = vst [vmem:[%s170_s25 + $0x8] sm:$0xff] %v257_v15 }
  0xf6 PF: > { %s13_s12 = sadd.s32 1, %s362_s12  }
  0xf7   : > { %p10_p4 = scmp.ge.s32.totalorder %s13_s12, 4  }
  0xf9   :  { %12 = sbr.rel (!%p10_p4) target bundleno = 1 (0x1), region = 62 }

// kernel: unet_forward.6
= control target key start
LH: loop header
LB: loop body
LE: loop exit
PB: predicated region body
PF: predicated region fallthrough
CT: control target
= control target key end

     0   :  { %14 = vsyncpa [#allocation4], 0  ;;  %s1950_s30 = smov 0   ;;  %s2132_s0 = inlined_call_operand.vmem [shape: bf16[2,72,80], index: 0, kind: input, shape index: {}]   ;;  %s2133_s1 = inlined_call_operand.vmem [shape: bf16[16,72], index: 1, kind: input, shape index: {}]   ;;  %s2134_s2 = inlined_call_operand.vmem [shape: f32[16,1], index: 2, kind: input, shape index: {}]   ;;  %s2135_s3 = inlined_call_operand.vmem [shape: bf16[16,72], index: 3, kind: input, shape index: {}]   ;;  %s2136_s4 = inlined_call_operand.vmem [shape: f32[16,1], index: 4, kind: input, shape index: {}]   ;;  %s2137_s5 = inlined_call_operand.vmem [shape: f32[9,16,16], index: 5, kind: input, shape index: {}]   ;;  %s2138_s6 = inlined_call_operand.vmem [shape: f32[16,1], index: 6, kind: input, shape index: {}]   ;;  %s2139_s7 = inlined_call_operand.vmem [shape: f32[1,80], index: 7, kind: input, shape index: {}]   ;;  %s2140_s8 = inlined_call_operand.vmem [shape: f32[1,2], index: 8, kind: input, shape index: {}]   ;;  %s2141_s9 = inlined_call_operand.vmem [shape: f32[2,16,80], index: 9, kind: output, shape index: {}]  }
   0x1 LB: > { %s1956_s10 = sadd.s32 4294967295, %s1885_s30   ;;  %p1524_p0 = scmp.ge.s32.totalorder %s1885_s30, 1  ;;  %s1885_s30 = sphi %s1950_s30, %s20_s30  }
   0x2   : > { %p245_p1 = scmp.lt.s32.totalorder %s1885_s30, 3  ;;  %s279_s13 = sshll.u32 %s2140_s8, 4  ;;  %s280_s13 = int_to_ptr.vmem [resolvable:$true] %s279_s13 }
   0x3   : > { %p1780_p3 = scmp.eq.s32.totalorder %s1956_s10, 0  ;;  %s1860_s15 = scalar_lea.vmem %s280_s13, 16 }
   0x4   : > { %p1963_p2 = pnand %p1524_p0, %p245_p1  ;;  %p1861_p6 = scmp.ne.s32.totalorder %s280_s13, %s1860_s15 }
   0x5   : > { %p1868_p10 = scmp.lt.s32.totalorder %s280_s13, %s280_s13  ;;  %p1869_p11 = scmp.lt.s32.totalorder %s1860_s15, %s1860_s15 }
   0x6   : > { %p1776_p4 = pneg %p1963_p2 }
   0x7   : > { %p1870_p12 = por %p1869_p11, %p1868_p10 }
   0x8   : > { %p1777_p5 = pnand %p1780_p3, %p1776_p4 }
   0xa   : > { %p1862_p7 = pneg %p1777_p5 }
   0xc   : > { %p1863_p8 = pnand %p1862_p7, %p1861_p6 }
   0xe   : > { %p1864_p9 = pneg %p1863_p8 }
  0x10   : > { %p1871_p13 = pnand %p1870_p12, %p1864_p9 }
  0x12   : > { %1874 = shalt.err (!%p1871_p13)
}
  0x13   : > { %s1887_s16 = smov [#allocation3]   ;;  %300 = sbr.rel (%p1963_p2) target bundleno = 1440 (0x5a0), region = 56 }
  0x14   : > { %1779 = dma.vmem_to_smem (!%p1777_p5), %s280_s13, 16, %s1887_s16, [#allocation4]  }
  0x1a   : > { %1880 = dma.done.wait (%p1780_p3), [#allocation4], 16  }
  0x1b   : > { %1882 = vsyncadd (%p1780_p3), [#allocation4], 4294967280 }
  0x1c   : > { %306 = sfence }
  0x1d   : > { %p337_p0 = scmp.lt.s32.totalorder %s1956_s10, 1  ;;  %v1888_v0 = vmov 0.0   ;;  %vm1889_vm0 = vmmov 0   ;;  %v362_v1 = vld [vmem:[%s2134_s2] sm:$0xff]  ;;  %v1890_v2 = vmov 0   ;;  %v363_v3 = vld [vmem:[%s2134_s2 + $0x8] sm:$0xff] }
  0x1e   : > { %1628 = vmatprep.subr.bf16.mxu1 %v1888_v0  ;;  %1638 = vmatprep.mubr.msk.bf16.mxu1 %vm1889_vm0, %v1888_v0  ;;  %vm410_vm1 = vcmask 1043456   ;;  %v1850_v10 = vld [vmem:[%s2133_s1] sm:$0xff]   ;;  %vm406_vm2 = vcmask 588800   ;;  %vm463_vm3 = vcmask 654336   ;;  %vm562_vm4 = vcmask 883712   ;;  %s349_s29 = sld [smem:[#allocation3]] }
  0x1f   : > { %s2144_s10 = smov (!%p337_p0, %s1956_s10), 1  ;;  %1803 = vset.pattern.permute.xlu0 %v1890_v2  ;;  %1844 = vset.pattern.permute.xlu1 %v1890_v2  ;;  %v2013_v13 = vld [vmem:[%s2139_s7] ss:$0 sm:$0xff]  ;;  %563 = vst.msk [vmem:[#allocation2] sm:$0xff] %vm562_vm4, %v1888_v0  ;;  %564 = vst.msk [vmem:[#allocation2 + $0x8] sm:$0xff] %vm562_vm4, %v1888_v0  ;;  %s1891_s11 = smov 11  }
  0x20   : > { %366 = vperm.xlu0 %1803, %v362_v1   ;;  %s1771_s19 = smul.u32 36, %s2144_s10  ;;  %vm575_vm7 = vcmask 744536   ;;  %v1543_v55 = vld [vmem:[%s2137_s5 + $0x10] sm:$0xff]  ;;  %vm593_vm8 = vcmask 130048   ;;  %s1892_s14 = smov 118   ;;  %v1400_v60 = vld [vmem:[%s2138_s6] sm:$0xff] }
  0x21   : > { %1660 = vmatprep.mubr.msk.f32.mxu0 %vm593_vm8, %v1543_v55  ;;  %s1893_s15 = smov 127   ;;  %s1894_s18 = smov 126   ;;  %v1401_v61 = vld [vmem:[%s2138_s6 + $0x8] sm:$0xff]  ;;  %v1851_v62 = vld [vmem:[%s2135_s3] sm:$0xff]  }
  0x22   : > { %s341_s24 = scalar_lea.vmem %s2132_s0, %s1771_s19  ;;  %s1895_s19 = smov 117  }
  0x23   : > { %v1845_v4 = vld [vmem:[%s341_s24] sm:$0xff]   ;;  %v1846_v5 = vld [vmem:[%s341_s24 + $0x8] sm:$0xff]   ;;  %v1847_v6 = vld [vmem:[%s341_s24 + $0x10] sm:$0xff]   ;;  %s1896_s20 = smov 116   ;;  %s1897_s21 = smov 108  }
  0x24   : > { %371 = vperm.xlu0 %1803, %v363_v3   ;;  %1629 = vmatpush3.bf16.msra.mxu1 %v1845_v4  ;;  %v1848_v7 = vld [vmem:[%s341_s24 + $0x18] sm:$0xff]   ;;  %v1849_v8 = vld [vmem:[%s341_s24 + $0x20] ss:$0 sps:$4 sm:$0xff]   ;;  %v494_v43 = vstv %s349_s29  ;;  %s1898_s22 = smov 107   ;;  %s1899_s23 = smov 106  }
  0x25   : > { %1630 = vmatprep.subr.bf16.mxu1 %v1888_v0  ;;  %v412_v9 = vsel %vm410_vm1, %v1849_v8, 0  ;;  %s1532_s28 = sld [smem:[#allocation3 + $0x1]]  ;;  %s1579_s29 = sshll.u32 %s2144_s10, 4 }
  0x26   : > { %s346_s13 = scalar_lea.vmem %s2141_s9, %s1579_s29 }
  0x28   : > { %1631 = vmatpush3.bf16.msra.mxu1 %v1846_v5 }
  0x29   : > { %1632 = vmatprep.subr.bf16.mxu1 %v1888_v0 }
  0x2c   : > { %1633 = vmatpush3.bf16.msra.mxu1 %v1847_v6 }
  0x2d   : > { %1634 = vmatprep.subr.bf16.mxu1 %v1888_v0 }
  0x30   : > { %1635 = vmatpush3.bf16.msra.mxu1 %v1848_v7 }
  0x31   : > { %1636 = vmatprep.subr.bf16.mxu1 %v1888_v0 }
  0x34   : > { %1637 = vmatpush3.bf16.msra.mxu1 %v412_v9 }
  0x35   : > { %1642 = vmatprep.subr.bf16.mxu1 %v1888_v0 }
  0x37   : > { %1639 = vmatmul.mubr.msk.bf16.vlgmr.msra.gmra.mrb[0].mxu1 %vm406_vm2, %v1850_v10 }
  0x38   : > { %1643 = vmatpush3.bf16.msra.mxu1 %v1845_v4  ;;  %1652 = vmatprep.mubr.msk.bf16.mxu1 %vm1889_vm0, %v1888_v0 }
  0x39   : > { %1644 = vmatprep.subr.bf16.mxu1 %v1888_v0 }
  0x3c   : > { %1645 = vmatpush3.bf16.msra.mxu1 %v1846_v5 }
  0x3d   : > { %1646 = vmatprep.subr.bf16.mxu1 %v1888_v0 }
  0x40   : > { %1647 = vmatpush3.bf16.msra.mxu1 %v1847_v6  ;;  %v1544_v6 = vld [vmem:[%s2137_s5 + $0x18] sm:$0xff] }
  0x41   : > { %1648 = vmatprep.subr.bf16.mxu1 %v1888_v0 }
  0x44   : > { %1649 = vmatpush3.bf16.msra.mxu1 %v1848_v7  ;;  %v578_v7 = vld [vmem:[%s2137_s5] sm:$0xff] }
  0x45   : > { %1650 = vmatprep.subr.bf16.mxu1 %v1888_v0 }
  0x48   : > { %1651 = vmatpush3.bf16.msra.mxu1 %v412_v9 }
  0x4b   : > { %1653 = vmatmul.mubr.msk.bf16.vlgmr.msra.gmra.mrb[4].mxu1 %vm406_vm2, %v1851_v62 }
  0x9f   : > { %v367_v11 = vpop.permute.xlu0 %366 }
  0xa3   : > { %v372_v16 = vpop.permute.xlu0 %371 }
 0x10a   : > { %v448_v12 = vpop.f32.mrb[0].mxu1 }
 0x10b   : > { %v449_v14 = vadd.f32 %v448_v12, %v367_v11  ;;  %v1640_v15 = vpop.f32.mrb[1].mxu1  ;;  %v579_v12 = vld [vmem:[%s2137_s5 + $0x8] sm:$0xff] }
 0x10c   : > { %v451_v17 = vpop.f32.mrb[2].mxu1 }
 0x10d   : > { %v452_v18 = vadd.f32 %v451_v17, %v372_v16  ;;  %v1641_v19 = vpop.f32.mrb[3].mxu1  ;;  %v461_v20 = vmul.f32 %v2013_v13, %v449_v14 }
 0x10e   : > { %v1550_v19 = vld [vmem:[%s2137_s5 + $0x28] sm:$0xff] }
 0x10f   : > { %v464_v21 = vsel %vm463_vm3, %v461_v20, 0.0  ;;  %v462_v22 = vmul.f32 %v2013_v13, %v452_v18  ;;  %v1553_v20 = vld [vmem:[%s2137_s5 + $0x30] sm:$0xff] }
 0x110   : > { %465 = vadd.xlane.f32.xlu1 %v464_v21 }
 0x111   : > { %v467_v23 = vsel %vm463_vm3, %v462_v22, 0.0 }
 0x114   : > { %468 = vadd.xlane.f32.xlu1 %v467_v23 }
 0x19d   : > { %v466_v24 = vpop.xlane.xlu1 %465 }
 0x19e   : > { %v470_v25 = vmul.f32 0.015625, %v466_v24 }
 0x1a0   : > { %v472_v26 = vsub.f32 %v449_v14, %v470_v25  ;;  %v1549_v14 = vld [vmem:[%s2137_s5 + $0x20] sm:$0xff]  ;;  %v1554_v25 = vld [vmem:[%s2137_s5 + $0x38] sm:$0xff] }
 0x1a1   : > { %v469_v27 = vpop.xlane.xlu1 %468 }
 0x1a2   : > { %v471_v28 = vmul.f32 0.015625, %v469_v27  ;;  %v474_v29 = vmul.f32 %v2013_v13, %v472_v26 }
 0x1a4   : > { %v473_v30 = vsub.f32 %v452_v18, %v471_v28  ;;  %v476_v31 = vmul.f32 %v474_v29, %v474_v29 }
 0x1a6   : > { %v478_v32 = vsel %vm463_vm3, %v476_v31, 0.0  ;;  %v475_v33 = vmul.f32 %v2013_v13, %v473_v30  ;;  %v1558_v31 = vld [vmem:[%s2137_s5 + $0x48] sm:$0xff] }
 0x1a7   : > { %479 = vadd.xlane.f32.xlu0 %v478_v32  ;;  %v1561_v32 = vld [vmem:[%s2137_s5 + $0x50] sm:$0xff] }
 0x1a8   : > { %v477_v34 = vmul.f32 %v475_v33, %v475_v33 }
 0x1aa   : > { %v481_v35 = vsel %vm463_vm3, %v477_v34, 0.0 }
 0x1ab   : > { %482 = vadd.xlane.f32.xlu1 %v481_v35 }
 0x234   : > { %v480_v36 = vpop.xlane.xlu0 %479 }
 0x235   : > { %v484_v37 = vmul.f32 0.015625, %v480_v36 }
 0x237   : > { %v486_v38 = vadd.f32 1e-05, %v484_v37  ;;  %v1562_v37 = vld [vmem:[%s2137_s5 + $0x58] sm:$0xff] }
 0x238   : > { %v483_v39 = vpop.xlane.xlu1 %482 }
 0x239   : > { %1852 = vrsqrt.f32 %v486_v38  ;;  %v485_v40 = vmul.f32 0.015625, %v483_v39  ;;  %v1565_v38 = vld [vmem:[%s2137_s5 + $0x60] sm:$0xff] }
 0x23b   : > { %v487_v41 = vadd.f32 1e-05, %v485_v40 }
 0x23d   : > { %1854 = vrsqrt.f32 %v487_v41 }
 0x243   : > { %v1853_v42 = vpop.eup %1852 }
 0x244   : > { %v490_v44 = vmul.f32 %v1853_v42, %v472_v26  ;;  %v1557_v26 = vld [vmem:[%s2137_s5 + $0x40] sm:$0xff] }
 0x246   : > { %vm492_vm5 = vcmp.ge.f32.partialorder %v490_v44, 0.0  ;;  %v495_v45 = vmul.f32 %v494_v43, %v490_v44 }
 0x247   : > { %v1855_v46 = vpop.eup %1854 }
 0x248   : > { %v497_v47 = vsel %vm492_vm5, %v490_v44, %v495_v45  ;;  %v491_v48 = vmul.f32 %v1855_v46, %v473_v30  ;;  %v1569_v44 = vld [vmem:[%s2137_s5 + $0x70] sm:$0xff]  ;;  %v1570_v46 = vld [vmem:[%s2137_s5 + $0x78] sm:$0xff] }
 0x249   : > { %v565_v49 = vmul.f32 %v2013_v13, %v497_v47  ;;  %v1573_v47 = vld [vmem:[%s2137_s5 + $0x80] sm:$0xff] }
 0x24a   : > { %vm493_vm6 = vcmp.ge.f32.partialorder %v491_v48, 0.0  ;;  %v496_v50 = vmul.f32 %v494_v43, %v491_v48  ;;  %v1566_v43 = vld [vmem:[%s2137_s5 + $0x68] sm:$0xff] }
 0x24b   : > { %569 = vrot.lane.b32.xlu1 %v565_v49, %s1891_s11 }
 0x24c   : > { %v498_v51 = vsel %vm493_vm6, %v491_v48, %v496_v50  ;;  %v1574_v48 = vld [vmem:[%s2137_s5 + $0x88] sm:$0xff] }
 0x24d   : > { %v566_v52 = vmul.f32 %v2013_v13, %v498_v51 }
 0x24f   : > { %571 = vrot.lane.b32.xlu1 %v566_v52, %s1891_s11 }
 0x2bd   : > { %v570_v53 = vpop.permute.xlu1 %569 }
 0x2be   : > { %576 = vst.msk [vmem:[#allocation2] sm:$0xff] %vm575_vm7, %v570_v53 }
 0x2c1   : > { %v572_v54 = vpop.permute.xlu1 %571 }
 0x2c2   : > { %577 = vst.msk [vmem:[#allocation2 + $0x8] sm:$0xff] %vm575_vm7, %v572_v54 }
 0x2c5   : > { %v580_v56 = vld [vmem:[#allocation2] sm:$0xff] }
 0x2c9   : > { %v581_v57 = vld [vmem:[#allocation2 + $0x8] sm:$0xff] }
 0x2ca   : > { %v1814_v58 = vpack.i.bf16 %v581_v57, %v580_v56  ;;  %v1723_v59 = vpack.c.bf16 %v581_v57, %v580_v56 }
 0x2cc   : > { %1815 = vrot.lane.b32.xlu0 %v1814_v58, %s1892_s14  ;;  %1805 = vrot.lane.b32.xlu1 %v1814_v58, %s1893_s15 }
 0x2d0   : > { %1404 = vperm.xlu0 %1803, %v1400_v60   ;;  %1810 = vrot.lane.b32.xlu1 %v1814_v58, %s1894_s18  ;;  %v555_v60 = vpop.f32.mrb[4].mxu1 }
 0x2d4   : > { %1820 = vrot.lane.b32.xlu1 %v1814_v58, %s1895_s19 }
 0x2d8   : > { %1825 = vrot.lane.b32.xlu1 %v1814_v58, %s1896_s20 }
 0x2dc   : > { %1830 = vrot.lane.b32.xlu1 %v1814_v58, %s1897_s21 }
 0x2e0   : > { %1835 = vrot.lane.b32.xlu1 %v1814_v58, %s1898_s22 }
 0x2e4   : > { %1840 = vrot.lane.b32.xlu1 %v1814_v58, %s1899_s23 }
 0x2e8   : > { %1409 = vperm.xlu1 %1844, %v1401_v61   ;;  %v1654_v61 = vpop.f32.mrb[5].mxu1 }
 0x33e   : > { %v1806_v63 = vpop.permute.xlu1 %1805  ;;  %v1816_v9 = vpop.permute.xlu0 %1815 }
 0x33f   : > { %v1808_v0 = vunpack.i.h.bf16 %v1806_v63  ;;  %v1807_v1 = vunpack.i.l.bf16 %v1806_v63  ;;  %v1818_v10 = vunpack.i.h.bf16 %v1816_v9  ;;  %v1817_v11 = vunpack.i.l.bf16 %v1816_v9 }
 0x341   : > { %v1719_v2 = vpack.c.bf16 %v1808_v0, %v1807_v1  ;;  %v1731_v15 = vpack.c.bf16 %v1818_v10, %v1817_v11  ;;  %v502_v10 = vld [vmem:[%s2136_s4 + $0x8] sm:$0xff]  ;;  %v558_v11 = vpop.f32.mrb[6].mxu1 }
 0x342   : > { %v1811_v3 = vpop.permute.xlu1 %1810 }
 0x343   : > { %v1813_v4 = vunpack.i.h.bf16 %v1811_v3  ;;  %v1812_v5 = vunpack.i.l.bf16 %v1811_v3  ;;  %1720 = vmatprep.subr.bf16.mxu0 %v1719_v2 }
 0x344   : > { %1722 = vmatpush3.bf16.msra.mxu0 %v1719_v2 }
 0x345   : > { %1724 = vmatprep.subr.bf16.mxu0 %v1723_v59  ;;  %v1727_v8 = vpack.c.bf16 %v1813_v4, %v1812_v5 }
 0x346   : > { %v1821_v16 = vpop.permute.xlu1 %1820 }
 0x347   : > { %1661 = vmatmul.mubr.msk.f32.vlgmr.msra.gmra.mrb[0].mxu0 %vm593_vm8, %v1544_v6  ;;  %v1823_v17 = vunpack.i.h.bf16 %v1821_v16  ;;  %v1822_v18 = vunpack.i.l.bf16 %v1821_v16 }
 0x348   : > { %1726 = vmatpush3.bf16.msra.mxu0 %v1723_v59  ;;  %1667 = vmatprep.mubr.msk.f32.mxu0 %vm593_vm8, %v578_v7  ;;  %v501_v59 = vld [vmem:[%s2136_s4] sm:$0xff] }
 0x349   : > { %1728 = vmatprep.subr.bf16.mxu0 %v1727_v8  ;;  %v1735_v21 = vpack.c.bf16 %v1823_v17, %v1822_v18 }
 0x34a   : > { %v1826_v22 = vpop.permute.xlu1 %1825 }
 0x34b   : > { %v1828_v23 = vunpack.i.h.bf16 %v1826_v22  ;;  %v1827_v24 = vunpack.i.l.bf16 %v1826_v22 }
 0x34d   : > { %v1739_v27 = vpack.c.bf16 %v1828_v23, %v1827_v24 }
 0x34e   : > { %v1831_v28 = vpop.permute.xlu1 %1830 }
 0x34f   : > { %1668 = vmatmul.mubr.msk.f32.vlgmr.msra.gmra.mrb[0].mxu0 %vm593_vm8, %v579_v12  ;;  %v1833_v29 = vunpack.i.h.bf16 %v1831_v28  ;;  %v1832_v30 = vunpack.i.l.bf16 %v1831_v28  ;;  %v1405_v51 = vpop.permute.xlu0 %1404  ;;  %v1655_v12 = vpop.f32.mrb[7].mxu1 }
 0x350   : > { %1730 = vmatpush3.bf16.msra.mxu0 %v1727_v8  ;;  %1674 = vmatprep.mubr.msk.f32.mxu0 %vm593_vm8, %v1549_v14 }
 0x351   : > { %1732 = vmatprep.subr.bf16.mxu0 %v1731_v15  ;;  %v1743_v33 = vpack.c.bf16 %v1833_v29, %v1832_v30 }
 0x352   : > { %v1836_v34 = vpop.permute.xlu1 %1835 }
 0x353   : > { %v1838_v35 = vunpack.i.h.bf16 %v1836_v34  ;;  %v1837_v36 = vunpack.i.l.bf16 %v1836_v34 }
 0x355   : > { %v1747_v39 = vpack.c.bf16 %v1838_v35, %v1837_v36 }
 0x356   : > { %v1841_v40 = vpop.permute.xlu1 %1840 }
 0x357   : > { %1675 = vmatmul.mubr.msk.f32.vlgmr.msra.gmra.mrb[0].mxu0 %vm593_vm8, %v1550_v19  ;;  %v1843_v41 = vunpack.i.h.bf16 %v1841_v40  ;;  %v1842_v42 = vunpack.i.l.bf16 %v1841_v40 }
 0x358   : > { %1734 = vmatpush3.bf16.msra.mxu0 %v1731_v15  ;;  %1681 = vmatprep.mubr.msk.f32.mxu0 %vm593_vm8, %v1553_v20  ;;  %v1446_v20 = vstv %s1532_s28 }
 0x359   : > { %1736 = vmatprep.subr.bf16.mxu0 %v1735_v21  ;;  %v1751_v45 = vpack.c.bf16 %v1843_v41, %v1842_v42 }
 0x35f   : > { %1682 = vmatmul.mubr.msk.f32.vlgmr.msra.gmra.mrb[0].mxu0 %vm593_vm8, %v1554_v25 }
 0x360   : > { %1738 = vmatpush3.bf16.msra.mxu0 %v1735_v21  ;;  %1688 = vmatprep.mubr.msk.f32.mxu0 %vm593_vm8, %v1557_v26 }
 0x361   : > { %1740 = vmatprep.subr.bf16.mxu0 %v1739_v27 }
 0x367   : > { %1689 = vmatmul.mubr.msk.f32.vlgmr.msra.gmra.mrb[0].mxu0 %vm593_vm8, %v1558_v31  ;;  %v1410_v49 = vpop.permute.xlu1 %1409 }
 0x368   : > { %1742 = vmatpush3.bf16.msra.mxu0 %v1739_v27  ;;  %1695 = vmatprep.mubr.msk.f32.mxu0 %vm593_vm8, %v1561_v32 }
 0x369   : > { %1744 = vmatprep.subr.bf16.mxu0 %v1743_v33 }
 0x36f   : > { %1696 = vmatmul.mubr.msk.f32.vlgmr.msra.gmra.mrb[0].mxu0 %vm593_vm8, %v1562_v37 }
 0x370   : > { %1746 = vmatpush3.bf16.msra.mxu0 %v1743_v33  ;;  %1702 = vmatprep.mubr.msk.f32.mxu0 %vm593_vm8, %v1565_v38 }
 0x371   : > { %1748 = vmatprep.subr.bf16.mxu0 %v1747_v39 }
 0x377   : > { %1703 = vmatmul.mubr.msk.f32.vlgmr.msra.gmra.mrb[0].mxu0 %vm593_vm8, %v1566_v43 }
 0x378   : > { %1750 = vmatpush3.bf16.msra.mxu0 %v1747_v39  ;;  %1709 = vmatprep.mubr.msk.f32.mxu0 %vm593_vm8, %v1569_v44 }
 0x379   : > { %1752 = vmatprep.subr.bf16.mxu0 %v1751_v45 }
 0x37f   : > { %1710 = vmatmul.mubr.msk.f32.vlgmr.msra.gmra.mrb[0].mxu0 %vm593_vm8, %v1570_v46 }
 0x380   : > { %1754 = vmatpush3.bf16.msra.mxu0 %v1751_v45  ;;  %1716 = vmatprep.mubr.msk.f32.mxu0 %vm593_vm8, %v1573_v47 }
 0x387   : > { %1717 = vmatmul.mubr.msk.f32.vlgmr.msra.gmra.mrb[0].mxu0 %vm593_vm8, %v1574_v48 }
 0x45a   : > { %v1718_v50 = vpop.f32.mrb[0].mxu0 }
 0x45b   : > { %v1413_v52 = vadd.f32 %v1718_v50, %v1410_v49  ;;  %v1389_v53 = vpop.f32.mrb[1].mxu0 }
 0x45c   : > { %v1412_v54 = vadd.f32 %v1405_v51, %v1389_v53 }
 0x45d   : > { %v1415_v55 = vmul.f32 %v2013_v13, %v1413_v52 }
 0x45e   : > { %v1414_v56 = vmul.f32 %v2013_v13, %v1412_v54 }
 0x45f   : > { %v1419_v57 = vsel %vm463_vm3, %v1415_v55, 0.0 }
 0x460   : > { %1420 = vadd.xlane.f32.xlu1 %v1419_v57  ;;  %v1416_v58 = vsel %vm463_vm3, %v1414_v56, 0.0 }
 0x461   : > { %1417 = vadd.xlane.f32.xlu0 %v1416_v58 }
 0x471   : > { %505 = vperm.xlu1 %1844, %v501_v59  }
 0x4ed   : > { %v1421_v62 = vpop.xlane.xlu1 %1420 }
 0x4ee   : > { %v1423_v63 = vmul.f32 0.015625, %v1421_v62  ;;  %v1418_v0 = vpop.xlane.xlu0 %1417 }
 0x4ef   : > { %v1422_v1 = vmul.f32 0.015625, %v1418_v0 }
 0x4f0   : > { %v1425_v2 = vsub.f32 %v1413_v52, %v1423_v63 }
 0x4f1   : > { %v1424_v3 = vsub.f32 %v1412_v54, %v1422_v1  ;;  %v506_v26 = vpop.permute.xlu1 %505 }
 0x4f2   : > { %v1427_v4 = vmul.f32 %v2013_v13, %v1425_v2  ;;  %v556_v31 = vadd.f32 %v555_v60, %v506_v26 }
 0x4f3   : > { %v1426_v5 = vmul.f32 %v2013_v13, %v1424_v3 }
 0x4f4   : > { %v1429_v6 = vmul.f32 %v1427_v4, %v1427_v4 }
 0x4f5   : > { %v1428_v8 = vmul.f32 %v1426_v5, %v1426_v5 }
 0x4f6   : > { %v1433_v7 = vsel %vm463_vm3, %v1429_v6, 0.0 }
 0x4f7   : > { %1434 = vadd.xlane.f32.xlu0 %v1433_v7  ;;  %v1430_v9 = vsel %vm463_vm3, %v1428_v8, 0.0 }
 0x4fb   : > { %1431 = vadd.xlane.f32.xlu0 %v1430_v9 }
 0x511   : > { %510 = vperm.xlu0 %1803, %v502_v10  }
 0x584   : > { %v1435_v14 = vpop.xlane.xlu0 %1434 }
 0x585   : > { %v1437_v15 = vmul.f32 0.015625, %v1435_v14 }
 0x587   : > { %v1439_v16 = vadd.f32 1e-05, %v1437_v15 }
 0x588   : > { %v1432_v13 = vpop.xlane.xlu0 %1431 }
 0x589   : > { %1856 = vrsqrt.f32 %v1439_v16  ;;  %v1436_v17 = vmul.f32 0.015625, %v1432_v13 }
 0x58b   : > { %v1438_v18 = vadd.f32 1e-05, %v1436_v17 }
 0x58d   : > { %1858 = vrsqrt.f32 %v1438_v18 }
 0x590   : > { %v511_v21 = vpop.permute.xlu0 %510 }
 0x591   : > { %v559_v25 = vadd.f32 %v558_v11, %v511_v21 }
 0x593   : > { %v1857_v19 = vpop.eup %1856 }
 0x594   : > { %v1443_v22 = vmul.f32 %v1857_v19, %v1425_v2 }
 0x596   : > { %vm1445_vm9 = vcmp.ge.f32.partialorder %v1443_v22, 0.0  ;;  %v1448_v23 = vmul.f32 %v1446_v20, %v1443_v22 }
 0x597   : > { %v1859_v24 = vpop.eup %1858 }
 0x598   : > { %v1442_v27 = vmul.f32 %v1859_v24, %v1424_v3  ;;  %v1450_v28 = vsel %vm1445_vm9, %v1443_v22, %v1448_v23 }
 0x599   : > { %v1452_v29 = vadd.f32 %v1450_v28, %v559_v25 }
 0x59a   : > { %vm1444_vm10 = vcmp.ge.f32.partialorder %v1442_v27, 0.0  ;;  %v1447_v30 = vmul.f32 %v1446_v20, %v1442_v27 }
 0x59b   : > { %1454 = vst.msk [vmem:[%s346_s13 + $0x8] sm:$0xff] %vm463_vm3, %v1452_v29 }
 0x59c   : > { %v1449_v32 = vsel %vm1444_vm10, %v1442_v27, %v1447_v30 }
 0x59d   : > { %v1451_v33 = vadd.f32 %v1449_v32, %v556_v31 }
 0x59f   : > { %1453 = vst.msk [vmem:[%s346_s13] sm:$0xff] %vm463_vm3, %v1451_v33 }
 0x5a0 PF: > { %s20_s30 = sadd.s32 1, %s1885_s30  }
 0x5a1   : > { %p17_p1 = scmp.ge.s32.totalorder %s20_s30, 4  }
 0x5a3   :  { %19 = sbr.rel (!%p17_p1) target bundleno = 1 (0x1), region = 99 }
 0x5aa   :  { %1476 = vsyncpa [#allocation4], 1 }
 0x5ab   :  { %1478 = vsyncpa [#allocation4 + $0x1], 1 }

// kernel: unet_forward.7
= control target key start
LH: loop header
LB: loop body
LE: loop exit
PB: predicated region body
PF: predicated region fallthrough
CT: control target
= control target key end

     0   :  { %14 = vsyncpa [#allocation4], 0  ;;  %s2607_s30 = smov 0   ;;  %s2935_s0 = inlined_call_operand.vmem [shape: bf16[2,144,24], index: 0, kind: input, shape index: {}]   ;;  %s2936_s1 = inlined_call_operand.vmem [shape: bf16[32,144], index: 1, kind: input, shape index: {}]   ;;  %s2937_s2 = inlined_call_operand.vmem [shape: f32[32,1], index: 2, kind: input, shape index: {}]   ;;  %s2938_s3 = inlined_call_operand.vmem [shape: bf16[32,144], index: 3, kind: input, shape index: {}]   ;;  %s2939_s4 = inlined_call_operand.vmem [shape: f32[32,1], index: 4, kind: input, shape index: {}]   ;;  %s2940_s5 = inlined_call_operand.vmem [shape: f32[9,32,32], index: 5, kind: input, shape index: {}]   ;;  %s2941_s6 = inlined_call_operand.vmem [shape: f32[32,1], index: 6, kind: input, shape index: {}]   ;;  %s2942_s7 = inlined_call_operand.vmem [shape: f32[1,24], index: 7, kind: input, shape index: {}]   ;;  %s2943_s8 = inlined_call_operand.vmem [shape: f32[1,2], index: 8, kind: input, shape index: {}]   ;;  %s2944_s9 = inlined_call_operand.vmem [shape: f32[2,32,24], index: 9, kind: output, shape index: {}]  }
   0x1 LB: > { %s2613_s10 = sadd.s32 4294967295, %s2543_s30   ;;  %p1964_p0 = scmp.ge.s32.totalorder %s2543_s30, 1  ;;  %s2543_s30 = sphi %s2607_s30, %s20_s30  }
   0x2   : > { %p245_p1 = scmp.lt.s32.totalorder %s2543_s30, 3  ;;  %s279_s13 = sshll.u32 %s2943_s8, 4  ;;  %s280_s13 = int_to_ptr.vmem [resolvable:$true] %s279_s13 }
   0x3   : > { %p2377_p3 = scmp.eq.s32.totalorder %s2613_s10, 0  ;;  %s2518_s15 = scalar_lea.vmem %s280_s13, 16 }
   0x4   : > { %p2620_p2 = pnand %p1964_p0, %p245_p1  ;;  %p2519_p6 = scmp.ne.s32.totalorder %s280_s13, %s2518_s15 }
   0x5   : > { %p2526_p10 = scmp.lt.s32.totalorder %s280_s13, %s280_s13  ;;  %p2527_p11 = scmp.lt.s32.totalorder %s2518_s15, %s2518_s15 }
   0x6   : > { %p2373_p4 = pneg %p2620_p2 }
   0x7   : > { %p2528_p12 = por %p2527_p11, %p2526_p10 }
   0x8   : > { %p2374_p5 = pnand %p2377_p3, %p2373_p4 }
   0xa   : > { %p2520_p7 = pneg %p2374_p5 }
   0xc   : > { %p2521_p8 = pnand %p2520_p7, %p2519_p6 }
   0xe   : > { %p2522_p9 = pneg %p2521_p8 }
  0x10   : > { %p2529_p13 = pnand %p2528_p12, %p2522_p9 }
  0x12   : > { %2532 = shalt.err (!%p2529_p13)
}
  0x13   : > { %s2545_s16 = smov [#allocation3]   ;;  %300 = sbr.rel (%p2620_p2) target bundleno = 1515 (0x5eb), region = 56 }
  0x14   : > { %2376 = dma.vmem_to_smem (!%p2374_p5), %s280_s13, 16, %s2545_s16, [#allocation4]  }
  0x1a   : > { %2538 = dma.done.wait (%p2377_p3), [#allocation4], 16  }
  0x1b   : > { %2540 = vsyncadd (%p2377_p3), [#allocation4], 4294967280 }
  0x1c   : > { %306 = sfence }
  0x1d   : > { %p337_p0 = scmp.lt.s32.totalorder %s2613_s10, 1  ;;  %v2546_v0 = vmov 0   ;;  %v2492_v1 = vld [vmem:[%s2936_s1 + $0x4] ss:$8 sps:$4 sm:$0xff]   ;;  %vm469_vm0 = vcmask 130048   ;;  %v375_v4 = vld [vmem:[%s2937_s2 + $0x10] sm:$0xff] }
  0x1e   : > { %476 = vmatprep.subr.bf16.mxu1 %v2546_v0  ;;  %2399 = vset.pattern.permute.xlu0 %v2546_v0  ;;  %v373_v2 = vld [vmem:[%s2937_s2] sm:$0xff]  ;;  %v374_v3 = vld [vmem:[%s2937_s2 + $0x8] sm:$0xff]  ;;  %v376_v5 = vld [vmem:[%s2937_s2 + $0x18] sm:$0xff]  ;;  %vm535_vm1 = vcmask 195584   ;;  %vm706_vm2 = vcmask 359424   ;;  %s349_s20 = sld [smem:[#allocation3]] }
  0x1f   : > { %s2947_s10 = smov (!%p337_p0, %s2613_s10), 1  ;;  %2400 = vset.pattern.permute.xlu1 %v2546_v0  ;;  %1986 = vmatprep.mubr.msk.bf16.mxu1 %vm469_vm0, %v2492_v1  ;;  %v2490_v15 = vld [vmem:[%s2936_s1] ss:$8 sps:$4 sm:$0xff]   ;;  %v2493_v16 = vld [vmem:[%s2936_s1 + $0x14] ss:$8 sps:$4 sm:$0xff]   ;;  %s2548_s21 = smov 7  }
  0x20   : > { %379 = vperm.xlu0 %2399, %v373_v2   ;;  %s2368_s25 = smul.u32 72, %s2947_s10  ;;  %389 = vperm.xlu1 %2400, %v375_v4   ;;  %v2495_v17 = vld [vmem:[%s2936_s1 + $0x10] ss:$8 sps:$4 sm:$0xff]   ;;  %v2692_v21 = vld [vmem:[%s2942_s7] ss:$0 sm:$0xff]  ;;  %vm731_vm7 = vcmask 252984  }
  0x21   : > { %s2549_s22 = smov 127   ;;  %s2550_s23 = smov 126   ;;  %vm765_vm8 = vcmask 261120  }
  0x22   : > { %s341_s11 = scalar_lea.vmem %s2935_s0, %s2368_s25  ;;  %s2551_s26 = smov 122  }
  0x23   : > { %v2481_v6 = vld [vmem:[%s341_s11] sm:$0xff]   ;;  %v2482_v7 = vld [vmem:[%s341_s11 + $0x8] sm:$0xff]   ;;  %v2483_v8 = vld [vmem:[%s341_s11 + $0x10] sm:$0xff]   ;;  %s2552_s27 = smov 121   ;;  %s2553_s28 = smov 120  }
  0x24   : > { %384 = vperm.xlu0 %2399, %v374_v3   ;;  %394 = vperm.xlu1 %2400, %v376_v5   ;;  %v2484_v9 = vld [vmem:[%s341_s11 + $0x18] sm:$0xff]   ;;  %v2485_v10 = vld [vmem:[%s341_s11 + $0x20] sm:$0xff]   ;;  %v2486_v11 = vld [vmem:[%s341_s11 + $0x28] sm:$0xff]   ;;  %v2547_v3 = vmov 0.0   ;;  %s2554_s29 = smov 116   ;;  %s2556_s12 = smov 114  }
  0x25   : > { %477 = vmatpush1.bf16.msra.mxu1 %v2481_v6  ;;  %v2487_v12 = vld [vmem:[%s341_s11 + $0x30] sm:$0xff]   ;;  %v2488_v13 = vld [vmem:[%s341_s11 + $0x38] sm:$0xff]   ;;  %v2489_v14 = vld [vmem:[%s341_s11 + $0x40] sm:$0xff]   ;;  %707 = vst.msk [vmem:[#allocation2] sm:$0xff] %vm706_vm2, %v2547_v3  ;;  %s2555_s11 = smov 115   ;;  %s2065_s13 = sshll.u32 %s2947_s10, 5 }
  0x26   : > { %478 = vmatprep.subr.bf16.mxu1 %v2546_v0  ;;  %708 = vst.msk [vmem:[#allocation2 + $0x8] sm:$0xff] %vm706_vm2, %v2547_v3  ;;  %709 = vst.msk [vmem:[#allocation2 + $0x10] sm:$0xff] %vm706_vm2, %v2547_v3  ;;  %s2921_s16 = scalar_lea.vmem %s2944_s9, %s2065_s13 }
  0x27   : > { %710 = vst.msk [vmem:[#allocation2 + $0x18] sm:$0xff] %vm706_vm2, %v2547_v3  ;;  %v1997_v3 = vld [vmem:[%s2940_s5 + $0x30] sm:$0xff] }
  0x29   : > { %479 = vmatpush1.bf16.msra.mxu1 %v2482_v7 }
  0x2a   : > { %480 = vmatprep.subr.bf16.mxu1 %v2546_v0 }
  0x2d   : > { %481 = vmatpush1.bf16.msra.mxu1 %v2483_v8 }
  0x2e   : > { %482 = vmatprep.subr.bf16.mxu1 %v2546_v0 }
  0x31   : > { %483 = vmatpush1.bf16.msra.mxu1 %v2484_v9 }
  0x32   : > { %484 = vmatprep.subr.bf16.mxu1 %v2546_v0 }
  0x35   : > { %485 = vmatpush1.bf16.msra.mxu1 %v2485_v10 }
  0x36   : > { %486 = vmatprep.subr.bf16.mxu1 %v2546_v0 }
  0x39   : > { %487 = vmatpush1.bf16.msra.mxu1 %v2486_v11 }
  0x3a   : > { %488 = vmatprep.subr.bf16.mxu1 %v2546_v0 }
  0x3d   : > { %489 = vmatpush1.bf16.msra.mxu1 %v2487_v12 }
  0x3e   : > { %490 = vmatprep.subr.bf16.mxu1 %v2546_v0 }
  0x41   : > { %491 = vmatpush1.bf16.msra.mxu1 %v2488_v13 }
  0x42   : > { %492 = vmatprep.subr.bf16.mxu1 %v2546_v0 }
  0x45   : > { %493 = vmatpush1.bf16.msra.mxu1 %v2489_v14 }
  0x46   : > { %657 = vmatprep.subr.bf16.mxu1 %v2546_v0 }
  0x48   : > { %509 = vmatmul.mubr.bf16.vlgmr.msra.gmra.mrb[0].mxu1 %v2490_v15 }
  0x49   : > { %1987 = vmatprep.mubr.msk.bf16.mxu1 %vm469_vm0, %v2493_v16  ;;  %658 = vmatpush1.bf16.msra.mxu1 %v2481_v6 }
  0x4a   : > { %659 = vmatprep.subr.bf16.mxu1 %v2546_v0 }
  0x4d   : > { %660 = vmatpush1.bf16.msra.mxu1 %v2482_v7 }
  0x4e   : > { %661 = vmatprep.subr.bf16.mxu1 %v2546_v0 }
  0x50   : > { %517 = vmatmul.mubr.bf16.gmra.mrb[4].mxu1 %v2495_v17  ;;  %v596_v17 = vstv %s349_s20 }
  0x51   : > { %662 = vmatpush1.bf16.msra.mxu1 %v2483_v8 }
  0x52   : > { %663 = vmatprep.subr.bf16.mxu1 %v2546_v0 }
  0x55   : > { %664 = vmatpush1.bf16.msra.mxu1 %v2484_v9 }
  0x56   : > { %665 = vmatprep.subr.bf16.mxu1 %v2546_v0 }
  0x59   : > { %666 = vmatpush1.bf16.msra.mxu1 %v2485_v10 }
  0x5a   : > { %667 = vmatprep.subr.bf16.mxu1 %v2546_v0 }
  0x5d   : > { %668 = vmatpush1.bf16.msra.mxu1 %v2486_v11 }
  0x5e   : > { %669 = vmatprep.subr.bf16.mxu1 %v2546_v0 }
  0x61   : > { %670 = vmatpush1.bf16.msra.mxu1 %v2487_v12 }
  0x62   : > { %671 = vmatprep.subr.bf16.mxu1 %v2546_v0 }
  0x65   : > { %672 = vmatpush1.bf16.msra.mxu1 %v2488_v13 }
  0x66   : > { %673 = vmatprep.subr.bf16.mxu1 %v2546_v0 }
  0x69   : > { %674 = vmatpush1.bf16.msra.mxu1 %v2489_v14 }
  0x9f   : > { %v380_v18 = vpop.permute.xlu0 %379  ;;  %v390_v28 = vpop.permute.xlu1 %389 }
  0xa3   : > { %v385_v20 = vpop.permute.xlu0 %384  ;;  %v395_v35 = vpop.permute.xlu1 %394 }
 0x11b   : > { %v510_v19 = vpop.f32.mrb[0].mxu1 }
 0x11c   : > { %v511_v22 = vadd.f32 %v510_v19, %v380_v18  ;;  %v512_v23 = vpop.f32.mrb[1].mxu1 }
 0x11d   : > { %v513_v24 = vpop.f32.mrb[2].mxu1 }
 0x11e   : > { %v514_v25 = vadd.f32 %v513_v24, %v385_v20  ;;  %v515_v26 = vpop.f32.mrb[3].mxu1  ;;  %v531_v27 = vmul.f32 %v2692_v21, %v511_v22 }
 0x120   : > { %v536_v29 = vsel %vm535_vm1, %v531_v27, 0.0  ;;  %v532_v30 = vmul.f32 %v2692_v21, %v514_v25 }
 0x121   : > { %537 = vadd.xlane.f32.xlu0 %v536_v29 }
 0x122   : > { %v539_v31 = vsel %vm535_vm1, %v532_v30, 0.0 }
 0x123   : > { %v518_v32 = vpop.f32.mrb[4].mxu1  ;;  %540 = vadd.xlane.f32.xlu1 %v539_v31 }
 0x124   : > { %v519_v33 = vadd.f32 %v518_v32, %v390_v28  ;;  %v520_v34 = vpop.f32.mrb[5].mxu1 }
 0x125   : > { %v521_v36 = vpop.f32.mrb[6].mxu1 }
 0x126   : > { %v522_v37 = vadd.f32 %v521_v36, %v395_v35  ;;  %v523_v38 = vpop.f32.mrb[7].mxu1  ;;  %v533_v39 = vmul.f32 %v2692_v21, %v519_v33 }
 0x128   : > { %v542_v40 = vsel %vm535_vm1, %v533_v39, 0.0  ;;  %v534_v41 = vmul.f32 %v2692_v21, %v522_v37 }
 0x129   : > { %543 = vadd.xlane.f32.xlu0 %v542_v40 }
 0x12a   : > { %v545_v42 = vsel %vm535_vm1, %v534_v41, 0.0 }
 0x12d   : > { %546 = vadd.xlane.f32.xlu0 %v545_v42 }
 0x1ae   : > { %v538_v43 = vpop.xlane.xlu0 %537 }
 0x1af   : > { %v548_v44 = vmul.f32 0.0625, %v538_v43 }
 0x1b0   : > { %v541_v45 = vpop.xlane.xlu1 %540 }
 0x1b1   : > { %v552_v46 = vsub.f32 %v511_v22, %v548_v44  ;;  %v549_v47 = vmul.f32 0.0625, %v541_v45 }
 0x1b3   : > { %v553_v48 = vsub.f32 %v514_v25, %v549_v47  ;;  %v556_v49 = vmul.f32 %v2692_v21, %v552_v46 }
 0x1b5   : > { %v560_v50 = vmul.f32 %v556_v49, %v556_v49  ;;  %v557_v51 = vmul.f32 %v2692_v21, %v553_v48 }
 0x1b6   : > { %v544_v52 = vpop.xlane.xlu0 %543 }
 0x1b7   : > { %v550_v53 = vmul.f32 0.0625, %v544_v52  ;;  %v564_v54 = vsel %vm535_vm1, %v560_v50, 0.0  ;;  %v561_v55 = vmul.f32 %v557_v51, %v557_v51  ;;  %v1786_v51 = vld [vmem:[%s2941_s6] sm:$0xff]  ;;  %v1788_v52 = vld [vmem:[%s2941_s6 + $0x10] sm:$0xff] }
 0x1b8   : > { %565 = vadd.xlane.f32.xlu1 %v564_v54  ;;  %v1789_v54 = vld [vmem:[%s2941_s6 + $0x18] sm:$0xff] }
 0x1b9   : > { %v554_v56 = vsub.f32 %v519_v33, %v550_v53  ;;  %v567_v57 = vsel %vm535_vm1, %v561_v55, 0.0  ;;  %v1787_v53 = vld [vmem:[%s2941_s6 + $0x8] sm:$0xff] }
 0x1ba   : > { %568 = vadd.xlane.f32.xlu0 %v567_v57  ;;  %v547_v58 = vpop.xlane.xlu0 %546  ;;  %v2496_v55 = vld [vmem:[%s2938_s3] ss:$8 sps:$4 sm:$0xff]  }
 0x1bb   : > { %v551_v59 = vmul.f32 0.0625, %v547_v58  ;;  %v558_v60 = vmul.f32 %v2692_v21, %v554_v56 }
 0x1bd   : > { %v555_v61 = vsub.f32 %v522_v37, %v551_v59  ;;  %v562_v62 = vmul.f32 %v558_v60, %v558_v60 }
 0x1bf   : > { %v570_v63 = vsel %vm535_vm1, %v562_v62, 0.0  ;;  %v559_v0 = vmul.f32 %v2692_v21, %v555_v61 }
 0x1c0   : > { %571 = vadd.xlane.f32.xlu1 %v570_v63 }
 0x1c1   : > { %v563_v1 = vmul.f32 %v559_v0, %v559_v0 }
 0x1c3   : > { %v573_v2 = vsel %vm535_vm1, %v563_v1, 0.0 }
 0x1c4   : > { %574 = vadd.xlane.f32.xlu0 %v573_v2  ;;  %v1996_v2 = vld [vmem:[%s2940_s5 + $0x28] sm:$0xff] }
 0x245   : > { %v566_v4 = vpop.xlane.xlu1 %565 }
 0x246   : > { %v576_v5 = vmul.f32 0.0625, %v566_v4 }
 0x247   : > { %v569_v6 = vpop.xlane.xlu0 %568 }
 0x248   : > { %v580_v7 = vadd.f32 1e-05, %v576_v5  ;;  %v577_v8 = vmul.f32 0.0625, %v569_v6 }
 0x24a   : > { %2502 = vrsqrt.f32 %v580_v7  ;;  %v581_v9 = vadd.f32 1e-05, %v577_v8  ;;  %v1998_v7 = vld [vmem:[%s2940_s5 + $0x38] sm:$0xff]  ;;  %v736_v8 = vld [vmem:[%s2940_s5] sm:$0xff] }
 0x24c   : > { %2504 = vrsqrt.f32 %v581_v9 }
 0x24d   : > { %v572_v10 = vpop.xlane.xlu1 %571 }
 0x24e   : > { %v578_v11 = vmul.f32 0.0625, %v572_v10 }
 0x250   : > { %v582_v12 = vadd.f32 1e-05, %v578_v11 }
 0x251   : > { %v575_v13 = vpop.xlane.xlu0 %574 }
 0x252   : > { %2506 = vrsqrt.f32 %v582_v12  ;;  %v579_v14 = vmul.f32 0.0625, %v575_v13  ;;  %v737_v13 = vld [vmem:[%s2940_s5 + $0x8] sm:$0xff] }
 0x254   : > { %v2503_v15 = vpop.eup %2502  ;;  %v583_v16 = vadd.f32 1e-05, %v579_v14  ;;  %v738_v14 = vld [vmem:[%s2940_s5 + $0x10] sm:$0xff] }
 0x255   : > { %v588_v18 = vmul.f32 %v2503_v15, %v552_v46  ;;  %v1995_v46 = vld [vmem:[%s2940_s5 + $0x20] sm:$0xff] }
 0x256   : > { %v2505_v19 = vpop.eup %2504  ;;  %2508 = vrsqrt.f32 %v583_v16  ;;  %2146 = vmatprep.mubr.msk.f32.mxu0 %vm765_vm8, %v1995_v46 }
 0x257   : > { %vm592_vm3 = vcmp.ge.f32.partialorder %v588_v18, 0.0  ;;  %v597_v20 = vmul.f32 %v596_v17, %v588_v18  ;;  %v589_v22 = vmul.f32 %v2505_v19, %v553_v48  ;;  %v739_v19 = vld [vmem:[%s2940_s5 + $0x18] sm:$0xff] }
 0x259   : > { %v601_v23 = vsel %vm592_vm3, %v588_v18, %v597_v20  ;;  %vm593_vm4 = vcmp.ge.f32.partialorder %v589_v22, 0.0  ;;  %v598_v24 = vmul.f32 %v596_v17, %v589_v22  ;;  %v2007_v20 = vld [vmem:[%s2940_s5 + $0x40] sm:$0xff] }
 0x25a   : > { %v711_v25 = vmul.f32 %v2692_v21, %v601_v23 }
 0x25b   : > { %v602_v26 = vsel %vm593_vm4, %v589_v22, %v598_v24 }
 0x25c   : > { %v2507_v27 = vpop.eup %2506  ;;  %719 = vrot.lane.b32.xlu1 %v711_v25, %s2548_s21  ;;  %v712_v28 = vmul.f32 %v2692_v21, %v602_v26  ;;  %v2008_v26 = vld [vmem:[%s2940_s5 + $0x48] sm:$0xff] }
 0x25d   : > { %v590_v29 = vmul.f32 %v2507_v27, %v554_v56  ;;  %v2498_v56 = vld [vmem:[%s2938_s3 + $0x4] ss:$8 sps:$4 sm:$0xff]   ;;  %v2009_v27 = vld [vmem:[%s2940_s5 + $0x50] sm:$0xff] }
 0x25e   : > { %721 = vrot.lane.b32.xlu0 %v712_v28, %s2548_s21  ;;  %1993 = vmatprep.mubr.msk.bf16.mxu1 %vm469_vm0, %v2498_v56  ;;  %v2026_v56 = vld [vmem:[%s2940_s5 + $0x98] sm:$0xff] }
 0x25f   : > { %vm594_vm5 = vcmp.ge.f32.partialorder %v590_v29, 0.0  ;;  %v599_v30 = vmul.f32 %v596_v17, %v590_v29  ;;  %690 = vmatmul.mubr.bf16.vlgmr.msra.gmra.mrb[8].mxu1 %v2496_v55 }
 0x260   : > { %v2509_v31 = vpop.eup %2508 }
 0x261   : > { %v603_v32 = vsel %vm594_vm5, %v590_v29, %v599_v30  ;;  %v591_v33 = vmul.f32 %v2509_v31, %v555_v61 }
 0x262   : > { %v713_v34 = vmul.f32 %v2692_v21, %v603_v32  ;;  %v2010_v32 = vld [vmem:[%s2940_s5 + $0x58] sm:$0xff] }
 0x263   : > { %vm595_vm6 = vcmp.ge.f32.partialorder %v591_v33, 0.0  ;;  %v600_v35 = vmul.f32 %v596_v17, %v591_v33 }
 0x264   : > { %723 = vrot.lane.b32.xlu1 %v713_v34, %s2548_s21 }
 0x265   : > { %v604_v36 = vsel %vm595_vm6, %v591_v33, %v600_v35  ;;  %v2015_v33 = vld [vmem:[%s2940_s5 + $0x60] sm:$0xff] }
 0x266   : > { %v714_v37 = vmul.f32 %v2692_v21, %v604_v36 }
 0x268   : > { %725 = vrot.lane.b32.xlu1 %v714_v37, %s2548_s21 }
 0x2ce   : > { %v720_v38 = vpop.permute.xlu1 %719 }
 0x2cf   : > { %732 = vst.msk [vmem:[#allocation2] sm:$0xff] %vm731_vm7, %v720_v38  ;;  %v2016_v38 = vld [vmem:[%s2940_s5 + $0x68] sm:$0xff] }
 0x2d0   : > { %v722_v39 = vpop.permute.xlu0 %721 }
 0x2d1   : > { %733 = vst.msk [vmem:[#allocation2 + $0x8] sm:$0xff] %vm731_vm7, %v722_v39  ;;  %v2017_v39 = vld [vmem:[%s2940_s5 + $0x70] sm:$0xff] }
 0x2d6   : > { %v724_v40 = vpop.permute.xlu1 %723  ;;  %v740_v41 = vld [vmem:[#allocation2] sm:$0xff] }
 0x2d7   : > { %734 = vst.msk [vmem:[#allocation2 + $0x10] sm:$0xff] %vm731_vm7, %v724_v40 }
 0x2d8   : > { %v741_v42 = vld [vmem:[#allocation2 + $0x8] sm:$0xff] }
 0x2d9   : > { %v2401_v43 = vpack.i.bf16 %v741_v42, %v740_v41  ;;  %v2272_v45 = vpack.c.bf16 %v741_v42, %v740_v41 }
 0x2da   : > { %v726_v44 = vpop.permute.xlu1 %725 }
 0x2db   : > { %735 = vst.msk [vmem:[#allocation2 + $0x18] sm:$0xff] %vm731_vm7, %v726_v44  ;;  %2402 = vrot.lane.b32.xlu0 %v2401_v43, %s2549_s22  ;;  %v2018_v44 = vld [vmem:[%s2940_s5 + $0x78] sm:$0xff] }
 0x2de   : > { %v742_v47 = vld [vmem:[#allocation2 + $0x10] sm:$0xff] }
 0x2df   : > { %2412 = vrot.lane.b32.xlu0 %v2401_v43, %s2550_s23 }
 0x2e2   : > { %v743_v48 = vld [vmem:[#allocation2 + $0x18] sm:$0xff] }
 0x2e3   : > { %2422 = vrot.lane.b32.xlu0 %v2401_v43, %s2551_s26  ;;  %v2406_v49 = vpack.i.bf16 %v743_v48, %v742_v47  ;;  %v2276_v50 = vpack.c.bf16 %v743_v48, %v742_v47 }
 0x2e5   : > { %2407 = vrot.lane.b32.xlu1 %v2406_v49, %s2549_s22 }
 0x2e7   : > { %2432 = vrot.lane.b32.xlu0 %v2401_v43, %s2552_s27 }
 0x2e9   : > { %2417 = vrot.lane.b32.xlu1 %v2406_v49, %s2550_s23 }
 0x2eb   : > { %2442 = vrot.lane.b32.xlu0 %v2401_v43, %s2553_s28 }
 0x2ed   : > { %2427 = vrot.lane.b32.xlu1 %v2406_v49, %s2551_s26 }
 0x2ef   : > { %2452 = vrot.lane.b32.xlu0 %v2401_v43, %s2554_s29 }
 0x2f1   : > { %2437 = vrot.lane.b32.xlu1 %v2406_v49, %s2552_s27 }
 0x2f3   : > { %2462 = vrot.lane.b32.xlu0 %v2401_v43, %s2555_s11 }
 0x2f5   : > { %2447 = vrot.lane.b32.xlu1 %v2406_v49, %s2553_s28 }
 0x2f7   : > { %2472 = vrot.lane.b32.xlu0 %v2401_v43, %s2556_s12 }
 0x2f9   : > { %2457 = vrot.lane.b32.xlu1 %v2406_v49, %s2554_s29 }
 0x2fb   : > { %1792 = vperm.xlu0 %2399, %v1786_v51   ;;  %v2025_v51 = vld [vmem:[%s2940_s5 + $0x90] sm:$0xff] }
 0x2fd   : > { %2467 = vrot.lane.b32.xlu1 %v2406_v49, %s2555_s11 }
 0x2ff   : > { %1802 = vperm.xlu0 %2399, %v1788_v52  }
 0x301   : > { %2477 = vrot.lane.b32.xlu1 %v2406_v49, %s2556_s12  ;;  %s1972_s12 = sld [smem:[#allocation3 + $0x1]] }
 0x305   : > { %1797 = vperm.xlu1 %2400, %v1787_v53  }
 0x309   : > { %1807 = vperm.xlu1 %2400, %v1789_v54  }
 0x34d   : > { %v2403_v57 = vpop.permute.xlu0 %2402 }
 0x34e   : > { %v2405_v58 = vunpack.i.h.bf16 %v2403_v57  ;;  %v2404_v59 = vunpack.i.l.bf16 %v2403_v57  ;;  %v2031_v57 = vld [vmem:[%s2940_s5 + $0xa0] sm:$0xff] }
 0x350   : > { %v2264_v60 = vpack.c.bf16 %v2405_v58, %v2404_v59 }
 0x351   : > { %v2413_v1 = vpop.permute.xlu0 %2412 }
 0x352   : > { %2265 = vmatprep.subr.bf16.mxu0 %v2264_v60  ;;  %v2415_v4 = vunpack.i.h.bf16 %v2413_v1  ;;  %v2414_v5 = vunpack.i.l.bf16 %v2413_v1 }
 0x353   : > { %2267 = vmatpush3.bf16.msra.mxu0 %v2264_v60 }
 0x354   : > { %v2280_v9 = vpack.c.bf16 %v2415_v4, %v2414_v5  ;;  %v2034_v4 = vld [vmem:[%s2940_s5 + $0xb8] sm:$0xff]  ;;  %v2039_v5 = vld [vmem:[%s2940_s5 + $0xc0] sm:$0xff] }
 0x355   : > { %v2423_v12 = vpop.permute.xlu0 %2422 }
 0x356   : > { %v2425_v15 = vunpack.i.h.bf16 %v2423_v12  ;;  %v2424_v16 = vunpack.i.l.bf16 %v2423_v12 }
 0x357   : > { %v2408_v61 = vpop.permute.xlu1 %2407 }
 0x358   : > { %v2410_v62 = vunpack.i.h.bf16 %v2408_v61  ;;  %v2409_v63 = vunpack.i.l.bf16 %v2408_v61  ;;  %v2288_v22 = vpack.c.bf16 %v2425_v15, %v2424_v16  ;;  %v2042_v16 = vld [vmem:[%s2940_s5 + $0xd8] sm:$0xff] }
 0x359   : > { %v2433_v25 = vpop.permute.xlu0 %2432 }
 0x35a   : > { %v2268_v0 = vpack.c.bf16 %v2410_v62, %v2409_v63  ;;  %v2435_v28 = vunpack.i.h.bf16 %v2433_v25  ;;  %v2434_v29 = vunpack.i.l.bf16 %v2433_v25  ;;  %v2032_v62 = vld [vmem:[%s2940_s5 + $0xa8] sm:$0xff]  ;;  %v2033_v63 = vld [vmem:[%s2940_s5 + $0xb0] sm:$0xff]  ;;  %v2050_v25 = vld [vmem:[%s2940_s5 + $0xf8] sm:$0xff] }
 0x35b   : > { %v2418_v6 = vpop.permute.xlu1 %2417 }
 0x35c   : > { %2269 = vmatprep.subr.bf16.mxu0 %v2268_v0  ;;  %v2420_v10 = vunpack.i.h.bf16 %v2418_v6  ;;  %v2419_v11 = vunpack.i.l.bf16 %v2418_v6  ;;  %v2296_v34 = vpack.c.bf16 %v2435_v28, %v2434_v29  ;;  %v2057_v28 = vld [vmem:[%s2940_s5 + $0x110] sm:$0xff]  ;;  %v2058_v29 = vld [vmem:[%s2940_s5 + $0x118] sm:$0xff] }
 0x35d   : > { %2271 = vmatpush3.bf16.msra.mxu0 %v2268_v0  ;;  %v2443_v37 = vpop.permute.xlu0 %2442 }
 0x35e   : > { %2273 = vmatprep.subr.bf16.mxu0 %v2272_v45  ;;  %v2284_v17 = vpack.c.bf16 %v2420_v10, %v2419_v11  ;;  %v2445_v40 = vunpack.i.h.bf16 %v2443_v37  ;;  %v2444_v41 = vunpack.i.l.bf16 %v2443_v37  ;;  %v2040_v10 = vld [vmem:[%s2940_s5 + $0xc8] sm:$0xff]  ;;  %v2041_v11 = vld [vmem:[%s2940_s5 + $0xd0] sm:$0xff] }
 0x35f   : > { %v2428_v18 = vpop.permute.xlu1 %2427 }
 0x360   : > { %2147 = vmatmul.mubr.msk.f32.vlgmr.msra.gmra.mrb[0].mxu0 %vm765_vm8, %v1996_v2  ;;  %v2430_v23 = vunpack.i.h.bf16 %v2428_v18  ;;  %v2429_v24 = vunpack.i.l.bf16 %v2428_v18  ;;  %v2304_v46 = vpack.c.bf16 %v2445_v40, %v2444_v41 }
 0x361   : > { %2275 = vmatpush3.bf16.msra.mxu0 %v2272_v45  ;;  %2149 = vmatprep.mubr.msk.f32.mxu0 %vm765_vm8, %v1997_v3  ;;  %v2023_v45 = vld [vmem:[%s2940_s5 + $0x80] sm:$0xff]  ;;  %v2453_v49 = vpop.permute.xlu0 %2452 }
 0x362   : > { %2277 = vmatprep.subr.bf16.mxu0 %v2276_v50  ;;  %v2292_v30 = vpack.c.bf16 %v2430_v23, %v2429_v24  ;;  %v2455_v52 = vunpack.i.h.bf16 %v2453_v49  ;;  %v2454_v53 = vunpack.i.l.bf16 %v2453_v49  ;;  %v2049_v23 = vld [vmem:[%s2940_s5 + $0xf0] sm:$0xff] }
 0x363   : > { %v2438_v31 = vpop.permute.xlu1 %2437 }
 0x364   : > { %2150 = vmatmul.mubr.msk.f32.gmra.mrb[2].mxu0 %vm765_vm8, %v1998_v7  ;;  %v2440_v35 = vunpack.i.h.bf16 %v2438_v31  ;;  %v2439_v36 = vunpack.i.l.bf16 %v2438_v31  ;;  %v2312_v58 = vpack.c.bf16 %v2455_v52, %v2454_v53  ;;  %v2501_v31 = vld [vmem:[%s2938_s3 + $0x10] ss:$8 sps:$4 sm:$0xff]   ;;  %v609_v52 = vld [vmem:[%s2939_s4] sm:$0xff]  ;;  %v2895_v53 = vpop.f32.mrb[8].mxu1 }
 0x365   : > { %2279 = vmatpush3.bf16.msra.mxu0 %v2276_v50  ;;  %2160 = vmatprep.mubr.msk.f32.mxu0 %vm765_vm8, %v736_v8  ;;  %v2024_v50 = vld [vmem:[%s2940_s5 + $0x88] sm:$0xff]  ;;  %v2463_v61 = vpop.permute.xlu0 %2462 }
 0x366   : > { %2281 = vmatprep.subr.bf16.mxu0 %v2280_v9  ;;  %v2300_v42 = vpack.c.bf16 %v2440_v35, %v2439_v36  ;;  %v2465_v0 = vunpack.i.h.bf16 %v2463_v61  ;;  %v2464_v1 = vunpack.i.l.bf16 %v2463_v61 }
 0x367   : > { %v2448_v43 = vpop.permute.xlu1 %2447 }
 0x368   : > { %2161 = vmatmul.mubr.msk.f32.vlgmr.msra.gmra.mrb[0].mxu0 %vm765_vm8, %v737_v13  ;;  %v2450_v47 = vunpack.i.h.bf16 %v2448_v43  ;;  %v2449_v48 = vunpack.i.l.bf16 %v2448_v43  ;;  %v2320_v6 = vpack.c.bf16 %v2465_v0, %v2464_v1 }
 0x369   : > { %2283 = vmatpush3.bf16.msra.mxu0 %v2280_v9  ;;  %2163 = vmatprep.mubr.msk.f32.mxu0 %vm765_vm8, %v738_v14  ;;  %v2473_v9 = vpop.permute.xlu0 %2472 }
 0x36a   : > { %2285 = vmatprep.subr.bf16.mxu0 %v2284_v17  ;;  %v2308_v54 = vpack.c.bf16 %v2450_v47, %v2449_v48  ;;  %v2475_v12 = vunpack.i.h.bf16 %v2473_v9  ;;  %v2474_v13 = vunpack.i.l.bf16 %v2473_v9 }
 0x36b   : > { %v2458_v55 = vpop.permute.xlu1 %2457 }
 0x36c   : > { %2164 = vmatmul.mubr.msk.f32.gmra.mrb[2].mxu0 %vm765_vm8, %v739_v19  ;;  %v2460_v59 = vunpack.i.h.bf16 %v2458_v55  ;;  %v2459_v60 = vunpack.i.l.bf16 %v2458_v55  ;;  %v2328_v18 = vpack.c.bf16 %v2475_v12, %v2474_v13 }
 0x36d   : > { %2287 = vmatpush3.bf16.msra.mxu0 %v2284_v17  ;;  %2174 = vmatprep.mubr.msk.f32.mxu0 %vm765_vm8, %v2007_v20  ;;  %v2047_v17 = vld [vmem:[%s2940_s5 + $0xe0] sm:$0xff] }
 0x36e   : > { %2289 = vmatprep.subr.bf16.mxu0 %v2288_v22  ;;  %v2316_v2 = vpack.c.bf16 %v2460_v59, %v2459_v60 }
 0x36f   : > { %v2468_v3 = vpop.permute.xlu1 %2467 }
 0x370   : > { %2175 = vmatmul.mubr.msk.f32.vlgmr.msra.gmra.mrb[0].mxu0 %vm765_vm8, %v2008_v26  ;;  %v2470_v7 = vunpack.i.h.bf16 %v2468_v3  ;;  %v2469_v8 = vunpack.i.l.bf16 %v2468_v3  ;;  %v2055_v26 = vld [vmem:[%s2940_s5 + $0x100] sm:$0xff] }
 0x371   : > { %2291 = vmatpush3.bf16.msra.mxu0 %v2288_v22  ;;  %2177 = vmatprep.mubr.msk.f32.mxu0 %vm765_vm8, %v2009_v27  ;;  %v2048_v22 = vld [vmem:[%s2940_s5 + $0xe8] sm:$0xff] }
 0x372   : > { %2293 = vmatprep.subr.bf16.mxu0 %v2292_v30  ;;  %v2324_v14 = vpack.c.bf16 %v2470_v7, %v2469_v8  ;;  %v2056_v27 = vld [vmem:[%s2940_s5 + $0x108] sm:$0xff] }
 0x373   : > { %v2478_v15 = vpop.permute.xlu1 %2477 }
 0x374   : > { %2178 = vmatmul.mubr.msk.f32.gmra.mrb[2].mxu0 %vm765_vm8, %v2010_v32  ;;  %v2480_v19 = vunpack.i.h.bf16 %v2478_v15  ;;  %v2479_v20 = vunpack.i.l.bf16 %v2478_v15  ;;  %v610_v15 = vld [vmem:[%s2939_s4 + $0x8] sm:$0xff] }
 0x375   : > { %2295 = vmatpush3.bf16.msra.mxu0 %v2292_v30  ;;  %2188 = vmatprep.mubr.msk.f32.mxu0 %vm765_vm8, %v2015_v33  ;;  %v2499_v30 = vld [vmem:[%s2938_s3 + $0x14] ss:$8 sps:$4 sm:$0xff]  }
 0x376   : > { %2297 = vmatprep.subr.bf16.mxu0 %v2296_v34  ;;  %v2332_v24 = vpack.c.bf16 %v2480_v19, %v2479_v20  ;;  %1994 = vmatprep.mubr.msk.bf16.mxu1 %vm469_vm0, %v2499_v30 }
 0x377   : > { %698 = vmatmul.mubr.bf16.gmra.mrb[12].mxu1 %v2501_v31 }
 0x378   : > { %2189 = vmatmul.mubr.msk.f32.vlgmr.msra.gmra.mrb[0].mxu0 %vm765_vm8, %v2016_v38 }
 0x379   : > { %2299 = vmatpush3.bf16.msra.mxu0 %v2296_v34  ;;  %2191 = vmatprep.mubr.msk.f32.mxu0 %vm765_vm8, %v2017_v39 }
 0x37a   : > { %2301 = vmatprep.subr.bf16.mxu0 %v2300_v42  ;;  %v1793_v32 = vpop.permute.xlu0 %1792 }
 0x37c   : > { %2192 = vmatmul.mubr.msk.f32.gmra.mrb[2].mxu0 %vm765_vm8, %v2018_v44 }
 0x37d   : > { %2303 = vmatpush3.bf16.msra.mxu0 %v2300_v42  ;;  %2202 = vmatprep.mubr.msk.f32.mxu0 %vm765_vm8, %v2023_v45 }
 0x37e   : > { %2305 = vmatprep.subr.bf16.mxu0 %v2304_v46  ;;  %v1803_v39 = vpop.permute.xlu0 %1802 }
 0x380   : > { %2203 = vmatmul.mubr.msk.f32.vlgmr.msra.gmra.mrb[0].mxu0 %vm765_vm8, %v2024_v50 }
 0x381   : > { %2307 = vmatpush3.bf16.msra.mxu0 %v2304_v46  ;;  %2205 = vmatprep.mubr.msk.f32.mxu0 %vm765_vm8, %v2025_v51 }
 0x382   : > { %2309 = vmatprep.subr.bf16.mxu0 %v2308_v54 }
 0x384   : > { %2206 = vmatmul.mubr.msk.f32.gmra.mrb[2].mxu0 %vm765_vm8, %v2026_v56  ;;  %v1798_v33 = vpop.permute.xlu1 %1797 }
 0x385   : > { %2311 = vmatpush3.bf16.msra.mxu0 %v2308_v54  ;;  %2216 = vmatprep.mubr.msk.f32.mxu0 %vm765_vm8, %v2031_v57  ;;  %v693_v54 = vpop.f32.mrb[9].mxu1 }
 0x386   : > { %2313 = vmatprep.subr.bf16.mxu0 %v2312_v58 }
 0x388   : > { %2217 = vmatmul.mubr.msk.f32.vlgmr.msra.gmra.mrb[0].mxu0 %vm765_vm8, %v2032_v62  ;;  %v1808_v42 = vpop.permute.xlu1 %1807 }
 0x389   : > { %2315 = vmatpush3.bf16.msra.mxu0 %v2312_v58  ;;  %2219 = vmatprep.mubr.msk.f32.mxu0 %vm765_vm8, %v2033_v63 }
 0x38a   : > { %2317 = vmatprep.subr.bf16.mxu0 %v2316_v2 }
 0x38c   : > { %2220 = vmatmul.mubr.msk.f32.gmra.mrb[2].mxu0 %vm765_vm8, %v2034_v4 }
 0x38d   : > { %2319 = vmatpush3.bf16.msra.mxu0 %v2316_v2  ;;  %2230 = vmatprep.mubr.msk.f32.mxu0 %vm765_vm8, %v2039_v5 }
 0x38e   : > { %2321 = vmatprep.subr.bf16.mxu0 %v2320_v6 }
 0x390   : > { %2231 = vmatmul.mubr.msk.f32.vlgmr.msra.gmra.mrb[0].mxu0 %vm765_vm8, %v2040_v10  ;;  %v611_v10 = vld [vmem:[%s2939_s4 + $0x10] sm:$0xff] }
 0x391   : > { %2323 = vmatpush3.bf16.msra.mxu0 %v2320_v6  ;;  %2233 = vmatprep.mubr.msk.f32.mxu0 %vm765_vm8, %v2041_v11  ;;  %v694_v11 = vpop.f32.mrb[10].mxu1 }
 0x392   : > { %2325 = vmatprep.subr.bf16.mxu0 %v2324_v14  ;;  %v696_v12 = vpop.f32.mrb[11].mxu1 }
 0x394   : > { %2234 = vmatmul.mubr.msk.f32.gmra.mrb[2].mxu0 %vm765_vm8, %v2042_v16 }
 0x395   : > { %2327 = vmatpush3.bf16.msra.mxu0 %v2324_v14  ;;  %2244 = vmatprep.mubr.msk.f32.mxu0 %vm765_vm8, %v2047_v17 }
 0x396   : > { %2329 = vmatprep.subr.bf16.mxu0 %v2328_v18 }
 0x398   : > { %2245 = vmatmul.mubr.msk.f32.vlgmr.msra.gmra.mrb[0].mxu0 %vm765_vm8, %v2048_v22  ;;  %v612_v22 = vld [vmem:[%s2939_s4 + $0x18] sm:$0xff] }
 0x399   : > { %2331 = vmatpush3.bf16.msra.mxu0 %v2328_v18  ;;  %2247 = vmatprep.mubr.msk.f32.mxu0 %vm765_vm8, %v2049_v23 }
 0x39a   : > { %2333 = vmatprep.subr.bf16.mxu0 %v2332_v24 }
 0x39c   : > { %2248 = vmatmul.mubr.msk.f32.gmra.mrb[2].mxu0 %vm765_vm8, %v2050_v25 }
 0x39d   : > { %2335 = vmatpush3.bf16.msra.mxu0 %v2332_v24  ;;  %2258 = vmatprep.mubr.msk.f32.mxu0 %vm765_vm8, %v2055_v26 }
 0x3a0   : > { %2259 = vmatmul.mubr.msk.f32.vlgmr.msra.gmra.mrb[0].mxu0 %vm765_vm8, %v2056_v27 }
 0x3a1   : > { %2261 = vmatprep.mubr.msk.f32.mxu0 %vm765_vm8, %v2057_v28 }
 0x3a4   : > { %2262 = vmatmul.mubr.msk.f32.gmra.mrb[2].mxu0 %vm765_vm8, %v2058_v29 }
 0x44a   : > { %v2906_v13 = vpop.f32.mrb[12].mxu1 }
 0x44b   : > { %v701_v14 = vpop.f32.mrb[13].mxu1 }
 0x44c   : > { %v702_v23 = vpop.f32.mrb[14].mxu1 }
 0x44d   : > { %v704_v24 = vpop.f32.mrb[15].mxu1 }
 0x473   : > { %v2260_v34 = vpop.f32.mrb[0].mxu0 }
 0x474   : > { %v1811_v35 = vadd.f32 %v2260_v34, %v1798_v33  ;;  %v1763_v36 = vpop.f32.mrb[1].mxu0  ;;  %v1878_v33 = vstv %s1972_s12 }
 0x475   : > { %v1810_v37 = vadd.f32 %v1793_v32, %v1763_v36 }
 0x476   : > { %v1815_v38 = vmul.f32 %v2692_v21, %v1811_v35 }
 0x477   : > { %v2263_v40 = vpop.f32.mrb[2].mxu0  ;;  %v1814_v41 = vmul.f32 %v2692_v21, %v1810_v37 }
 0x478   : > { %v1773_v43 = vpop.f32.mrb[3].mxu0  ;;  %v1821_v44 = vsel %vm535_vm1, %v1815_v38, 0.0  ;;  %v1813_v45 = vadd.f32 %v2263_v40, %v1808_v42 }
 0x479   : > { %v1812_v46 = vadd.f32 %v1803_v39, %v1773_v43  ;;  %1822 = vadd.xlane.f32.xlu1 %v1821_v44  ;;  %v1818_v47 = vsel %vm535_vm1, %v1814_v41, 0.0 }
 0x47a   : > { %1819 = vadd.xlane.f32.xlu0 %v1818_v47  ;;  %v1817_v50 = vmul.f32 %v2692_v21, %v1813_v45 }
 0x47b   : > { %v1816_v48 = vmul.f32 %v2692_v21, %v1812_v46 }
 0x47c   : > { %v1827_v51 = vsel %vm535_vm1, %v1817_v50, 0.0 }
 0x47d   : > { %v1824_v49 = vsel %vm535_vm1, %v1816_v48, 0.0 }
 0x47e   : > { %1825 = vadd.xlane.f32.xlu0 %v1824_v49 }
 0x482   : > { %1828 = vadd.xlane.f32.xlu0 %v1827_v51 }
 0x48a   : > { %615 = vperm.xlu1 %2400, %v609_v52  }
 0x506   : > { %v1823_v55 = vpop.xlane.xlu1 %1822 }
 0x507   : > { %v1831_v56 = vmul.f32 0.0625, %v1823_v55  ;;  %v1820_v57 = vpop.xlane.xlu0 %1819 }
 0x508   : > { %v1830_v58 = vmul.f32 0.0625, %v1820_v57 }
 0x509   : > { %v1835_v59 = vsub.f32 %v1811_v35, %v1831_v56 }
 0x50a   : > { %v1834_v60 = vsub.f32 %v1810_v37, %v1830_v58  ;;  %v616_v25 = vpop.permute.xlu1 %615 }
 0x50b   : > { %v1826_v61 = vpop.xlane.xlu0 %1825  ;;  %v1839_v62 = vmul.f32 %v2692_v21, %v1835_v59  ;;  %v692_v41 = vadd.f32 %v2895_v53, %v616_v25 }
 0x50c   : > { %v1838_v63 = vmul.f32 %v2692_v21, %v1834_v60  ;;  %v1832_v16 = vmul.f32 0.0625, %v1826_v61 }
 0x50d   : > { %v1843_v0 = vmul.f32 %v1839_v62, %v1839_v62 }
 0x50e   : > { %v1842_v1 = vmul.f32 %v1838_v63, %v1838_v63  ;;  %v1836_v17 = vsub.f32 %v1812_v46, %v1832_v16 }
 0x50f   : > { %v1829_v2 = vpop.xlane.xlu0 %1828  ;;  %v1849_v3 = vsel %vm535_vm1, %v1843_v0, 0.0 }
 0x510   : > { %v1833_v4 = vmul.f32 0.0625, %v1829_v2  ;;  %1850 = vadd.xlane.f32.xlu0 %v1849_v3  ;;  %v1846_v5 = vsel %vm535_vm1, %v1842_v1, 0.0  ;;  %v1840_v18 = vmul.f32 %v2692_v21, %v1836_v17 }
 0x511   : > { %1847 = vadd.xlane.f32.xlu1 %v1846_v5 }
 0x512   : > { %v1837_v6 = vsub.f32 %v1813_v45, %v1833_v4  ;;  %v1844_v19 = vmul.f32 %v1840_v18, %v1840_v18 }
 0x514   : > { %v1841_v7 = vmul.f32 %v2692_v21, %v1837_v6  ;;  %v1852_v20 = vsel %vm535_vm1, %v1844_v19, 0.0 }
 0x516   : > { %v1845_v8 = vmul.f32 %v1841_v7, %v1841_v7 }
 0x518   : > { %v1855_v9 = vsel %vm535_vm1, %v1845_v8, 0.0 }
 0x519   : > { %1856 = vadd.xlane.f32.xlu0 %v1855_v9 }
 0x522   : > { %625 = vperm.xlu1 %2400, %v611_v10  }
 0x52f   : > { %620 = vperm.xlu0 %2399, %v610_v15  }
 0x546   : > { %1853 = vadd.xlane.f32.xlu1 %v1852_v20 }
 0x557   : > { %630 = vperm.xlu1 %2400, %v612_v22  }
 0x59d   : > { %v1851_v26 = vpop.xlane.xlu0 %1850 }
 0x59e   : > { %v1859_v27 = vmul.f32 0.0625, %v1851_v26  ;;  %v1848_v28 = vpop.xlane.xlu1 %1847 }
 0x59f   : > { %v1858_v29 = vmul.f32 0.0625, %v1848_v28 }
 0x5a0   : > { %v1863_v30 = vadd.f32 1e-05, %v1859_v27 }
 0x5a1   : > { %v1862_v31 = vadd.f32 1e-05, %v1858_v29 }
 0x5a2   : > { %2510 = vrsqrt.f32 %v1863_v30  ;;  %v626_v49 = vpop.permute.xlu1 %625 }
 0x5a3   : > { %2512 = vrsqrt.f32 %v1862_v31  ;;  %v700_v62 = vadd.f32 %v2906_v13, %v626_v49 }
 0x5a6   : > { %v1857_v21 = vpop.xlane.xlu0 %1856 }
 0x5a7   : > { %v1861_v46 = vmul.f32 0.0625, %v1857_v21 }
 0x5a9   : > { %v1865_v47 = vadd.f32 1e-05, %v1861_v46 }
 0x5ab   : > { %2514 = vrsqrt.f32 %v1865_v47 }
 0x5ac   : > { %v2511_v32 = vpop.eup %2510 }
 0x5ad   : > { %v2513_v34 = vpop.eup %2512  ;;  %v1871_v35 = vmul.f32 %v2511_v32, %v1835_v59 }
 0x5ae   : > { %v1870_v36 = vmul.f32 %v2513_v34, %v1834_v60  ;;  %v621_v37 = vpop.permute.xlu0 %620 }
 0x5af   : > { %vm1875_vm9 = vcmp.ge.f32.partialorder %v1871_v35, 0.0  ;;  %v1880_v38 = vmul.f32 %v1878_v33, %v1871_v35  ;;  %v695_v39 = vadd.f32 %v694_v11, %v621_v37 }
 0x5b0   : > { %vm1874_vm10 = vcmp.ge.f32.partialorder %v1870_v36, 0.0  ;;  %v1879_v40 = vmul.f32 %v1878_v33, %v1870_v36 }
 0x5b1   : > { %v1884_v42 = vsel %vm1875_vm9, %v1871_v35, %v1880_v38 }
 0x5b2   : > { %v1883_v43 = vsel %vm1874_vm10, %v1870_v36, %v1879_v40  ;;  %v1888_v44 = vadd.f32 %v1884_v42, %v695_v39 }
 0x5b3   : > { %v1887_v45 = vadd.f32 %v1883_v43, %v692_v41 }
 0x5b4   : > { %1892 = vst.msk [vmem:[%s2921_s16 + $0x8] sm:$0xff] %vm535_vm1, %v1888_v44 }
 0x5b5   : > { %1891 = vst.msk [vmem:[%s2921_s16] sm:$0xff] %vm535_vm1, %v1887_v45  ;;  %v2515_v48 = vpop.eup %2514 }
 0x5b6   : > { %v1873_v50 = vmul.f32 %v2515_v48, %v1837_v6 }
 0x5b8   : > { %v1882_v53 = vmul.f32 %v1878_v33, %v1873_v50  ;;  %vm1877_vm11 = vcmp.ge.f32.partialorder %v1873_v50, 0.0 }
 0x5ba   : > { %v1886_v57 = vsel %vm1877_vm11, %v1873_v50, %v1882_v53 }
 0x5d3   : > { %v1854_v51 = vpop.xlane.xlu1 %1853 }
 0x5d4   : > { %v1860_v52 = vmul.f32 0.0625, %v1854_v51 }
 0x5d6   : > { %v1864_v54 = vadd.f32 1e-05, %v1860_v52 }
 0x5d7   : > { %v631_v55 = vpop.permute.xlu1 %630 }
 0x5d8   : > { %2516 = vrsqrt.f32 %v1864_v54  ;;  %v703_v56 = vadd.f32 %v702_v23, %v631_v55 }
 0x5da   : > { %v1890_v58 = vadd.f32 %v1886_v57, %v703_v56 }
 0x5dc   : > { %1894 = vst.msk [vmem:[%s2921_s16 + $0x18] sm:$0xff] %vm535_vm1, %v1890_v58 }
 0x5e2   : > { %v2517_v59 = vpop.eup %2516 }
 0x5e3   : > { %v1872_v60 = vmul.f32 %v2517_v59, %v1836_v17 }
 0x5e5   : > { %vm1876_vm12 = vcmp.ge.f32.partialorder %v1872_v60, 0.0  ;;  %v1881_v61 = vmul.f32 %v1878_v33, %v1872_v60 }
 0x5e7   : > { %v1885_v63 = vsel %vm1876_vm12, %v1872_v60, %v1881_v61 }
 0x5e8   : > { %v1889_v0 = vadd.f32 %v1885_v63, %v700_v62 }
 0x5ea   : > { %1893 = vst.msk [vmem:[%s2921_s16 + $0x10] sm:$0xff] %vm535_vm1, %v1889_v0 }
 0x5eb PF: > { %s20_s30 = sadd.s32 1, %s2543_s30  }
 0x5ec   : > { %p17_p1 = scmp.ge.s32.totalorder %s20_s30, 4  }
 0x5ee   :  { %19 = sbr.rel (!%p17_p1) target bundleno = 1 (0x1), region = 99 }
 0x5f5   :  { %1916 = vsyncpa [#allocation4], 1 }
 0x5f6   :  { %1918 = vsyncpa [#allocation4 + $0x1], 1 }

// kernel: unet_forward.8
= control target key start
LH: loop header
LB: loop body
LE: loop exit
PB: predicated region body
PF: predicated region fallthrough
CT: control target
= control target key end

     0   :  { %15 = vsyncpa [#allocation4], 0  ;;  %s2327_s13 = smov 0   ;;  %s2557_s0 = inlined_call_operand.vmem [shape: bf16[2,432,80], index: 0, kind: input, shape index: {}]   ;;  %s2558_s1 = inlined_call_operand.vmem [shape: bf16[16,432], index: 1, kind: input, shape index: {}]   ;;  %s2559_s2 = inlined_call_operand.vmem [shape: f32[16,1], index: 2, kind: input, shape index: {}]   ;;  %s2560_s3 = inlined_call_operand.vmem [shape: bf16[2,48,80], index: 3, kind: input, shape index: {}]   ;;  %s2561_s4 = inlined_call_operand.vmem [shape: bf16[16,48], index: 4, kind: input, shape index: {}]   ;;  %s2562_s5 = inlined_call_operand.vmem [shape: f32[16,1], index: 5, kind: input, shape index: {}]   ;;  %s2563_s6 = inlined_call_operand.vmem [shape: f32[9,16,16], index: 6, kind: input, shape index: {}]   ;;  %s2564_s7 = inlined_call_operand.vmem [shape: f32[16,1], index: 7, kind: input, shape index: {}]   ;;  %s2565_s8 = inlined_call_operand.vmem [shape: f32[1,80], index: 8, kind: input, shape index: {}]   ;;  %s2566_s9 = inlined_call_operand.vmem [shape: f32[1,2], index: 9, kind: input, shape index: {}]   ;;  %s2567_s10 = inlined_call_operand.vmem [shape: f32[2,16,80], index: 10, kind: output, shape index: {}]  }
   0x1 LB: > { %s2333_s14 = sadd.s32 4294967295, %s2257_s13   ;;  %p1840_p0 = scmp.ge.s32.totalorder %s2257_s13, 1  ;;  %s2257_s13 = sphi %s2327_s13, %s21_s13  }
   0x2   : > { %p272_p1 = scmp.lt.s32.totalorder %s2257_s13, 3  ;;  %s306_s17 = sshll.u32 %s2566_s9, 4  ;;  %s307_s17 = int_to_ptr.vmem [resolvable:$true] %s306_s17 }
   0x3   : > { %p2122_p3 = scmp.eq.s32.totalorder %s2333_s14, 0  ;;  %s2232_s19 = scalar_lea.vmem %s307_s17, 16 }
   0x4   : > { %p2340_p2 = pnand %p1840_p0, %p272_p1  ;;  %p2233_p6 = scmp.ne.s32.totalorder %s307_s17, %s2232_s19 }
   0x5   : > { %p2240_p10 = scmp.lt.s32.totalorder %s307_s17, %s307_s17  ;;  %p2241_p11 = scmp.lt.s32.totalorder %s2232_s19, %s2232_s19 }
   0x6   : > { %p2118_p4 = pneg %p2340_p2 }
   0x7   : > { %p2242_p12 = por %p2241_p11, %p2240_p10 }
   0x8   : > { %p2119_p5 = pnand %p2122_p3, %p2118_p4 }
   0xa   : > { %p2234_p7 = pneg %p2119_p5 }
   0xc   : > { %p2235_p8 = pnand %p2234_p7, %p2233_p6 }
   0xe   : > { %p2236_p9 = pneg %p2235_p8 }
  0x10   : > { %p2243_p13 = pnand %p2242_p12, %p2236_p9 }
  0x12   : > { %2246 = shalt.err (!%p2243_p13)
}
  0x13   : > { %s2259_s20 = smov [#allocation3]   ;;  %335 = sbr.rel (%p2340_p2) target bundleno = 1450 (0x5aa), region = 60 }
  0x14   : > { %2121 = dma.vmem_to_smem (!%p2119_p5), %s307_s17, 16, %s2259_s20, [#allocation4]  }
  0x1a   : > { %2252 = dma.done.wait (%p2122_p3), [#allocation4], 16  }
  0x1b   : > { %2254 = vsyncadd (%p2122_p3), [#allocation4], 4294967280 }
  0x1c   : > { %341 = sfence }
  0x1d   : > { %p379_p0 = scmp.lt.s32.totalorder %s2333_s14, 1  ;;  %v2260_v0 = vmov 0   ;;  %v2214_v1 = vld [vmem:[%s2558_s1 + $0x4] ss:$16 sps:$4 sm:$0xff]   ;;  %vm649_vm0 = vcmask 392192   ;;  %v457_v4 = vld [vmem:[%s2559_s2 + $0x8] sm:$0xff] }
  0x1e   : > { %694 = vmatprep.subr.bf16.mxu1 %v2260_v0  ;;  %2145 = vset.pattern.permute.xlu0 %v2260_v0  ;;  %v2219_v2 = vld [vmem:[%s2558_s1 + $0xc] ss:$16 sps:$4 sm:$0xff]   ;;  %v456_v3 = vld [vmem:[%s2559_s2] sm:$0xff]  ;;  %v2217_v33 = vld [vmem:[%s2558_s1 + $0x8] ss:$16 sps:$4 sm:$0xff]   ;;  %vm743_vm1 = vcmask 654336  }
  0x1f   : > { %s2570_s14 = smov (!%p379_p0, %s2333_s14), 1  ;;  %2186 = vset.pattern.permute.xlu1 %v2260_v0  ;;  %685 = vmatprep.mubr.bf16.mxu0 %v2214_v1  ;;  %v2212_v30 = vld [vmem:[%s2558_s1] ss:$16 sps:$4 sm:$0xff]   ;;  %vm866_vm2 = vcmask 883712   ;;  %s396_s21 = sld [smem:[#allocation3]]  ;;  %vm897_vm5 = vcmask 130048  }
  0x20   : > { %460 = vperm.xlu0 %2145, %v456_v3   ;;  %s2112_s27 = smul.u32 216, %s2570_s14  ;;  %1881 = vmatprep.mubr.msk.bf16.mxu1 %vm649_vm0, %v2219_v2  ;;  %v2427_v44 = vld [vmem:[%s2565_s8] ss:$0 sm:$0xff]  ;;  %v2261_v3 = vmov 0.0   ;;  %s2262_s22 = smov 11   ;;  %vm879_vm6 = vcmask 744536  }
  0x21   : > { %867 = vst.msk [vmem:[#allocation2] sm:$0xff] %vm866_vm2, %v2261_v3  ;;  %868 = vst.msk [vmem:[#allocation2 + $0x8] sm:$0xff] %vm866_vm2, %v2261_v3  ;;  %s2113_s25 = smul.u32 24, %s2570_s14  ;;  %s2263_s11 = smov 117   ;;  %vm2268_vm7 = vmmov 0  }
  0x22   : > { %s2379_s12 = scalar_lea.vmem %s2557_s0, %s2112_s27  ;;  %s2265_s19 = smov 118  }
  0x23   : > { %v2187_v5 = vld [vmem:[%s2379_s12 + $0x80] sm:$0xff]   ;;  %v2190_v8 = vld [vmem:[%s2379_s12 + $0x88] sm:$0xff]   ;;  %v2193_v11 = vld [vmem:[%s2379_s12 + $0x90] sm:$0xff]   ;;  %s388_s30 = scalar_lea.vmem %s2560_s3, %s2113_s25  ;;  %s2266_s20 = smov 116  }
  0x24   : > { %465 = vperm.xlu0 %2145, %v457_v4   ;;  %v2188_v6 = vld [vmem:[%s2379_s12 + $0x40] sm:$0xff]   ;;  %695 = vmatpush1.bf16.msra.mxu1 %v2187_v5  ;;  %v2191_v9 = vld [vmem:[%s2379_s12 + $0x48] sm:$0xff]   ;;  %v2194_v12 = vld [vmem:[%s2379_s12 + $0x50] sm:$0xff]   ;;  %s2269_s24 = smov 107   ;;  %s2270_s25 = smov 127  }
  0x25   : > { %v2189_v7 = vld [vmem:[%s2379_s12] sm:$0xff]   ;;  %1925 = vmatprep.subr.bf16.mxu0 %v2188_v6  ;;  %696 = vmatprep.subr.bf16.mxu1 %v2260_v0  ;;  %v2192_v10 = vld [vmem:[%s2379_s12 + $0x8] sm:$0xff]   ;;  %v2195_v13 = vld [vmem:[%s2379_s12 + $0x10] sm:$0xff]   ;;  %s2271_s26 = smov 106   ;;  %s1849_s27 = sld [smem:[#allocation3 + $0x1]] }
  0x26   : > { %1926 = vmatpush3.bf16.msra.mxu0 %v2189_v7  ;;  %v2196_v14 = vld [vmem:[%s2379_s12 + $0x98] sm:$0xff]   ;;  %v2200_v17 = vld [vmem:[%s2379_s12 + $0x60] sm:$0xff]   ;;  %v2203_v20 = vld [vmem:[%s2379_s12 + $0x68] sm:$0xff]   ;;  %s1924_s28 = sshll.u32 %s2570_s14, 4 }
  0x27   : > { %1927 = vmatprep.subr.bf16.mxu0 %v2191_v9  ;;  %v2197_v15 = vld [vmem:[%s2379_s12 + $0x58] sm:$0xff]   ;;  %v2199_v18 = vld [vmem:[%s2379_s12 + $0xa0] sm:$0xff]   ;;  %v2202_v21 = vld [vmem:[%s2379_s12 + $0xa8] sm:$0xff]  }
  0x28   : > { %697 = vmatpush1.bf16.msra.mxu1 %v2190_v8  ;;  %v2198_v16 = vld [vmem:[%s2379_s12 + $0x18] sm:$0xff]   ;;  %v2201_v19 = vld [vmem:[%s2379_s12 + $0x20] sm:$0xff]   ;;  %v2204_v22 = vld [vmem:[%s2379_s12 + $0x28] sm:$0xff]  }
  0x29   : > { %698 = vmatprep.subr.bf16.mxu1 %v2260_v0  ;;  %v2206_v23 = vld [vmem:[%s2379_s12 + $0x70] sm:$0xff]   ;;  %v2209_v26 = vld [vmem:[%s2379_s12 + $0x78] sm:$0xff]   ;;  %v2211_v29 = vld [vmem:[%s2379_s12 + $0xc0] sm:$0xff]  }
  0x2a   : > { %1928 = vmatpush3.bf16.msra.mxu0 %v2192_v10  ;;  %v2205_v24 = vld [vmem:[%s2379_s12 + $0xb0] sm:$0xff]   ;;  %v2208_v27 = vld [vmem:[%s2379_s12 + $0xb8] sm:$0xff]   ;;  %v2215_v31 = vld [vmem:[%s2379_s12 + $0xc8] sm:$0xff]  }
  0x2b   : > { %1929 = vmatprep.subr.bf16.mxu0 %v2194_v12  ;;  %v2207_v25 = vld [vmem:[%s2379_s12 + $0x30] sm:$0xff]   ;;  %v2210_v28 = vld [vmem:[%s2379_s12 + $0x38] sm:$0xff]  }
  0x2c   : > { %699 = vmatpush1.bf16.msra.mxu1 %v2193_v11  ;;  %v2216_v32 = vld [vmem:[%s2379_s12 + $0xd0] sm:$0xff]   ;;  %v774_v11 = vstv %s396_s21  ;;  %s2264_s12 = smov 126   ;;  %s2267_s21 = smov 108  }
  0x2d   : > { %700 = vmatprep.subr.bf16.mxu1 %v2260_v0 }
  0x2e   : > { %1930 = vmatpush3.bf16.msra.mxu0 %v2195_v13 }
  0x2f   : > { %1931 = vmatprep.subr.bf16.mxu0 %v2197_v15 }
  0x30   : > { %701 = vmatpush1.bf16.msra.mxu1 %v2196_v14 }
  0x31   : > { %702 = vmatprep.subr.bf16.mxu1 %v2260_v0 }
  0x32   : > { %1932 = vmatpush3.bf16.msra.mxu0 %v2198_v16 }
  0x33   : > { %1933 = vmatprep.subr.bf16.mxu0 %v2200_v17 }
  0x34   : > { %703 = vmatpush1.bf16.msra.mxu1 %v2199_v18 }
  0x35   : > { %704 = vmatprep.subr.bf16.mxu1 %v2260_v0 }
  0x36   : > { %1934 = vmatpush3.bf16.msra.mxu0 %v2201_v19 }
  0x37   : > { %1935 = vmatprep.subr.bf16.mxu0 %v2203_v20 }
  0x38   : > { %705 = vmatpush1.bf16.msra.mxu1 %v2202_v21  ;;  %v882_v21 = vld [vmem:[%s2563_s6] sm:$0xff] }
  0x39   : > { %706 = vmatprep.subr.bf16.mxu1 %v2260_v0 }
  0x3a   : > { %1936 = vmatpush3.bf16.msra.mxu0 %v2204_v22 }
  0x3b   : > { %1937 = vmatprep.subr.bf16.mxu0 %v2206_v23 }
  0x3c   : > { %707 = vmatpush1.bf16.msra.mxu1 %v2205_v24 }
  0x3d   : > { %708 = vmatprep.subr.bf16.mxu1 %v2260_v0 }
  0x3e   : > { %1938 = vmatpush3.bf16.msra.mxu0 %v2207_v25 }
  0x3f   : > { %1939 = vmatprep.subr.bf16.mxu0 %v2209_v26 }
  0x40   : > { %709 = vmatpush1.bf16.msra.mxu1 %v2208_v27 }
  0x41   : > { %710 = vmatprep.subr.bf16.mxu1 %v2260_v0 }
  0x42   : > { %1940 = vmatpush3.bf16.msra.mxu0 %v2210_v28  ;;  %v1704_v28 = vld [vmem:[%s2564_s7] sm:$0xff] }
  0x44   : > { %711 = vmatpush1.bf16.msra.mxu1 %v2211_v29  ;;  %v2220_v29 = vld [vmem:[%s388_s30] sm:$0xff]  }
  0x45   : > { %686 = vmatmul.mubr.bf16.vlgmr.msra.gmra.mrb[0].mxu0 %v2212_v30  ;;  %712 = vmatprep.subr.bf16.mxu1 %v2260_v0  ;;  %v883_v30 = vld [vmem:[%s2563_s6 + $0x8] sm:$0xff] }
  0x46   : > { %2008 = vmatprep.mubr.msk.f32.mxu0 %vm897_vm5, %v882_v21 }
  0x48   : > { %713 = vmatpush1.bf16.msra.mxu1 %v2215_v31  ;;  %v1894_v31 = vld [vmem:[%s2563_s6 + $0x20] sm:$0xff] }
  0x49   : > { %714 = vmatprep.subr.bf16.mxu1 %v2260_v0 }
  0x4c   : > { %715 = vmatpush1.bf16.msra.mxu1 %v2216_v32  ;;  %v2221_v32 = vld [vmem:[%s388_s30 + $0x8] sm:$0xff]  }
  0x4d   : > { %1987 = vmatprep.subr.bf16.mxu1 %v2261_v3 }
  0x4f   : > { %727 = vmatmul.mubr.bf16.vlgmr.msra.gmra.mrb[0].mxu1 %v2217_v33  ;;  %v2222_v33 = vld [vmem:[%s388_s30 + $0x10] sm:$0xff]  }
  0x50   : > { %1988 = vmatpush3.bf16.msra.mxu1 %v2220_v29  ;;  %1993 = vmatprep.mubr.msk.bf16.mxu1 %vm2268_vm7, %v2261_v3 }
  0x51   : > { %1989 = vmatprep.subr.bf16.mxu1 %v2261_v3 }
  0x54   : > { %1990 = vmatpush3.bf16.msra.mxu1 %v2221_v32 }
  0x55   : > { %1991 = vmatprep.subr.bf16.mxu1 %v2261_v3  ;;  %v1906_v3 = vld [vmem:[%s2563_s6 + $0x50] sm:$0xff] }
  0x58   : > { %1992 = vmatpush3.bf16.msra.mxu1 %v2222_v33 }
  0x9f   : > { %v461_v36 = vpop.permute.xlu0 %460 }
  0xa3   : > { %v466_v42 = vpop.permute.xlu0 %465 }
 0x118   : > { %v1941_v34 = vpop.f32.mrb[0].mxu0 }
 0x119   : > { %v1942_v35 = vpop.f32.mrb[1].mxu0 }
 0x11a   : > { %v1943_v37 = vadd.f32 %v1942_v35, %v1941_v34  ;;  %v1944_v38 = vpop.f32.mrb[2].mxu0  ;;  %v2223_v34 = vld [vmem:[%s2561_s4] sm:$0xff]   ;;  %v1888_v35 = vld [vmem:[%s2563_s6 + $0x10] sm:$0xff] }
 0x11b   : > { %v1945_v39 = vpop.f32.mrb[3].mxu0  ;;  %1994 = vmatmul.mubr.msk.bf16.vlgmr.msra.gmra.mrb[4].mxu1 %vm649_vm0, %v2223_v34 }
 0x11c   : > { %v1946_v40 = vadd.f32 %v1945_v39, %v1944_v38  ;;  %v688_v41 = vadd.f32 %v1943_v37, %v461_v36  ;;  %2001 = vmatprep.mubr.msk.f32.mxu1 %vm897_vm5, %v1888_v35  ;;  %v1705_v36 = vld [vmem:[%s2564_s7 + $0x8] sm:$0xff] }
 0x11e   : > { %v691_v45 = vadd.f32 %v1946_v40, %v466_v42 }
 0x122   : > { %v728_v43 = vpop.f32.mrb[0].mxu1 }
 0x123   : > { %v729_v46 = vadd.f32 %v728_v43, %v688_v41  ;;  %v730_v47 = vpop.f32.mrb[1].mxu1 }
 0x124   : > { %v731_v48 = vpop.f32.mrb[2].mxu1 }
 0x125   : > { %v732_v49 = vadd.f32 %v731_v48, %v691_v45  ;;  %v733_v50 = vpop.f32.mrb[3].mxu1  ;;  %v741_v51 = vmul.f32 %v2427_v44, %v729_v46  ;;  %v1895_v48 = vld [vmem:[%s2563_s6 + $0x28] sm:$0xff] }
 0x126   : > { %v1898_v50 = vld [vmem:[%s2563_s6 + $0x30] sm:$0xff] }
 0x127   : > { %v744_v52 = vsel %vm743_vm1, %v741_v51, 0.0  ;;  %v742_v53 = vmul.f32 %v2427_v44, %v732_v49 }
 0x128   : > { %745 = vadd.xlane.f32.xlu1 %v744_v52 }
 0x129   : > { %v747_v54 = vsel %vm743_vm1, %v742_v53, 0.0 }
 0x12c   : > { %748 = vadd.xlane.f32.xlu1 %v747_v54 }
 0x1b5   : > { %v746_v55 = vpop.xlane.xlu1 %745 }
 0x1b6   : > { %v750_v56 = vmul.f32 0.015625, %v746_v55 }
 0x1b8   : > { %v752_v57 = vsub.f32 %v729_v46, %v750_v56  ;;  %v1899_v56 = vld [vmem:[%s2563_s6 + $0x38] sm:$0xff] }
 0x1b9   : > { %v749_v58 = vpop.xlane.xlu1 %748 }
 0x1ba   : > { %v751_v59 = vmul.f32 0.015625, %v749_v58  ;;  %v754_v60 = vmul.f32 %v2427_v44, %v752_v57 }
 0x1bc   : > { %v753_v61 = vsub.f32 %v732_v49, %v751_v59  ;;  %v756_v62 = vmul.f32 %v754_v60, %v754_v60 }
 0x1be   : > { %v758_v63 = vsel %vm743_vm1, %v756_v62, 0.0  ;;  %v755_v0 = vmul.f32 %v2427_v44, %v753_v61 }
 0x1bf   : > { %759 = vadd.xlane.f32.xlu0 %v758_v63 }
 0x1c0   : > { %v757_v1 = vmul.f32 %v755_v0, %v755_v0 }
 0x1c2   : > { %v761_v2 = vsel %vm743_vm1, %v757_v1, 0.0  ;;  %v1903_v1 = vld [vmem:[%s2563_s6 + $0x48] sm:$0xff] }
 0x1c3   : > { %762 = vadd.xlane.f32.xlu1 %v761_v2 }
 0x24c   : > { %v760_v4 = vpop.xlane.xlu0 %759 }
 0x24d   : > { %v764_v5 = vmul.f32 0.015625, %v760_v4 }
 0x24f   : > { %v766_v6 = vadd.f32 1e-05, %v764_v5  ;;  %v1889_v5 = vld [vmem:[%s2563_s6 + $0x18] sm:$0xff] }
 0x250   : > { %v763_v7 = vpop.xlane.xlu1 %762 }
 0x251   : > { %2224 = vrsqrt.f32 %v766_v6  ;;  %v765_v8 = vmul.f32 0.015625, %v763_v7 }
 0x253   : > { %v767_v9 = vadd.f32 1e-05, %v765_v8  ;;  %v1907_v8 = vld [vmem:[%s2563_s6 + $0x58] sm:$0xff] }
 0x255   : > { %2226 = vrsqrt.f32 %v767_v9  ;;  %v1910_v9 = vld [vmem:[%s2563_s6 + $0x60] sm:$0xff] }
 0x25b   : > { %v2225_v10 = vpop.eup %2224 }
 0x25c   : > { %v770_v12 = vmul.f32 %v2225_v10, %v752_v57  ;;  %v1902_v57 = vld [vmem:[%s2563_s6 + $0x40] sm:$0xff] }
 0x25e   : > { %vm772_vm3 = vcmp.ge.f32.partialorder %v770_v12, 0.0  ;;  %v775_v13 = vmul.f32 %v774_v11, %v770_v12 }
 0x25f   : > { %v2227_v14 = vpop.eup %2226 }
 0x260   : > { %v777_v15 = vsel %vm772_vm3, %v770_v12, %v775_v13  ;;  %v771_v16 = vmul.f32 %v2227_v14, %v753_v61  ;;  %v1911_v14 = vld [vmem:[%s2563_s6 + $0x68] sm:$0xff] }
 0x261   : > { %v869_v17 = vmul.f32 %v2427_v44, %v777_v15  ;;  %v1914_v15 = vld [vmem:[%s2563_s6 + $0x70] sm:$0xff] }
 0x262   : > { %vm773_vm4 = vcmp.ge.f32.partialorder %v771_v16, 0.0  ;;  %v776_v18 = vmul.f32 %v774_v11, %v771_v16 }
 0x263   : > { %873 = vrot.lane.b32.xlu1 %v869_v17, %s2262_s22  ;;  %v1915_v17 = vld [vmem:[%s2563_s6 + $0x78] sm:$0xff] }
 0x264   : > { %v778_v19 = vsel %vm773_vm4, %v771_v16, %v776_v18  ;;  %v1918_v18 = vld [vmem:[%s2563_s6 + $0x80] sm:$0xff] }
 0x265   : > { %v870_v20 = vmul.f32 %v2427_v44, %v778_v19  ;;  %v1919_v19 = vld [vmem:[%s2563_s6 + $0x88] sm:$0xff] }
 0x267   : > { %875 = vrot.lane.b32.xlu1 %v870_v20, %s2262_s22  ;;  %v2531_v20 = vpop.f32.mrb[4].mxu1 }
 0x268   : > { %v1995_v21 = vpop.f32.mrb[5].mxu1 }
 0x2d5   : > { %v874_v22 = vpop.permute.xlu1 %873 }
 0x2d6   : > { %880 = vst.msk [vmem:[#allocation2] sm:$0xff] %vm879_vm6, %v874_v22  ;;  %v862_v22 = vpop.f32.mrb[6].mxu1 }
 0x2d9   : > { %v876_v23 = vpop.permute.xlu1 %875 }
 0x2da   : > { %881 = vst.msk [vmem:[#allocation2 + $0x8] sm:$0xff] %vm879_vm6, %v876_v23  ;;  %v1996_v23 = vpop.f32.mrb[7].mxu1 }
 0x2dd   : > { %v884_v24 = vld [vmem:[#allocation2] sm:$0xff] }
 0x2e1   : > { %v885_v25 = vld [vmem:[#allocation2 + $0x8] sm:$0xff] }
 0x2e2   : > { %v2156_v26 = vpack.i.bf16 %v885_v25, %v884_v24  ;;  %v2064_v27 = vpack.c.bf16 %v885_v25, %v884_v24 }
 0x2e4   : > { %2157 = vrot.lane.b32.xlu0 %v2156_v26, %s2263_s11  ;;  %2147 = vrot.lane.b32.xlu1 %v2156_v26, %s2264_s12  ;;  %s393_s11 = scalar_lea.vmem %s2567_s10, %s1924_s28 }
 0x2e5   : > { %2065 = vmatprep.subr.bf16.mxu0 %v2064_v27 }
 0x2e6   : > { %2067 = vmatpush3.bf16.msra.mxu0 %v2064_v27 }
 0x2e8   : > { %1708 = vperm.xlu0 %2145, %v1704_v28   ;;  %2152 = vrot.lane.b32.xlu1 %v2156_v26, %s2265_s19 }
 0x2e9   : > { %2009 = vmatmul.mubr.msk.f32.vlgmr.msra.gmra.mrb[4].mxu0 %vm897_vm5, %v883_v30 }
 0x2ea   : > { %2015 = vmatprep.mubr.msk.f32.mxu0 %vm897_vm5, %v1894_v31 }
 0x2ec   : > { %2162 = vrot.lane.b32.xlu1 %v2156_v26, %s2266_s20 }
 0x2f0   : > { %2167 = vrot.lane.b32.xlu1 %v2156_v26, %s2267_s21 }
 0x2f4   : > { %2172 = vrot.lane.b32.xlu1 %v2156_v26, %s2269_s24 }
 0x2f8   : > { %2177 = vrot.lane.b32.xlu1 %v2156_v26, %s2270_s25 }
 0x2fc   : > { %2182 = vrot.lane.b32.xlu1 %v2156_v26, %s2271_s26 }
 0x300   : > { %1713 = vperm.xlu1 %2186, %v1705_v36  }
 0x356   : > { %v2148_v37 = vpop.permute.xlu1 %2147  ;;  %v2158_v40 = vpop.permute.xlu0 %2157 }
 0x357   : > { %v2150_v38 = vunpack.i.h.bf16 %v2148_v37  ;;  %v2149_v39 = vunpack.i.l.bf16 %v2148_v37  ;;  %v2160_v43 = vunpack.i.h.bf16 %v2158_v40  ;;  %v2159_v45 = vunpack.i.l.bf16 %v2158_v40 }
 0x359   : > { %v2068_v41 = vpack.c.bf16 %v2150_v38, %v2149_v39  ;;  %v2076_v52 = vpack.c.bf16 %v2160_v43, %v2159_v45  ;;  %v787_v38 = vld [vmem:[%s2562_s5] sm:$0xff] }
 0x35a   : > { %v2153_v42 = vpop.permute.xlu1 %2152 }
 0x35b   : > { %v2155_v46 = vunpack.i.h.bf16 %v2153_v42  ;;  %v2154_v47 = vunpack.i.l.bf16 %v2153_v42  ;;  %2069 = vmatprep.subr.bf16.mxu0 %v2068_v41 }
 0x35c   : > { %2071 = vmatpush3.bf16.msra.mxu0 %v2068_v41 }
 0x35d   : > { %v2072_v49 = vpack.c.bf16 %v2155_v46, %v2154_v47 }
 0x35e   : > { %v2163_v51 = vpop.permute.xlu1 %2162 }
 0x35f   : > { %2016 = vmatmul.mubr.msk.f32.vlgmr.msra.gmra.mrb[4].mxu0 %vm897_vm5, %v1895_v48  ;;  %2073 = vmatprep.subr.bf16.mxu0 %v2072_v49  ;;  %v2165_v54 = vunpack.i.h.bf16 %v2163_v51  ;;  %v2164_v55 = vunpack.i.l.bf16 %v2163_v51 }
 0x360   : > { %2075 = vmatpush3.bf16.msra.mxu0 %v2072_v49  ;;  %2022 = vmatprep.mubr.msk.f32.mxu0 %vm897_vm5, %v1898_v50 }
 0x361   : > { %2077 = vmatprep.subr.bf16.mxu0 %v2076_v52  ;;  %v2080_v59 = vpack.c.bf16 %v2165_v54, %v2164_v55 }
 0x362   : > { %v2168_v53 = vpop.permute.xlu1 %2167 }
 0x363   : > { %v2170_v61 = vunpack.i.h.bf16 %v2168_v53  ;;  %v2169_v62 = vunpack.i.l.bf16 %v2168_v53 }
 0x365   : > { %v2084_v4 = vpack.c.bf16 %v2170_v61, %v2169_v62 }
 0x366   : > { %v2173_v58 = vpop.permute.xlu1 %2172 }
 0x367   : > { %2023 = vmatmul.mubr.msk.f32.vlgmr.msra.gmra.mrb[4].mxu0 %vm897_vm5, %v1899_v56  ;;  %v2175_v6 = vunpack.i.h.bf16 %v2173_v58  ;;  %v2174_v7 = vunpack.i.l.bf16 %v2173_v58  ;;  %v1709_v31 = vpop.permute.xlu0 %1708 }
 0x368   : > { %2079 = vmatpush3.bf16.msra.mxu0 %v2076_v52  ;;  %2029 = vmatprep.mubr.msk.f32.mxu0 %vm897_vm5, %v1902_v57  ;;  %v788_v52 = vld [vmem:[%s2562_s5 + $0x8] sm:$0xff] }
 0x369   : > { %2081 = vmatprep.subr.bf16.mxu0 %v2080_v59  ;;  %v2088_v10 = vpack.c.bf16 %v2175_v6, %v2174_v7 }
 0x36a   : > { %v2178_v60 = vpop.permute.xlu1 %2177 }
 0x36b   : > { %v2180_v63 = vunpack.i.h.bf16 %v2178_v60  ;;  %v2179_v0 = vunpack.i.l.bf16 %v2178_v60 }
 0x36d   : > { %v2060_v2 = vpack.c.bf16 %v2180_v63, %v2179_v0 }
 0x36e   : > { %v2183_v11 = vpop.permute.xlu1 %2182 }
 0x36f   : > { %2061 = vmatprep.subr.bf16.mxu1 %v2060_v2  ;;  %2030 = vmatmul.mubr.msk.f32.vlgmr.msra.gmra.mrb[4].mxu0 %vm897_vm5, %v1903_v1  ;;  %v2185_v12 = vunpack.i.h.bf16 %v2183_v11  ;;  %v2184_v13 = vunpack.i.l.bf16 %v2183_v11 }
 0x370   : > { %2083 = vmatpush3.bf16.msra.mxu0 %v2080_v59  ;;  %2063 = vmatpush3.bf16.msra.mxu1 %v2060_v2  ;;  %v1750_v59 = vstv %s1849_s27 }
 0x371   : > { %2085 = vmatprep.subr.bf16.mxu0 %v2084_v4  ;;  %2036 = vmatprep.mubr.msk.f32.mxu0 %vm897_vm5, %v1906_v3  ;;  %v2092_v16 = vpack.c.bf16 %v2185_v12, %v2184_v13 }
 0x373   : > { %2002 = vmatmul.mubr.msk.f32.vlgmr.msra.gmra.mrb[8].mxu1 %vm897_vm5, %v1889_v5 }
 0x377   : > { %2037 = vmatmul.mubr.msk.f32.vlgmr.msra.gmra.mrb[4].mxu0 %vm897_vm5, %v1907_v8 }
 0x378   : > { %2087 = vmatpush3.bf16.msra.mxu0 %v2084_v4  ;;  %2043 = vmatprep.mubr.msk.f32.mxu0 %vm897_vm5, %v1910_v9 }
 0x379   : > { %2089 = vmatprep.subr.bf16.mxu0 %v2088_v10 }
 0x37f   : > { %2044 = vmatmul.mubr.msk.f32.vlgmr.msra.gmra.mrb[4].mxu0 %vm897_vm5, %v1911_v14  ;;  %v1714_v27 = vpop.permute.xlu1 %1713 }
 0x380   : > { %2091 = vmatpush3.bf16.msra.mxu0 %v2088_v10  ;;  %2050 = vmatprep.mubr.msk.f32.mxu0 %vm897_vm5, %v1914_v15 }
 0x381   : > { %2093 = vmatprep.subr.bf16.mxu0 %v2092_v16 }
 0x387   : > { %2051 = vmatmul.mubr.msk.f32.vlgmr.msra.gmra.mrb[4].mxu0 %vm897_vm5, %v1915_v17 }
 0x388   : > { %2095 = vmatpush3.bf16.msra.mxu0 %v2092_v16  ;;  %2057 = vmatprep.mubr.msk.f32.mxu0 %vm897_vm5, %v1918_v18 }
 0x38f   : > { %2058 = vmatmul.mubr.msk.f32.vlgmr.msra.gmra.mrb[4].mxu0 %vm897_vm5, %v1919_v19 }
 0x446   : > { %v2003_v24 = vpop.f32.mrb[8].mxu1 }
 0x447   : > { %v970_v25 = vpop.f32.mrb[9].mxu1 }
 0x462   : > { %v2059_v26 = vpop.f32.mrb[4].mxu0 }
 0x463   : > { %v2096_v28 = vadd.f32 %v2059_v26, %v2003_v24  ;;  %v1693_v29 = vpop.f32.mrb[5].mxu0 }
 0x464   : > { %v2097_v30 = vadd.f32 %v1693_v29, %v970_v25 }
 0x465   : > { %v1717_v32 = vadd.f32 %v2096_v28, %v1714_v27 }
 0x466   : > { %v1716_v33 = vadd.f32 %v2097_v30, %v1709_v31 }
 0x467   : > { %v1719_v34 = vmul.f32 %v2427_v44, %v1717_v32 }
 0x468   : > { %v1718_v35 = vmul.f32 %v2427_v44, %v1716_v33 }
 0x469   : > { %v1723_v36 = vsel %vm743_vm1, %v1719_v34, 0.0 }
 0x46a   : > { %1724 = vadd.xlane.f32.xlu1 %v1723_v36  ;;  %v1720_v37 = vsel %vm743_vm1, %v1718_v35, 0.0 }
 0x46b   : > { %1721 = vadd.xlane.f32.xlu0 %v1720_v37 }
 0x47b   : > { %791 = vperm.xlu1 %2186, %v787_v38  }
 0x4f7   : > { %v1725_v39 = vpop.xlane.xlu1 %1724 }
 0x4f8   : > { %v1727_v40 = vmul.f32 0.015625, %v1725_v39  ;;  %v1722_v41 = vpop.xlane.xlu0 %1721 }
 0x4f9   : > { %v1726_v42 = vmul.f32 0.015625, %v1722_v41 }
 0x4fa   : > { %v1729_v43 = vsub.f32 %v1717_v32, %v1727_v40 }
 0x4fb   : > { %v1728_v45 = vsub.f32 %v1716_v33, %v1726_v42  ;;  %v792_v1 = vpop.permute.xlu1 %791 }
 0x4fc   : > { %v1731_v46 = vmul.f32 %v2427_v44, %v1729_v43  ;;  %v860_v6 = vadd.f32 %v2531_v20, %v792_v1 }
 0x4fd   : > { %v1730_v47 = vmul.f32 %v2427_v44, %v1728_v45 }
 0x4fe   : > { %v1733_v48 = vmul.f32 %v1731_v46, %v1731_v46 }
 0x4ff   : > { %v1732_v50 = vmul.f32 %v1730_v47, %v1730_v47 }
 0x500   : > { %v1737_v49 = vsel %vm743_vm1, %v1733_v48, 0.0 }
 0x501   : > { %1738 = vadd.xlane.f32.xlu0 %v1737_v49  ;;  %v1734_v51 = vsel %vm743_vm1, %v1732_v50, 0.0 }
 0x505   : > { %1735 = vadd.xlane.f32.xlu0 %v1734_v51 }
 0x51b   : > { %796 = vperm.xlu0 %2145, %v788_v52  }
 0x58e   : > { %v1739_v53 = vpop.xlane.xlu0 %1738 }
 0x58f   : > { %v1741_v54 = vmul.f32 0.015625, %v1739_v53 }
 0x591   : > { %v1743_v55 = vadd.f32 1e-05, %v1741_v54 }
 0x592   : > { %v1736_v56 = vpop.xlane.xlu0 %1735 }
 0x593   : > { %2228 = vrsqrt.f32 %v1743_v55  ;;  %v1740_v44 = vmul.f32 0.015625, %v1736_v56 }
 0x595   : > { %v1742_v57 = vadd.f32 1e-05, %v1740_v44 }
 0x597   : > { %2230 = vrsqrt.f32 %v1742_v57 }
 0x59a   : > { %v797_v61 = vpop.permute.xlu0 %796 }
 0x59b   : > { %v863_v0 = vadd.f32 %v862_v22, %v797_v61 }
 0x59d   : > { %v2229_v58 = vpop.eup %2228 }
 0x59e   : > { %v1747_v60 = vmul.f32 %v2229_v58, %v1729_v43 }
 0x5a0   : > { %vm1749_vm8 = vcmp.ge.f32.partialorder %v1747_v60, 0.0  ;;  %v1752_v62 = vmul.f32 %v1750_v59, %v1747_v60 }
 0x5a1   : > { %v2231_v63 = vpop.eup %2230 }
 0x5a2   : > { %v1746_v2 = vmul.f32 %v2231_v63, %v1728_v45  ;;  %v1754_v3 = vsel %vm1749_vm8, %v1747_v60, %v1752_v62 }
 0x5a3   : > { %v1756_v4 = vadd.f32 %v1754_v3, %v863_v0 }
 0x5a4   : > { %vm1748_vm9 = vcmp.ge.f32.partialorder %v1746_v2, 0.0  ;;  %v1751_v5 = vmul.f32 %v1750_v59, %v1746_v2 }
 0x5a5   : > { %1758 = vst.msk [vmem:[%s393_s11 + $0x8] sm:$0xff] %vm743_vm1, %v1756_v4 }
 0x5a6   : > { %v1753_v7 = vsel %vm1748_vm9, %v1746_v2, %v1751_v5 }
 0x5a7   : > { %v1755_v8 = vadd.f32 %v1753_v7, %v860_v6 }
 0x5a9   : > { %1757 = vst.msk [vmem:[%s393_s11] sm:$0xff] %vm743_vm1, %v1755_v8 }
 0x5aa PF: > { %s21_s13 = sadd.s32 1, %s2257_s13  }
 0x5ab   : > { %p18_p1 = scmp.ge.s32.totalorder %s21_s13, 4  }
 0x5ad   :  { %20 = sbr.rel (!%p18_p1) target bundleno = 1 (0x1), region = 106 }
 0x5b4   :  { %1780 = vsyncpa [#allocation4], 1 }
 0x5b5   :  { %1782 = vsyncpa [#allocation4 + $0x1], 1 }

// kernel: unet_forward.9
= control target key start
LH: loop header
LB: loop body
LE: loop exit
PB: predicated region body
PF: predicated region fallthrough
CT: control target
= control target key end

     0   :  { %17 = vsyncpa [#allocation4], 0  ;;  %s3172_s21 = smov 0   ;;  %s3448_s0 = inlined_call_operand.vmem [shape: bf16[2,216,288], index: 0, kind: input, shape index: {}]   ;;  %s3449_s1 = inlined_call_operand.vmem [shape: bf16[8,216], index: 1, kind: input, shape index: {}]   ;;  %s3450_s2 = inlined_call_operand.vmem [shape: f32[8,1], index: 2, kind: input, shape index: {}]   ;;  %s3451_s3 = inlined_call_operand.vmem [shape: bf16[2,24,288], index: 3, kind: input, shape index: {}]   ;;  %s3452_s4 = inlined_call_operand.vmem [shape: bf16[8,24], index: 4, kind: input, shape index: {}]   ;;  %s3453_s5 = inlined_call_operand.vmem [shape: f32[8,1], index: 5, kind: input, shape index: {}]   ;;  %s3454_s6 = inlined_call_operand.vmem [shape: f32[9,8,8], index: 6, kind: input, shape index: {}]   ;;  %s3455_s7 = inlined_call_operand.vmem [shape: f32[8,1], index: 7, kind: input, shape index: {}]   ;;  %s3456_s8 = inlined_call_operand.vmem [shape: f32[1,288], index: 8, kind: input, shape index: {}]   ;;  %s3457_s9 = inlined_call_operand.vmem [shape: f32[1,2], index: 9, kind: input, shape index: {}]   ;;  %s3458_s10 = inlined_call_operand.vmem [shape: f32[3,8], index: 10, kind: input, shape index: {}]   ;;  %s3459_s11 = inlined_call_operand.vmem [shape: f32[3,1], index: 11, kind: input, shape index: {}]   ;;  %s3460_s12 = inlined_call_operand.vmem [shape: f32[2,3,288], index: 12, kind: output, shape index: {}]  }
   0x1 LB: > { %s3178_s22 = sadd.s32 4294967295, %s3092_s21   ;;  %p2771_p0 = scmp.ge.s32.totalorder %s3092_s21, 1  ;;  %s3092_s21 = sphi %s3172_s21, %s23_s21  }
   0x2   : > { %p316_p1 = scmp.lt.s32.totalorder %s3092_s21, 3  ;;  %s350_s25 = sshll.u32 %s3457_s9, 4  ;;  %s351_s25 = int_to_ptr.vmem [resolvable:$true] %s350_s25 }
   0x3   : > { %p2974_p3 = scmp.eq.s32.totalorder %s3178_s22, 0  ;;  %s3067_s27 = scalar_lea.vmem %s351_s25, 16 }
   0x4   : > { %p3185_p2 = pnand %p2771_p0, %p316_p1  ;;  %p3068_p6 = scmp.ne.s32.totalorder %s351_s25, %s3067_s27 }
   0x5   : > { %p3075_p10 = scmp.lt.s32.totalorder %s351_s25, %s351_s25  ;;  %p3076_p11 = scmp.lt.s32.totalorder %s3067_s27, %s3067_s27 }
   0x6   : > { %p2970_p4 = pneg %p3185_p2 }
   0x7   : > { %p3077_p12 = por %p3076_p11, %p3075_p10 }
   0x8   : > { %p2971_p5 = pnand %p2974_p3, %p2970_p4 }
   0xa   : > { %p3069_p7 = pneg %p2971_p5 }
   0xc   : > { %p3070_p8 = pnand %p3069_p7, %p3068_p6 }
   0xe   : > { %p3071_p9 = pneg %p3070_p8 }
  0x10   : > { %p3078_p13 = pnand %p3077_p12, %p3071_p9 }
  0x12   : > { %3081 = shalt.err (!%p3078_p13)
}
  0x13   : > { %s3094_s28 = smov [#allocation3]   ;;  %385 = sbr.rel (%p3185_p2) target bundleno = 1705 (0x6a9), region = 68 }
  0x14   : > { %2973 = dma.vmem_to_smem (!%p2971_p5), %s351_s25, 16, %s3094_s28, [#allocation4]  }
  0x1a   : > { %3087 = dma.done.wait (%p2974_p3), [#allocation4], 16  }
  0x1b   : > { %3089 = vsyncadd (%p2974_p3), [#allocation4], 4294967280 }
  0x1c   : > { %391 = sfence }
  0x1d   : > { %p433_p0 = scmp.lt.s32.totalorder %s3178_s22, 1  ;;  %v3204_v0 = vld [vmem:[%s3449_s1] sm:$0xff]  ;;  %vm735_vm0 = vcmask 719872   ;;  %v3095_v2 = vmov 0   ;;  %vm739_vm1 = vcmask 1043456   ;;  %v831_v50 = vlaneseq  ;;  %s450_s23 = sld [smem:[#allocation3]] }
  0x1e   : > { %v507_v1 = vld [vmem:[%s3450_s2] sm:$0xff]  ;;  %790 = vmatprep.subr.bf16.mxu1 %v3095_v2  ;;  %v2781_v3 = vcombine.high %v3204_v0, %v3204_v0  ;;  %2997 = vset.pattern.permute.xlu0 %v3095_v2  ;;  %v2780_v49 = vcombine.low %v3204_v0, %v3204_v0  ;;  %vm850_vm2 = vcmask 261120   ;;  %vm1019_vm3 = vcmask 621568   ;;  %s3097_s24 = smov 19   ;;  %s3099_s13 = smov 127  }
  0x1f   : > { %s3463_s22 = smov (!%p433_p0, %s3178_s22), 1  ;;  %510 = vperm.xlu0 %2997, %v507_v1   ;;  %2998 = vset.pattern.permute.xlu1 %v3095_v2  ;;  %v832_v51 = vshrl.u32 %v831_v50, 7  ;;  %v449_v53 = vld [vmem:[%s3456_s8] sm:$0x7]  ;;  %vm923_vm7 = vcmask 195584   ;;  %vm3098_vm8 = vmmov 0  }
  0x20   : > { %2826 = vmatprep.mubr.msk.bf16.mxu1 %vm735_vm0, %v2781_v3  ;;  %2825 = vmatprep.mubr.msk.bf16.mxu0 %vm735_vm0, %v2781_v3  ;;  %s2963_s15 = smul.u32 324, %s3463_s22  ;;  %vm1039_vm9 = vcmask 1047704   ;;  %vm1033_vm10 = vcmask 154624   ;;  %vm1042_vm11 = vcmask 416768   ;;  %s3100_s14 = smov 110   ;;  %vm1059_vm12 = vcmask 1039360  }
  0x21   : > { %v841_v52 = vsub.s32 2, %v832_v51  ;;  %v833_v54 = vsub.s32 0, %v832_v51  ;;  %v837_v55 = vsub.s32 1, %v832_v51  ;;  %s2964_s25 = smul.u32 36, %s3463_s22  ;;  %s3102_s16 = smov 108   ;;  %vm1065_vm13 = vcmask 64512  }
  0x22   : > { %s3221_s18 = scalar_lea.vmem %s3448_s0, %s2963_s15  ;;  %s3101_s15 = smov 109   ;;  %vm1362_vm14 = vcmask 1031168   ;;  %vm1523_vm15 = vcmask 900096   ;;  %vm1684_vm0 = vcmask 891904  }
  0x23   : > { %v2999_v4 = vld [vmem:[%s3221_s18 + $0x4] ss:$12 sps:$4 sm:$0xff]   ;;  %v3001_v5 = vld [vmem:[%s3221_s18 + $0x8] ss:$12 sps:$4 sm:$0xff]   ;;  %v3002_v6 = vld [vmem:[%s3221_s18] ss:$12 sps:$4 sm:$0xff]   ;;  %v3286_v57 = vrot.slane %v449_v53, %v841_v52  ;;  %v3288_v59 = vrot.slane %v449_v53, %v833_v54  ;;  %v3290_v63 = vrot.slane %v449_v53, %v837_v55  ;;  %s442_s28 = scalar_lea.vmem %s3451_s3, %s2964_s25 }
  0x24   : > { %749 = vmatprep.subr.bf16.mxu0 %v2999_v4  ;;  %791 = vmatpush1.bf16.msra.mxu1 %v3001_v5  ;;  %v3003_v7 = vld [vmem:[%s3221_s18 + $0x1c] ss:$12 sps:$4 sm:$0xff]   ;;  %v3005_v8 = vld [vmem:[%s3221_s18 + $0x20] ss:$12 sps:$4 sm:$0xff]   ;;  %v3006_v9 = vld [vmem:[%s3221_s18 + $0x18] ss:$12 sps:$4 sm:$0xff]  }
  0x25   : > { %750 = vmatpush1.bf16.msra.mxu0 %v3002_v6  ;;  %792 = vmatprep.subr.bf16.mxu1 %v3095_v2  ;;  %v3007_v10 = vld [vmem:[%s3221_s18 + $0x34] ss:$12 sps:$4 sm:$0xff]   ;;  %v3009_v11 = vld [vmem:[%s3221_s18 + $0x38] ss:$12 sps:$4 sm:$0xff]   ;;  %v3010_v12 = vld [vmem:[%s3221_s18 + $0x30] ss:$12 sps:$4 sm:$0xff]  }
  0x26   : > { %751 = vmatprep.subr.bf16.mxu0 %v3003_v7  ;;  %v3011_v13 = vld [vmem:[%s3221_s18 + $0x4c] ss:$12 sps:$4 sm:$0xff]   ;;  %v3013_v14 = vld [vmem:[%s3221_s18 + $0x50] ss:$12 sps:$4 sm:$0xff]   ;;  %v3014_v15 = vld [vmem:[%s3221_s18 + $0x48] ss:$12 sps:$4 sm:$0xff]  }
  0x27   : > { %v3015_v16 = vld [vmem:[%s3221_s18 + $0x64] ss:$12 sps:$4 sm:$0xff]   ;;  %v3017_v17 = vld [vmem:[%s3221_s18 + $0x68] ss:$12 sps:$4 sm:$0xff]   ;;  %v3018_v18 = vld [vmem:[%s3221_s18 + $0x60] ss:$12 sps:$4 sm:$0xff]  }
  0x28   : > { %793 = vmatpush1.bf16.msra.mxu1 %v3005_v8  ;;  %v3019_v19 = vld [vmem:[%s3221_s18 + $0x7c] ss:$12 sps:$4 sm:$0xff]   ;;  %v3021_v20 = vld [vmem:[%s3221_s18 + $0x80] ss:$12 sps:$4 sm:$0xff]   ;;  %v3022_v21 = vld [vmem:[%s3221_s18 + $0x78] ss:$12 sps:$4 sm:$0xff]  }
  0x29   : > { %752 = vmatpush1.bf16.msra.mxu0 %v3006_v9  ;;  %794 = vmatprep.subr.bf16.mxu1 %v3095_v2  ;;  %v3023_v22 = vld [vmem:[%s3221_s18 + $0x94] ss:$12 sps:$4 sm:$0xff]   ;;  %v3025_v23 = vld [vmem:[%s3221_s18 + $0x98] ss:$12 sps:$4 sm:$0xff]   ;;  %v3026_v24 = vld [vmem:[%s3221_s18 + $0x90] ss:$12 sps:$4 sm:$0xff]  }
  0x2a   : > { %753 = vmatprep.subr.bf16.mxu0 %v3007_v10  ;;  %v3027_v25 = vld [vmem:[%s3221_s18 + $0xac] ss:$12 sps:$4 sm:$0xff]   ;;  %v3029_v26 = vld [vmem:[%s3221_s18 + $0xb0] ss:$12 sps:$4 sm:$0xff]   ;;  %v3030_v27 = vld [vmem:[%s3221_s18 + $0xa8] ss:$12 sps:$4 sm:$0xff]  }
  0x2b   : > { %v3031_v28 = vld [vmem:[%s3221_s18 + $0xc4] ss:$12 sps:$4 sm:$0xff]   ;;  %v3033_v29 = vld [vmem:[%s3221_s18 + $0xc8] ss:$12 sps:$4 sm:$0xff]   ;;  %v3034_v30 = vld [vmem:[%s3221_s18 + $0xc0] ss:$12 sps:$4 sm:$0xff]  }
  0x2c   : > { %795 = vmatpush1.bf16.msra.mxu1 %v3009_v11  ;;  %v3035_v31 = vld [vmem:[%s3221_s18 + $0xdc] ss:$12 sps:$4 sm:$0xff]   ;;  %v3037_v32 = vld [vmem:[%s3221_s18 + $0xe0] ss:$12 sps:$4 sm:$0xff]   ;;  %v3038_v33 = vld [vmem:[%s3221_s18 + $0xd8] ss:$12 sps:$4 sm:$0xff]  }
  0x2d   : > { %754 = vmatpush1.bf16.msra.mxu0 %v3010_v12  ;;  %796 = vmatprep.subr.bf16.mxu1 %v3095_v2  ;;  %v3039_v34 = vld [vmem:[%s3221_s18 + $0xf4] ss:$12 sps:$4 sm:$0xff]   ;;  %v3041_v35 = vld [vmem:[%s3221_s18 + $0xf8] ss:$12 sps:$4 sm:$0xff]   ;;  %v3042_v36 = vld [vmem:[%s3221_s18 + $0xf0] ss:$12 sps:$4 sm:$0xff]  }
  0x2e   : > { %755 = vmatprep.subr.bf16.mxu0 %v3011_v13  ;;  %v3043_v37 = vld [vmem:[%s3221_s18 + $0x10c] ss:$12 sps:$4 sm:$0xff]   ;;  %v3045_v38 = vld [vmem:[%s3221_s18 + $0x110] ss:$12 sps:$4 sm:$0xff]   ;;  %v3046_v39 = vld [vmem:[%s3221_s18 + $0x108] ss:$12 sps:$4 sm:$0xff]  }
  0x2f   : > { %v3047_v40 = vld [vmem:[%s3221_s18 + $0x124] ss:$12 sps:$4 sm:$0xff]   ;;  %v505_v41 = vld [vmem:[%s3221_s18 + $0x138] sm:$0xff]  ;;  %v3049_v42 = vld [vmem:[%s3221_s18 + $0x128] ss:$12 sps:$4 sm:$0xff]   ;;  %s3103_s17 = smov 126  }
  0x30   : > { %797 = vmatpush1.bf16.msra.mxu1 %v3013_v14  ;;  %v3050_v43 = vld [vmem:[%s3221_s18 + $0x120] ss:$12 sps:$4 sm:$0xff]   ;;  %v2822_v45 = vcombine.high %v505_v41, %v505_v41  ;;  %v2821_v46 = vcombine.low %v505_v41, %v505_v41  ;;  %s3105_s19 = smov 91   ;;  %s3106_s20 = smov 90  }
  0x31   : > { %756 = vmatpush1.bf16.msra.mxu0 %v3014_v15  ;;  %798 = vmatprep.subr.bf16.mxu1 %v3095_v2  ;;  %v3052_v44 = vld [vmem:[%s3221_s18 + $0x140] ss:$0 sps:$4 sm:$0xff]   ;;  %s3104_s18 = smov 92  }
  0x32   : > { %757 = vmatprep.subr.bf16.mxu0 %v3015_v16  ;;  %v747_v47 = vsel %vm739_vm1, %v3052_v44, 0  ;;  %v741_v48 = vsel %vm739_vm1, %v2821_v46, 0  ;;  %v3058_v46 = vld [vmem:[%s442_s28 + $0x4] ss:$12 sps:$4 sm:$0xff]   ;;  %v3061_v51 = vld [vmem:[%s442_s28 + $0x20] ss:$0 sps:$4 sm:$0xff]  }
  0x33   : > { %v886_v53 = vld [vmem:[%s3452_s4] sm:$0xf]  ;;  %v934_v54 = vsel %vm739_vm1, %v3061_v51, 0 }
  0x34   : > { %799 = vmatpush1.bf16.msra.mxu1 %v3017_v17 }
  0x35   : > { %758 = vmatpush1.bf16.msra.mxu0 %v3018_v18  ;;  %800 = vmatprep.subr.bf16.mxu1 %v3095_v2 }
  0x36   : > { %759 = vmatprep.subr.bf16.mxu0 %v3019_v19 }
  0x38   : > { %801 = vmatpush1.bf16.msra.mxu1 %v3021_v20 }
  0x39   : > { %760 = vmatpush1.bf16.msra.mxu0 %v3022_v21  ;;  %802 = vmatprep.subr.bf16.mxu1 %v3095_v2 }
  0x3a   : > { %761 = vmatprep.subr.bf16.mxu0 %v3023_v22 }
  0x3c   : > { %803 = vmatpush1.bf16.msra.mxu1 %v3025_v23 }
  0x3d   : > { %762 = vmatpush1.bf16.msra.mxu0 %v3026_v24  ;;  %804 = vmatprep.subr.bf16.mxu1 %v3095_v2 }
  0x3e   : > { %763 = vmatprep.subr.bf16.mxu0 %v3027_v25 }
  0x40   : > { %805 = vmatpush1.bf16.msra.mxu1 %v3029_v26 }
  0x41   : > { %764 = vmatpush1.bf16.msra.mxu0 %v3030_v27  ;;  %806 = vmatprep.subr.bf16.mxu1 %v3095_v2  ;;  %v3096_v27 = vmov 0.0  }
  0x42   : > { %765 = vmatprep.subr.bf16.mxu0 %v3031_v28  ;;  %1017 = vst [vmem:[#allocation2] sm:$0xff] %v3096_v27  ;;  %1020 = vst.msk [vmem:[#allocation2 + $0x10] sm:$0xff] %vm1019_vm3, %v3096_v27  ;;  %vm2006_vm3 = vcmask 752640  }
  0x44   : > { %807 = vmatpush1.bf16.msra.mxu1 %v3033_v29 }
  0x45   : > { %766 = vmatpush1.bf16.msra.mxu0 %v3034_v30  ;;  %808 = vmatprep.subr.bf16.mxu1 %v3095_v2 }
  0x46   : > { %767 = vmatprep.subr.bf16.mxu0 %v3035_v31 }
  0x48   : > { %809 = vmatpush1.bf16.msra.mxu1 %v3037_v32  ;;  %v879_v32 = vstv %s450_s23 }
  0x49   : > { %768 = vmatpush1.bf16.msra.mxu0 %v3038_v33  ;;  %810 = vmatprep.subr.bf16.mxu1 %v3095_v2 }
  0x4a   : > { %769 = vmatprep.subr.bf16.mxu0 %v3039_v34 }
  0x4c   : > { %811 = vmatpush1.bf16.msra.mxu1 %v3041_v35 }
  0x4d   : > { %770 = vmatpush1.bf16.msra.mxu0 %v3042_v36  ;;  %812 = vmatprep.subr.bf16.mxu1 %v3095_v2 }
  0x4e   : > { %771 = vmatprep.subr.bf16.mxu0 %v3043_v37 }
  0x50   : > { %813 = vmatpush1.bf16.msra.mxu1 %v3045_v38 }
  0x51   : > { %772 = vmatpush1.bf16.msra.mxu0 %v3046_v39  ;;  %814 = vmatprep.subr.bf16.mxu1 %v3095_v2 }
  0x52   : > { %773 = vmatprep.subr.bf16.mxu0 %v3047_v40 }
  0x54   : > { %815 = vmatpush1.bf16.msra.mxu1 %v3049_v42 }
  0x55   : > { %774 = vmatpush1.bf16.msra.mxu0 %v3050_v43  ;;  %816 = vmatprep.subr.bf16.mxu1 %v3095_v2 }
  0x56   : > { %2824 = vmatprep.subr.msk.bf16.mxu0 %vm739_vm1, %v2822_v45  ;;  %v3056_v45 = vld [vmem:[%s442_s28] ss:$12 sps:$4 sm:$0xff]  }
  0x58   : > { %817 = vmatpush1.bf16.msra.mxu1 %v747_v47  ;;  %v3059_v47 = vld [vmem:[%s442_s28 + $0x8] ss:$12 sps:$4 sm:$0xff]  }
  0x59   : > { %776 = vmatpush1.bf16.msra.mxu0 %v741_v48  ;;  %2889 = vmatprep.subr.bf16.mxu1 %v3096_v27  ;;  %v891_v48 = vld [vmem:[%s442_s28 + $0x18] sm:$0xff] }
  0x5a   : > { %936 = vmatprep.subr.bf16.mxu0 %v3058_v46  ;;  %v2830_v50 = vcombine.low %v891_v48, %v891_v48  ;;  %v2859_v46 = vld [vmem:[%s3454_s6 + $0x40] sm:$0xff] }
  0x5b   : > { %823 = vmatmul.mubr.bf16.vlgmr.msra.gmra.mrb[0].mxu1 %v2780_v49 }
  0x5c   : > { %782 = vmatmul.mubr.bf16.vlgmr.msra.gmra.mrb[0].mxu0 %v2780_v49  ;;  %2890 = vmatpush3.bf16.msra.mxu1 %v3059_v47  ;;  %v2831_v49 = vcombine.high %v891_v48, %v891_v48  ;;  %v928_v52 = vsel %vm739_vm1, %v2830_v50, 0 }
  0x5d   : > { %968 = vmatprep.mubr.bf16.mxu0 %v3095_v2  ;;  %937 = vmatpush1.bf16.msra.mxu0 %v3056_v45 }
  0x5e   : > { %2891 = vmatprep.subr.bf16.mxu1 %v3096_v27  ;;  %2833 = vmatprep.subr.msk.bf16.mxu0 %vm739_vm1, %v2831_v49  ;;  %vm1845_vm1 = vcmask 883712  }
  0x5f   : > { %2893 = vmatprep.mubr.msk.bf16.mxu1 %vm3098_vm8, %v3096_v27 }
  0x60   : > { %2892 = vmatpush3.bf16.msra.mxu1 %v934_v54 }
  0x61   : > { %939 = vmatpush1.bf16.msra.mxu0 %v928_v52  ;;  %2897 = vmatprep.subr.mxu1 %v3096_v27 }
  0x63   : > { %2894 = vmatmul.mubr.msk.bf16.vlgmr.msra.gmra.mrb[4].mxu1 %vm923_vm7, %v886_v53 }
  0x64   : > { %2834 = vmatmul.mubr.msk.bf16.vlgmr.msra.gmra.mrb[4].mxu0 %vm923_vm7, %v886_v53  ;;  %2899 = vmatprep.mubr.msk.f32.mxu1 %vm3098_vm8, %v3096_v27 }
  0x65   : > { %1133 = vmatprep.mubr.f32.mxu0 %v3096_v27 }
  0x9e   : > { %v511_v56 = vpop.permute.xlu0 %510 }
 0x12e   : > { %v824_v58 = vpop.f32.mrb[0].mxu1 }
 0x12f   : > { %v825_v60 = vadd.f32 %v824_v58, %v511_v56  ;;  %v783_v61 = vpop.f32.mrb[0].mxu0  ;;  %v826_v62 = vpop.f32.mrb[1].mxu1 }
 0x130   : > { %v784_v0 = vadd.f32 %v783_v61, %v511_v56  ;;  %v785_v1 = vpop.f32.mrb[1].mxu0  ;;  %v827_v2 = vpop.f32.mrb[2].mxu1 }
 0x131   : > { %v786_v3 = vadd.f32 %v785_v1, %v511_v56  ;;  %v787_v4 = vpop.f32.mrb[2].mxu0  ;;  %v828_v5 = vpop.f32.mrb[3].mxu1  ;;  %v848_v6 = vmul.f32 %v3286_v57, %v825_v60  ;;  %v2481_v1 = vld [vmem:[%s3455_s7] sm:$0xff] }
 0x132   : > { %v846_v7 = vmul.f32 %v3288_v59, %v784_v0  ;;  %v788_v8 = vpop.f32.mrb[3].mxu0  ;;  %v2836_v5 = vld [vmem:[%s3454_s6 + $0x8] sm:$0xff] }
 0x133   : > { %v847_v9 = vmul.f32 %v3290_v63, %v786_v3  ;;  %v851_v10 = vsel %vm850_vm2, %v848_v6, 0.0 }
 0x135   : > { %v849_v11 = vadd.f32 %v847_v9, %v846_v7  ;;  %v1044_v9 = vld [vmem:[%s3454_s6] sm:$0xff] }
 0x137   : > { %v852_v12 = vadd.f32 %v851_v10, %v849_v11  ;;  %v3413_v52 = vpop.f32.mrb[4].mxu0 }
 0x138   : > { %v3415_v53 = vpop.f32.mrb[5].mxu0 }
 0x139   : > { %853 = vadd.xlane.f32.xlu0 %v852_v12  ;;  %v974_v54 = vpop.f32.mrb[6].mxu0 }
 0x1c6   : > { %v854_v13 = vpop.xlane.xlu0 %853 }
 0x1c7   : > { %v855_v14 = vmul.f32 0.00390625, %v854_v13  ;;  %v2841_v13 = vld [vmem:[%s3454_s6 + $0x10] sm:$0xff] }
 0x1c9   : > { %v856_v15 = vsub.f32 %v784_v0, %v855_v14  ;;  %v857_v16 = vsub.f32 %v786_v3, %v855_v14  ;;  %v858_v17 = vsub.f32 %v825_v60, %v855_v14 }
 0x1cb   : > { %v859_v18 = vmul.f32 %v856_v15, %v3288_v59  ;;  %v860_v19 = vmul.f32 %v857_v16, %v3290_v63  ;;  %v861_v20 = vmul.f32 %v858_v17, %v3286_v57 }
 0x1cd   : > { %v862_v21 = vmul.f32 %v859_v18, %v859_v18  ;;  %v863_v22 = vmul.f32 %v860_v19, %v860_v19  ;;  %v864_v23 = vmul.f32 %v861_v20, %v861_v20  ;;  %v2844_v20 = vld [vmem:[%s3454_s6 + $0x18] sm:$0xff] }
 0x1cf   : > { %v865_v24 = vadd.f32 %v863_v22, %v862_v21  ;;  %v866_v25 = vsel %vm850_vm2, %v864_v23, 0.0 }
 0x1d1   : > { %v867_v26 = vadd.f32 %v866_v25, %v865_v24  ;;  %v2847_v25 = vld [vmem:[%s3454_s6 + $0x20] sm:$0xff] }
 0x1d3   : > { %868 = vadd.xlane.f32.xlu1 %v867_v26 }
 0x260   : > { %v869_v28 = vpop.xlane.xlu1 %868 }
 0x261   : > { %v870_v29 = vmul.f32 0.00390625, %v869_v28 }
 0x263   : > { %v871_v30 = vadd.f32 1e-05, %v870_v29 }
 0x265   : > { %3063 = vrsqrt.f32 %v871_v30 }
 0x26f   : > { %v3064_v31 = vpop.eup %3063 }
 0x270   : > { %v873_v33 = vmul.f32 %v3064_v31, %v856_v15  ;;  %v874_v34 = vmul.f32 %v3064_v31, %v857_v16  ;;  %v875_v37 = vmul.f32 %v3064_v31, %v858_v17 }
 0x272   : > { %vm876_vm4 = vcmp.ge.f32.partialorder %v873_v33, 0.0  ;;  %v880_v35 = vmul.f32 %v879_v32, %v873_v33  ;;  %v881_v36 = vmul.f32 %v879_v32, %v874_v34  ;;  %vm877_vm5 = vcmp.ge.f32.partialorder %v874_v34, 0.0 }
 0x273   : > { %v882_v41 = vmul.f32 %v879_v32, %v875_v37  ;;  %vm878_vm6 = vcmp.ge.f32.partialorder %v875_v37, 0.0  ;;  %v2850_v32 = vld [vmem:[%s3454_s6 + $0x28] sm:$0xff] }
 0x274   : > { %v883_v38 = vsel %vm876_vm4, %v873_v33, %v880_v35  ;;  %v884_v40 = vsel %vm877_vm5, %v874_v34, %v881_v36  ;;  %vm2167_vm4 = vcmask 744448   ;;  %vm2328_vm5 = vcmask 736256  }
 0x275   : > { %v1021_v39 = vmul.f32 %v883_v38, %v3288_v59  ;;  %v1022_v42 = vmul.f32 %v884_v40, %v3290_v63  ;;  %v885_v43 = vsel %vm878_vm6, %v875_v37, %v882_v41  ;;  %v2853_v37 = vld [vmem:[%s3454_s6 + $0x30] sm:$0xff]  ;;  %v2856_v41 = vld [vmem:[%s3454_s6 + $0x38] sm:$0xff] }
 0x276   : > { %v1023_v44 = vmul.f32 %v885_v43, %v3286_v57 }
 0x277   : > { %1027 = vrot.lane.b32.xlu1 %v1021_v39, %s3097_s24 }
 0x27b   : > { %1029 = vrot.lane.b32.xlu1 %v1022_v42, %s3097_s24 }
 0x27f   : > { %1031 = vrot.lane.b32.xlu1 %v1023_v44, %s3097_s24 }
 0x2e9   : > { %v1028_v55 = vpop.permute.xlu1 %1027 }
 0x2ea   : > { %1040 = vst.msk [vmem:[#allocation2] sm:$0xff] %vm1039_vm9, %v1028_v55 }
 0x2ed   : > { %v1030_v56 = vpop.permute.xlu1 %1029 }
 0x2ee   : > { %v1034_v58 = vsel %vm1033_vm10, %v1028_v55, %v1030_v56  ;;  %v3417_v55 = vpop.f32.mrb[4].mxu1 }
 0x2ef   : > { %1055 = vrot.lane.b32.xlu1 %v1034_v58, %s3099_s13 }
 0x2f1   : > { %v1032_v60 = vpop.permute.xlu1 %1031  ;;  %v1045_v61 = vld [vmem:[#allocation2] sm:$0xff] }
 0x2f2   : > { %v1035_v62 = vsel %vm1033_vm10, %v1030_v56, %v1032_v60  ;;  %1053 = vrot.lane.b32.xlu0 %v1045_v61, %s3099_s13  ;;  %v975_v56 = vpop.f32.mrb[7].mxu0 }
 0x2f3   : > { %1043 = vst.msk [vmem:[#allocation2 + $0x10] sm:$0xff] %vm1042_vm11, %v1035_v62 }
 0x2f6   : > { %1517 = vrot.lane.b32.xlu0 %v1045_v61, %s3100_s14 }
 0x2fa   : > { %v1047_v0 = vld [vmem:[#allocation2 + $0x10] sm:$0xff] }
 0x2fb   : > { %1682 = vrot.lane.b32.xlu0 %v1047_v0, %s3101_s15  ;;  %1057 = vrot.lane.b32.xlu1 %v1047_v0, %s3099_s13  ;;  %s2779_s13 = sld [smem:[#allocation3 + $0x1]] }
 0x2ff   : > { %1841 = vrot.lane.b32.xlu0 %v1034_v58, %s3102_s16  ;;  %1356 = vrot.lane.b32.xlu1 %v1045_v61, %s3103_s17 }
 0x303   : > { %1839 = vrot.lane.b32.xlu0 %v1045_v61, %s3102_s16  ;;  %1358 = vrot.lane.b32.xlu1 %v1034_v58, %s3103_s17 }
 0x307   : > { %2004 = vrot.lane.b32.xlu0 %v1047_v0, %s3104_s18  ;;  %1360 = vrot.lane.b32.xlu1 %v1047_v0, %s3103_s17 }
 0x30b   : > { %2163 = vrot.lane.b32.xlu0 %v1034_v58, %s3105_s19  ;;  %1519 = vrot.lane.b32.xlu1 %v1034_v58, %s3100_s14 }
 0x30f   : > { %2161 = vrot.lane.b32.xlu0 %v1045_v61, %s3105_s19  ;;  %1521 = vrot.lane.b32.xlu1 %v1047_v0, %s3100_s14 }
 0x313   : > { %2326 = vrot.lane.b32.xlu0 %v1047_v0, %s3106_s20  ;;  %1680 = vrot.lane.b32.xlu1 %v1034_v58, %s3101_s15 }
 0x317   : > { %2484 = vperm.xlu0 %2997, %v2481_v1   ;;  %1678 = vrot.lane.b32.xlu1 %v1045_v61, %s3101_s15 }
 0x31b   : > { %1843 = vrot.lane.b32.xlu1 %v1047_v0, %s3102_s16  ;;  %s2965_s16 = smul.u32 12, %s3463_s22 }
 0x31f   : > { %2002 = vrot.lane.b32.xlu1 %v1034_v58, %s3104_s18 }
 0x323   : > { %2000 = vrot.lane.b32.xlu1 %v1045_v61, %s3104_s18 }
 0x327   : > { %2165 = vrot.lane.b32.xlu1 %v1047_v0, %s3105_s19  ;;  %s447_s19 = scalar_lea.vmem %s3460_s12, %s2965_s16 }
 0x32b   : > { %2324 = vrot.lane.b32.xlu1 %v1034_v58, %s3106_s20 }
 0x32f   : > { %2322 = vrot.lane.b32.xlu1 %v1045_v61, %s3106_s20 }
 0x361   : > { %v1056_v2 = vpop.permute.xlu1 %1055 }
 0x364   : > { %v1054_v3 = vpop.permute.xlu0 %1053 }
 0x365   : > { %v1060_v7 = vsel %vm1059_vm12, %v1054_v3, %v1056_v2 }
 0x368   : > { %v1518_v10 = vpop.permute.xlu0 %1517 }
 0x36d   : > { %v1058_v4 = vpop.permute.xlu1 %1057  ;;  %v1683_v12 = vpop.permute.xlu0 %1682 }
 0x36e   : > { %2898 = vmatpush3.msra.mxu1 %v1058_v4  ;;  %v1061_v6 = vsel %vm1059_vm12, %v1056_v2, %v1058_v4 }
 0x36f   : > { %1069 = vmatprep.subr.mxu0 %v1061_v6  ;;  %2902 = vmatprep.subr.mxu1 %v3096_v27 }
 0x370   : > { %1070 = vmatpush1.msra.mxu0 %v1060_v7  ;;  %2900 = vmatmul.mubr.msk.f32.vlgmr.msra.gmra.mrb[8].mxu1 %vm1065_vm13, %v2836_v5 }
 0x371   : > { %2903 = vmatpush3.msra.mxu1 %v1047_v0  ;;  %2837 = vmatmul.mubr.msk.f32.vlgmr.msra.gmra.mrb[8].mxu0 %vm1065_vm13, %v2836_v5  ;;  %v1357_v8 = vpop.permute.xlu1 %1356  ;;  %v1842_v18 = vpop.permute.xlu0 %1841 }
 0x372   : > { %1213 = vmatprep.subr.mxu0 %v1034_v58  ;;  %1277 = vmatprep.mubr.f32.mxu0 %v3096_v27  ;;  %v2895_v58 = vpop.f32.mrb[5].mxu1 }
 0x373   : > { %1214 = vmatpush1.msra.mxu0 %v1045_v61  ;;  %2904 = vmatprep.mubr.msk.f32.mxu1 %vm3098_vm8, %v3096_v27  ;;  %v1014_v60 = vpop.f32.mrb[6].mxu1  ;;  %v2522_v58 = vstv %s2779_s13 }
 0x374   : > { %2907 = vmatprep.subr.mxu1 %v3096_v27  ;;  %2905 = vmatmul.mubr.msk.f32.vlgmr.msra.gmra.mrb[10].mxu1 %vm1065_vm13, %v1044_v9  ;;  %v2896_v61 = vpop.f32.mrb[7].mxu1 }
 0x375   : > { %v1359_v11 = vpop.permute.xlu1 %1358  ;;  %2909 = vmatprep.mubr.msk.f32.mxu1 %vm3098_vm8, %v3096_v27  ;;  %v1840_v23 = vpop.permute.xlu0 %1839 }
 0x376   : > { %v1363_v16 = vsel %vm1362_vm14, %v1357_v8, %v1359_v11  ;;  %v1846_v35 = vsel %vm1845_vm1, %v1840_v23, %v1842_v18 }
 0x379   : > { %2839 = vmatmul.mubr.msk.f32.vlgmr.msra.gmra.mrb[8].mxu0 %vm1065_vm13, %v1044_v9  ;;  %v1361_v14 = vpop.permute.xlu1 %1360  ;;  %v2005_v29 = vpop.permute.xlu0 %2004 }
 0x37a   : > { %2908 = vmatpush3.msra.mxu1 %v1361_v14  ;;  %v1364_v15 = vsel %vm1362_vm14, %v1359_v11, %v1361_v14  ;;  %1435 = vmatprep.mubr.f32.mxu0 %v3096_v27 }
 0x37b   : > { %1371 = vmatprep.subr.mxu0 %v1364_v15  ;;  %2910 = vmatmul.mubr.msk.f32.vlgmr.msra.gmra.mrb[12].mxu1 %vm1065_vm13, %v2841_v13 }
 0x37c   : > { %1372 = vmatpush1.msra.mxu0 %v1363_v16  ;;  %2912 = vmatprep.subr.mxu1 %v3096_v27 }
 0x37d   : > { %v1520_v17 = vpop.permute.xlu1 %1519  ;;  %2914 = vmatprep.mubr.msk.f32.mxu1 %vm3098_vm8, %v3096_v27  ;;  %v2164_v34 = vpop.permute.xlu0 %2163 }
 0x37e   : > { %v1524_v22 = vsel %vm1523_vm15, %v1518_v10, %v1520_v17 }
 0x381   : > { %2842 = vmatmul.mubr.msk.f32.vlgmr.msra.gmra.mrb[8].mxu0 %vm1065_vm13, %v2841_v13  ;;  %v1522_v19 = vpop.permute.xlu1 %1521  ;;  %v2162_v40 = vpop.permute.xlu0 %2161 }
 0x382   : > { %2913 = vmatpush3.msra.mxu1 %v1522_v19  ;;  %v1525_v21 = vsel %vm1523_vm15, %v1520_v17, %v1522_v19  ;;  %1596 = vmatprep.mubr.f32.mxu0 %v3096_v27  ;;  %v2168_v48 = vsel %vm2167_vm4, %v2162_v40, %v2164_v34 }
 0x383   : > { %1532 = vmatprep.subr.mxu0 %v1525_v21  ;;  %2917 = vmatprep.subr.mxu1 %v3096_v27 }
 0x384   : > { %1533 = vmatpush1.msra.mxu0 %v1524_v22  ;;  %2915 = vmatmul.mubr.msk.f32.vlgmr.msra.gmra.mrb[14].mxu1 %vm1065_vm13, %v2844_v20 }
 0x385   : > { %2918 = vmatpush3.msra.mxu1 %v1683_v12  ;;  %v1681_v24 = vpop.permute.xlu1 %1680  ;;  %2919 = vmatprep.mubr.msk.f32.mxu1 %vm3098_vm8, %v3096_v27  ;;  %v2327_v45 = vpop.permute.xlu0 %2326 }
 0x386   : > { %v1686_v26 = vsel %vm1684_vm0, %v1681_v24, %v1683_v12  ;;  %2922 = vmatprep.subr.mxu1 %v3096_v27 }
 0x387   : > { %1693 = vmatprep.subr.mxu0 %v1686_v26 }
 0x388   : > { %2920 = vmatmul.mubr.msk.f32.vlgmr.msra.gmra.mrb[16].mxu1 %vm1065_vm13, %v2847_v25 }
 0x389   : > { %2845 = vmatmul.mubr.msk.f32.vlgmr.msra.gmra.mrb[8].mxu0 %vm1065_vm13, %v2844_v20  ;;  %v1679_v28 = vpop.permute.xlu1 %1678  ;;  %2924 = vmatprep.mubr.msk.f32.mxu1 %vm3098_vm8, %v3096_v27 }
 0x38a   : > { %v1685_v30 = vsel %vm1684_vm0, %v1679_v28, %v1681_v24  ;;  %1757 = vmatprep.mubr.f32.mxu0 %v3096_v27 }
 0x38b   : > { %1694 = vmatpush1.msra.mxu0 %v1685_v30 }
 0x38d   : > { %v1844_v31 = vpop.permute.xlu1 %1843 }
 0x38e   : > { %2923 = vmatpush3.msra.mxu1 %v1844_v31  ;;  %v1847_v33 = vsel %vm1845_vm1, %v1842_v18, %v1844_v31 }
 0x38f   : > { %1854 = vmatprep.subr.mxu0 %v1847_v33  ;;  %2927 = vmatprep.subr.mxu1 %v3096_v27 }
 0x390   : > { %2925 = vmatmul.mubr.msk.f32.vlgmr.msra.gmra.mrb[18].mxu1 %vm1065_vm13, %v2850_v32 }
 0x391   : > { %2928 = vmatpush3.msra.mxu1 %v2005_v29  ;;  %2848 = vmatmul.mubr.msk.f32.vlgmr.msra.gmra.mrb[8].mxu0 %vm1065_vm13, %v2847_v25  ;;  %v2003_v36 = vpop.permute.xlu1 %2002 }
 0x392   : > { %1855 = vmatpush1.msra.mxu0 %v1846_v35  ;;  %v2008_v38 = vsel %vm2006_vm3, %v2003_v36, %v2005_v29  ;;  %2929 = vmatprep.mubr.msk.f32.mxu1 %vm3098_vm8, %v3096_v27 }
 0x393   : > { %2015 = vmatprep.subr.mxu0 %v2008_v38  ;;  %1918 = vmatprep.mubr.f32.mxu0 %v3096_v27 }
 0x394   : > { %2930 = vmatmul.mubr.msk.f32.vlgmr.msra.gmra.mrb[20].mxu1 %vm1065_vm13, %v2853_v37  ;;  %2932 = vmatprep.subr.mxu1 %v3096_v27 }
 0x395   : > { %v2001_v39 = vpop.permute.xlu1 %2000  ;;  %2934 = vmatprep.mubr.msk.f32.mxu1 %vm3098_vm8, %v3096_v27 }
 0x396   : > { %v2007_v42 = vsel %vm2006_vm3, %v2001_v39, %v2003_v36  ;;  %v2485_v24 = vpop.permute.xlu0 %2484 }
 0x399   : > { %2851 = vmatmul.mubr.msk.f32.vlgmr.msra.gmra.mrb[8].mxu0 %vm1065_vm13, %v2850_v32  ;;  %v2166_v43 = vpop.permute.xlu1 %2165 }
 0x39a   : > { %2016 = vmatpush1.msra.mxu0 %v2007_v42  ;;  %2933 = vmatpush3.msra.mxu1 %v2166_v43  ;;  %v2169_v44 = vsel %vm2167_vm4, %v2164_v34, %v2166_v43 }
 0x39b   : > { %2176 = vmatprep.subr.mxu0 %v2169_v44  ;;  %2935 = vmatmul.mubr.msk.f32.vlgmr.msra.gmra.mrb[22].mxu1 %vm1065_vm13, %v2856_v41 }
 0x39c   : > { %2937 = vmatprep.subr.mxu1 %v3096_v27  ;;  %2939 = vmatprep.mubr.msk.f32.mxu1 %vm3098_vm8, %v3096_v27 }
 0x39d   : > { %2938 = vmatpush3.msra.mxu1 %v2327_v45  ;;  %2079 = vmatprep.mubr.f32.mxu0 %v3096_v27  ;;  %v2325_v47 = vpop.permute.xlu1 %2324 }
 0x39e   : > { %2942 = vmatprep.subr.mxu1 %v3096_v27  ;;  %v2330_v49 = vsel %vm2328_vm5, %v2325_v47, %v2327_v45 }
 0x39f   : > { %2940 = vmatmul.mubr.msk.f32.vlgmr.msra.gmra.mrb[24].mxu1 %vm1065_vm13, %v2859_v46 }
 0x3a0   : > { %2944 = vmatprep.mubr.msk.f32.mxu1 %vm3098_vm8, %v3096_v27  ;;  %vm2688_vm8 = vcmask 256000  }
 0x3a1   : > { %2854 = vmatmul.mubr.msk.f32.vlgmr.msra.gmra.mrb[8].mxu0 %vm1065_vm13, %v2853_v37  ;;  %v2323_v50 = vpop.permute.xlu1 %2322 }
 0x3a2   : > { %2177 = vmatpush1.msra.mxu0 %v2168_v48  ;;  %2240 = vmatprep.mubr.f32.mxu0 %v3096_v27  ;;  %v2329_v51 = vsel %vm2328_vm5, %v2323_v50, %v2325_v47 }
 0x3a3   : > { %2337 = vmatprep.subr.mxu0 %v2330_v49 }
 0x3a9   : > { %2857 = vmatmul.mubr.msk.f32.vlgmr.msra.gmra.mrb[8].mxu0 %vm1065_vm13, %v2856_v41 }
 0x3aa   : > { %2338 = vmatpush1.msra.mxu0 %v2329_v51  ;;  %2401 = vmatprep.mubr.f32.mxu0 %v3096_v27  ;;  %v893_v51 = vld [vmem:[%s3453_s5] sm:$0xff] }
 0x3b1   : > { %2860 = vmatmul.mubr.msk.f32.vlgmr.msra.gmra.mrb[8].mxu0 %vm1065_vm13, %v2859_v46 }
 0x3b2   : > { %2606 = vmatprep.mubr.f32.mxu0 %v3096_v27 }
 0x443   : > { %v1206_v62 = vpop.f32.mrb[8].mxu1 }
 0x444   : > { %v2901_v0 = vpop.f32.mrb[9].mxu1 }
 0x447   : > { %v1350_v1 = vpop.f32.mrb[10].mxu1 }
 0x448   : > { %v1351_v2 = vadd.f32 %v1350_v1, %v1206_v62  ;;  %v2906_v3 = vpop.f32.mrb[11].mxu1 }
 0x44e   : > { %v1508_v4 = vpop.f32.mrb[12].mxu1 }
 0x44f   : > { %v1514_v5 = vadd.f32 %v1508_v4, %v1351_v2  ;;  %v2911_v6 = vpop.f32.mrb[13].mxu1 }
 0x457   : > { %v1669_v27 = vpop.f32.mrb[14].mxu1 }
 0x458   : > { %v1675_v7 = vadd.f32 %v1669_v27, %v1514_v5  ;;  %v2916_v8 = vpop.f32.mrb[15].mxu1 }
 0x45b   : > { %v1830_v9 = vpop.f32.mrb[16].mxu1 }
 0x45c   : > { %v1836_v10 = vadd.f32 %v1830_v9, %v1675_v7  ;;  %v2921_v11 = vpop.f32.mrb[17].mxu1 }
 0x463   : > { %v1991_v12 = vpop.f32.mrb[18].mxu1 }
 0x464   : > { %v1997_v13 = vadd.f32 %v1991_v12, %v1836_v10  ;;  %v2926_v14 = vpop.f32.mrb[19].mxu1  ;;  %v2532_v12 = vld [vmem:[%s3458_s10] sm:$0x7] }
 0x467   : > { %v2152_v15 = vpop.f32.mrb[20].mxu1 }
 0x468   : > { %v2158_v16 = vadd.f32 %v2152_v15, %v1997_v13  ;;  %v2931_v17 = vpop.f32.mrb[21].mxu1 }
 0x46e   : > { %v2313_v18 = vpop.f32.mrb[22].mxu1 }
 0x46f   : > { %v2319_v19 = vadd.f32 %v2313_v18, %v2158_v16  ;;  %v2936_v20 = vpop.f32.mrb[23].mxu1 }
 0x472   : > { %v2474_v21 = vpop.f32.mrb[24].mxu1 }
 0x473   : > { %v2480_v22 = vadd.f32 %v2474_v21, %v2319_v19  ;;  %v2941_v23 = vpop.f32.mrb[25].mxu1 }
 0x475   : > { %v2489_v25 = vadd.f32 %v2485_v24, %v2480_v22 }
 0x477   : > { %v2492_v32 = vmul.f32 %v2489_v25, %v3286_v57 }
 0x479   : > { %v2494_v35 = vsel %vm850_vm2, %v2492_v32, 0.0 }
 0x484   : > { %v2403_v26 = vpop.f32.mrb[8].mxu0 }
 0x485   : > { %v2487_v28 = vadd.f32 %v2485_v24, %v2403_v26  ;;  %v2405_v29 = vpop.f32.mrb[9].mxu0 }
 0x486   : > { %v2488_v30 = vadd.f32 %v2485_v24, %v2405_v29 }
 0x487   : > { %v2490_v31 = vmul.f32 %v2487_v28, %v3288_v59 }
 0x488   : > { %v2491_v33 = vmul.f32 %v2488_v30, %v3290_v63 }
 0x48a   : > { %v2493_v34 = vadd.f32 %v2491_v33, %v2490_v31 }
 0x48c   : > { %v2495_v36 = vadd.f32 %v2494_v35, %v2493_v34 }
 0x48e   : > { %2496 = vadd.xlane.f32.xlu1 %v2495_v36 }
 0x51b   : > { %v2497_v37 = vpop.xlane.xlu1 %2496 }
 0x51c   : > { %v2498_v38 = vmul.f32 0.00390625, %v2497_v37 }
 0x51e   : > { %v2499_v39 = vsub.f32 %v2487_v28, %v2498_v38  ;;  %v2500_v40 = vsub.f32 %v2488_v30, %v2498_v38  ;;  %v2501_v41 = vsub.f32 %v2489_v25, %v2498_v38 }
 0x520   : > { %v2502_v42 = vmul.f32 %v2499_v39, %v3288_v59  ;;  %v2503_v43 = vmul.f32 %v2500_v40, %v3290_v63  ;;  %v2504_v44 = vmul.f32 %v2501_v41, %v3286_v57  ;;  %v2533_v59 = vld [vmem:[%s3459_s11] sm:$0x7] }
 0x521   : > { %2536 = vperm.xlu1 %2998, %v2533_v59  }
 0x522   : > { %v2505_v45 = vmul.f32 %v2502_v42, %v2502_v42  ;;  %v2506_v46 = vmul.f32 %v2503_v43, %v2503_v43  ;;  %v2507_v47 = vmul.f32 %v2504_v44, %v2504_v44 }
 0x524   : > { %v2508_v48 = vadd.f32 %v2506_v46, %v2505_v45  ;;  %v2509_v49 = vsel %vm850_vm2, %v2507_v47, 0.0 }
 0x526   : > { %v2510_v50 = vadd.f32 %v2509_v49, %v2508_v48 }
 0x528   : > { %2511 = vadd.xlane.f32.xlu0 %v2510_v50 }
 0x53e   : > { %896 = vperm.xlu0 %2997, %v893_v51  }
 0x5b5   : > { %v2512_v63 = vpop.xlane.xlu0 %2511 }
 0x5b6   : > { %v2513_v57 = vmul.f32 0.00390625, %v2512_v63 }
 0x5b8   : > { %v2514_v54 = vadd.f32 1e-05, %v2513_v57 }
 0x5ba   : > { %3065 = vrsqrt.f32 %v2514_v54 }
 0x5bd   : > { %v897_v0 = vpop.permute.xlu0 %896 }
 0x5be   : > { %v971_v4 = vadd.f32 %v3413_v52, %v897_v0  ;;  %v973_v6 = vadd.f32 %v3415_v53, %v897_v0  ;;  %v1012_v27 = vadd.f32 %v3417_v55, %v897_v0  ;;  %v2537_v52 = vpop.permute.xlu1 %2536 }
 0x5c4   : > { %v3066_v56 = vpop.eup %3065 }
 0x5c5   : > { %v2516_v60 = vmul.f32 %v3066_v56, %v2499_v39  ;;  %v2517_v61 = vmul.f32 %v3066_v56, %v2500_v40  ;;  %v2518_v62 = vmul.f32 %v3066_v56, %v2501_v41 }
 0x5c7   : > { %vm2519_vm2 = vcmp.ge.f32.partialorder %v2516_v60, 0.0  ;;  %vm2520_vm6 = vcmp.ge.f32.partialorder %v2517_v61, 0.0  ;;  %vm2521_vm7 = vcmp.ge.f32.partialorder %v2518_v62, 0.0  ;;  %v2523_v1 = vmul.f32 %v2522_v58, %v2516_v60 }
 0x5c8   : > { %v2524_v2 = vmul.f32 %v2522_v58, %v2517_v61  ;;  %v2525_v3 = vmul.f32 %v2522_v58, %v2518_v62 }
 0x5c9   : > { %v2526_v5 = vsel %vm2519_vm2, %v2516_v60, %v2523_v1 }
 0x5ca   : > { %v2527_v7 = vsel %vm2520_vm6, %v2517_v61, %v2524_v2  ;;  %v2528_v8 = vsel %vm2521_vm7, %v2518_v62, %v2525_v3  ;;  %v2529_v9 = vadd.f32 %v2526_v5, %v971_v4 }
 0x5cb   : > { %v2530_v10 = vadd.f32 %v2527_v7, %v973_v6  ;;  %v2531_v11 = vadd.f32 %v2528_v8, %v1012_v27 }
 0x5cd   : > { %2542 = vmatprep.subr.mxu0 %v2530_v10  ;;  %2943 = vmatpush3.msra.mxu1 %v2531_v11 }
 0x5ce   : > { %2543 = vmatpush1.msra.mxu0 %v2529_v9  ;;  %2945 = vmatmul.mubr.msk.f32.vlgmr.msra.gmra.mrb[26].mxu1 %vm1065_vm13, %v2532_v12 }
 0x5cf   : > { %2862 = vmatmul.mubr.msk.f32.vlgmr.msra.gmra.mrb[10].mxu0 %vm1065_vm13, %v2532_v12 }
 0x6a1   : > { %v2679_v53 = vpop.f32.mrb[26].mxu1 }
 0x6a2   : > { %v2608_v55 = vpop.f32.mrb[10].mxu0  ;;  %v2680_v13 = vadd.f32 %v2679_v53, %v2537_v52  ;;  %v2946_v14 = vpop.f32.mrb[27].mxu1 }
 0x6a3   : > { %v2610_v15 = vpop.f32.mrb[11].mxu0  ;;  %v2609_v16 = vadd.f32 %v2608_v55, %v2537_v52 }
 0x6a4   : > { %v2611_v17 = vadd.f32 %v2610_v15, %v2537_v52  ;;  %2689 = vst.msk [vmem:[%s447_s19 + $0x8] sm:$0x7] %vm2688_vm8, %v2680_v13 }
 0x6a6   : > { %v2685_v18 = vcombine.low %v2609_v16, %v2611_v17 }
 0x6a8   : > { %2687 = vst [vmem:[%s447_s19] sm:$0x77] %v2685_v18 }
 0x6a9 PF: > { %s23_s21 = sadd.s32 1, %s3092_s21  }
 0x6aa   : > { %p20_p1 = scmp.ge.s32.totalorder %s23_s21, 4  }
 0x6ac   :  { %22 = sbr.rel (!%p20_p1) target bundleno = 1 (0x1), region = 114 }
 0x6b3   :  { %2711 = vsyncpa [#allocation4], 1 }
 0x6b4   :  { %2713 = vsyncpa [#allocation4 + $0x1], 1 }

</bundles_post_ra>
